<compile_context>
chip_gen: v7x
topology: tpu7x:2x2x1
jax: 0.10.0
libtpu: 0.0.40
codegen_flags: <defaults>
</compile_context>

<pallas_src>
import jax
import jax.numpy as jnp
from jax.experimental import pallas as pl
from jax.experimental.pallas import tpu as pltpu

# ---------------- configuration (small shapes, same structure as defaults) ---
EMB_SIZE = 64          # emb_size (PyTorch default 144; kept small per task)
HEADS = 4
DIM_HEAD = EMB_SIZE // HEADS
FF_MULT = 4
EXP_FAC = 2
KERNEL_SIZE = 31
PAD_L = KERNEL_SIZE // 2          # "same" padding (15, 15) for K=31
N_ENCODERS = 2
MAX_POS_EMB = 512                 # lucidrains Attention default
LN_EPS = 1e-5
BN_EPS = 1e-5
ATTN_SCALE = DIM_HEAD ** -0.5


# ------------------------------ in-kernel helpers -----------------------------
def _layernorm(x, ln):
    """x: (m, c) f32, ln: (2, c) [gamma; beta]."""
    mu = jnp.mean(x, axis=-1, keepdims=True)
    xc = x - mu
    var = jnp.mean(xc * xc, axis=-1, keepdims=True)
    return xc * jax.lax.rsqrt(var + LN_EPS) * ln[0:1, :] + ln[1:2, :]


def _mm_bf16(a, w_bf16):
    """Lane-dense matmul: bf16 operands on the MXU, f32 accumulation."""
    return jnp.dot(a.astype(jnp.bfloat16), w_bf16,
                   preferred_element_type=jnp.float32)


# ------------------------- fused conformer-block kernel -----------------------
def conformer_block_kernel(
        x_ref,
        ff1_ln, ff1_w1, ff1_b1, ff1_w2, ff1_b2,
        attn_ln, attn_wqkv, attn_wo, attn_bo, rel_ref,
        conv_ln, conv_w1, conv_b1, dw_w, dw_b, bn_ss, conv_w2, conv_b2,
        ff2_ln, ff2_w1, ff2_b1, ff2_w2, ff2_b2,
        post_ln,
        o_ref,
        pad_ref):
    n, d = x_ref.shape
    x = x_ref[...].astype(jnp.float32)

    # ---- x = 0.5 * FF1(LN(x)) + x  (fused) -----------------------------------
    h = _layernorm(x, ff1_ln[...])
    h = _mm_bf16(h, ff1_w1[...]) + ff1_b1[...]
    h = h * jax.nn.sigmoid(h)                         # Swish
    h = _mm_bf16(h, ff1_w2[...]) + ff1_b2[...]
    x = x + 0.5 * h

    # ---- x = Attention(LN(x)) + x  (fused QKV, heads in-kernel) --------------
    # TODO(synk): x_len padding-mask branch of Attention is not implemented;
    # MyConformer.forward is exercised with x_len=None (mask=None), as in PyTorch.
    h = _layernorm(x, attn_ln[...])
    qkv = _mm_bf16(h, attn_wqkv[...])                 # (n, 3d) f32
    rel = rel_ref[...]                                # (n, n, dh) f32
    head_outs = []
    for hh in range(HEADS):
        lo = hh * DIM_HEAD
        q = qkv[:, lo:lo + DIM_HEAD]
        k = qkv[:, d + lo:d + lo + DIM_HEAD]
        v = qkv[:, 2 * d + lo:2 * d + lo + DIM_HEAD]
        dots = jax.lax.dot_general(q, k, (((1,), (1,)), ((), ())),
                                   preferred_element_type=jnp.float32)
        # Shaw rel-pos bias on the MXU: batch over query rows, contract dh.
        pos = jax.lax.dot_general(q[:, None, :], rel,
                                  dimension_numbers=(((2,), (2,)), ((0,), (0,))),
                                  preferred_element_type=jnp.float32)[:, 0, :]
        logits = (dots + pos) * ATTN_SCALE
        logits = logits - jnp.max(logits, axis=-1, keepdims=True)
        e = jnp.exp(logits)
        p = e * pl.reciprocal(jnp.sum(e, axis=-1, keepdims=True), approx=True)
        head_outs.append(jnp.dot(p, v, preferred_element_type=jnp.float32))
    ao = jnp.concatenate(head_outs, axis=-1)          # (n, d) merged heads
    h = _mm_bf16(ao, attn_wo[...]) + attn_bo[...]
    x = x + h

    # ---- x = ConvModule(x) + x  (padded tile stays resident in VMEM) ---------
    h = _layernorm(x, conv_ln[...])
    h = _mm_bf16(h, conv_w1[...]) + conv_b1[...]      # 1x1 conv -> 2*inner
    inner = conv_w2.shape[0]
    h = h[:, :inner] * jax.nn.sigmoid(h[:, inner:])   # GLU over channels
    pad_ref[...] = jnp.zeros_like(pad_ref)            # zero-padded scratch tile
    pad_ref[PAD_L:PAD_L + n, :] = h
    xp = pad_ref[...]                                 # (n + K - 1, inner)
    w = dw_w[...]
    acc = jnp.zeros((n, inner), jnp.float32)
    for kk in range(KERNEL_SIZE):                     # static unroll over taps
        acc = acc + xp[kk:kk + n, :] * w[kk:kk + 1, :]
    h = acc + dw_b[...]
    h = h * bn_ss[0:1, :] + bn_ss[1:2, :]             # folded BatchNorm (eval)
    h = h * jax.nn.sigmoid(h)                         # Swish
    h = _mm_bf16(h, conv_w2[...]) + conv_b2[...]      # 1x1 conv -> d
    x = x + h

    # ---- x = 0.5 * FF2(LN(x)) + x, then post-LayerNorm -----------------------
    h = _layernorm(x, ff2_ln[...])
    h = _mm_bf16(h, ff2_w1[...]) + ff2_b1[...]
    h = h * jax.nn.sigmoid(h)
    h = _mm_bf16(h, ff2_w2[...]) + ff2_b2[...]
    x = x + 0.5 * h
    o_ref[...] = _layernorm(x, post_ln[...]).astype(o_ref.dtype)


def conformer_block(x, p, rel, bn_ss):
    b, n, d = x.shape
    ffd = p["ff1_w1"].shape[1]
    inner2 = p["conv_w1"].shape[1]
    inner = inner2 // 2
    dh = rel.shape[-1]

    def full2(r, c):
        return pl.BlockSpec((r, c), lambda i: (0, 0))

    def full3(a, bb, c):
        return pl.BlockSpec((a, bb, c), lambda i: (0, 0, 0))

    seq_spec = pl.BlockSpec((None, n, d), lambda i: (i, 0, 0))

    in_specs = [
        seq_spec,
        full2(2, d), full2(d, ffd), full2(1, ffd), full2(ffd, d), full2(1, d),
        full2(2, d), full2(d, 3 * d), full2(d, d), full2(1, d), full3(n, n, dh),
        full2(2, d), full2(d, inner2), full2(1, inner2),
        full2(KERNEL_SIZE, inner), full2(1, inner), full2(2, inner),
        full2(inner, d), full2(1, d),
        full2(2, d), full2(d, ffd), full2(1, ffd), full2(ffd, d), full2(1, d),
        full2(2, d),
    ]

    return pl.pallas_call(
        conformer_block_kernel,
        grid=(b,),
        in_specs=in_specs,
        out_specs=seq_spec,
        out_shape=jax.ShapeDtypeStruct((b, n, d), jnp.float32),
        scratch_shapes=[pltpu.VMEM((n + KERNEL_SIZE - 1, inner), jnp.float32)],
        compiler_params=pltpu.CompilerParams(dimension_semantics=("parallel",)),
    )(
        x,
        p["ff1_ln"], p["ff1_w1"], p["ff1_b1"], p["ff1_w2"], p["ff1_b2"],
        p["attn_ln"], p["attn_wqkv"], p["attn_wo"], p["attn_bo"], rel,
        p["conv_ln"], p["conv_w1"], p["conv_b1"], p["conv_dw_w"], p["conv_dw_b"],
        bn_ss, p["conv_w2"], p["conv_b2"],
        p["ff2_ln"], p["ff2_w1"], p["ff2_b1"], p["ff2_w2"], p["ff2_b2"],
        p["post_ln"],
    )


# ----------------------------- final classifier kernel ------------------------
def fc_kernel(x_ref, w_ref, b_ref, o_ref):
    o_ref[...] = (jnp.dot(x_ref[...], w_ref[...],
                          preferred_element_type=jnp.float32)
                  + b_ref[...]).astype(o_ref.dtype)


def pallas_fc(x2d, w, b):
    m, d = x2d.shape
    f = w.shape[1]
    return pl.pallas_call(
        fc_kernel,
        grid=(1,),
        in_specs=[pl.BlockSpec((m, d), lambda i: (0, 0)),
                  pl.BlockSpec((d, f), lambda i: (0, 0)),
                  pl.BlockSpec((1, f), lambda i: (0, 0))],
        out_specs=pl.BlockSpec((m, f), lambda i: (0, 0)),
        out_shape=jax.ShapeDtypeStruct((m, f), jnp.float32),
    )(x2d, w, b)


# ------------------------------- model forward --------------------------------
@jax.jit
def my_conformer_forward(x, params):
    b, s, d = x.shape
    cls = jnp.broadcast_to(params["class_token"], (b, 1, d)).astype(x.dtype)
    x = jnp.concatenate([cls, x], axis=1)             # prepend class token
    n = s + 1

    # Relative-position index matrix depends only on n -> computed once per
    # forward (identical for every encoder block).
    seq = jnp.arange(n)
    dist = jnp.clip(seq[:, None] - seq[None, :], -MAX_POS_EMB, MAX_POS_EMB) + MAX_POS_EMB

    for p in params["blocks"]:
        rel = p["rel_pos_emb"][dist]                  # (n, n, dh) gather (glue)
        # fold BatchNorm running stats into a per-channel scale/shift (host/XLA)
        bn_scale = p["bn_g"] * jax.lax.rsqrt(p["bn_v"] + BN_EPS)
        bn_shift = p["bn_b"] - p["bn_m"] * bn_scale
        bn_ss = jnp.stack([bn_scale, bn_shift])       # (2, inner)
        x = conformer_block(x, p, rel, bn_ss)

    embedding = x[:, 0, :]
    out = pallas_fc(embedding, params["fc5_w"], params["fc5_b"])
    return out, embedding


# ------------------------------- parameter init -------------------------------
def init_params(key):
    dim, ffd, inner = EMB_SIZE, EMB_SIZE * FF_MULT, EMB_SIZE * EXP_FAC
    keys = iter(jax.random.split(key, 256))
    bf16 = jnp.bfloat16

    def nrm(shape, dtype=jnp.float32, scale=0.05):
        w = scale * jax.random.normal(next(keys), shape, dtype=jnp.float32)
        return w.astype(dtype)

    def ln_pair(c=dim):
        return jnp.stack([jnp.ones((c,), jnp.float32), jnp.zeros((c,), jnp.float32)])

    blocks = []
    for _ in range(N_ENCODERS):
        blocks.append(dict(
            ff1_ln=ln_pair(),
            ff1_w1=nrm((dim, ffd), bf16), ff1_b1=nrm((1, ffd)),
            ff1_w2=nrm((ffd, dim), bf16), ff1_b2=nrm((1, dim)),
            attn_ln=ln_pair(),
            attn_wqkv=nrm((dim, 3 * dim), bf16),      # fused to_q | to_k | to_v
            attn_wo=nrm((dim, dim), bf16), attn_bo=nrm((1, dim)),
            rel_pos_emb=nrm((2 * MAX_POS_EMB + 1, DIM_HEAD)),
            conv_ln=ln_pair(),
            conv_w1=nrm((dim, 2 * inner), bf16), conv_b1=nrm((1, 2 * inner)),
            conv_dw_w=nrm((KERNEL_SIZE, inner)), conv_dw_b=nrm((1, inner)),
            bn_g=jnp.ones((inner,), jnp.float32), bn_b=jnp.zeros((inner,), jnp.float32),
            bn_m=jnp.zeros((inner,), jnp.float32), bn_v=jnp.ones((inner,), jnp.float32),
            conv_w2=nrm((inner, dim), bf16), conv_b2=nrm((1, dim)),
            ff2_ln=ln_pair(),
            ff2_w1=nrm((dim, ffd), bf16), ff2_b1=nrm((1, ffd)),
            ff2_w2=nrm((ffd, dim), bf16), ff2_b2=nrm((1, dim)),
            post_ln=ln_pair(),
        ))
    return dict(
        blocks=blocks,
        class_token=jax.random.uniform(next(keys), (1, 1, dim), dtype=jnp.float32),
        fc5_w=nrm((dim, 2)), fc5_b=nrm((1, 2)),
    )


# ------------------------------------ main -------------------------------------
if __name__ == "__main__":
    root = jax.random.PRNGKey(0)
    kp, kx = jax.random.split(root)
    B, S = 2, 8
    params = init_params(kp)
    x = jax.random.normal(kx, (B, S, EMB_SIZE), dtype=jnp.float32)

    out, emb = my_conformer_forward(x, params)
    out, emb = jax.block_until_ready((out, emb))

    assert out.shape == (B, 2), out.shape
    assert emb.shape == (B, EMB_SIZE), emb.shape
    assert bool(jnp.all(jnp.isfinite(out))) and bool(jnp.all(jnp.isfinite(emb)))
    print("KERNEL_OK")
</pallas_src>

<mosaic_0001>
module attributes {stable_mosaic.version = 11 : i64} {
  func.func @fc_kernel(%arg0: i32, %arg1: memref<2x64xf32, #tpu.memory_space<vmem>>, %arg2: memref<64x2xf32, #tpu.memory_space<vmem>>, %arg3: memref<1x2xf32, #tpu.memory_space<vmem>>, %arg4: memref<2x2xf32, #tpu.memory_space<vmem>>) attributes {dimension_semantics = [#tpu.dimension_semantics<arbitrary>], iteration_bounds = array<i64: 1>, scalar_prefetch = 0 : i64, scratch_operands = 0 : i64, tpu.core_type = #tpu.core_type<tc>, window_params = [{pipeline_mode = #tpu.pipeline_mode<synchronous>, transform_indices = @transform_0, window_bounds = array<i64: 2, 64>}, {pipeline_mode = #tpu.pipeline_mode<synchronous>, transform_indices = @transform_1, window_bounds = array<i64: 64, 2>}, {pipeline_mode = #tpu.pipeline_mode<synchronous>, transform_indices = @transform_2, window_bounds = array<i64: 1, 2>}, {pipeline_mode = #tpu.pipeline_mode<synchronous>, transform_indices = @transform_3, window_bounds = array<i64: 2, 2>}]} {
    %c0 = arith.constant 0 : index
    %c0_0 = arith.constant 0 : index
    %0 = vector.load %arg1[%c0, %c0_0] : memref<2x64xf32, #tpu.memory_space<vmem>>, vector<2x64xf32>
    %c0_1 = arith.constant 0 : index
    %c0_2 = arith.constant 0 : index
    %1 = vector.load %arg2[%c0_1, %c0_2] : memref<64x2xf32, #tpu.memory_space<vmem>>, vector<64x2xf32>
    %cst = arith.constant dense<0.000000e+00> : vector<2x2xf32>
    %2 = tpu.matmul %0, %1, %cst {dimension_numbers = #tpu.dot_dimension_numbers<[1], [0], [0], [1], [0, 0, 1, 1], [], []>} : vector<2x64xf32>, vector<64x2xf32>, vector<2x2xf32> -> vector<2x2xf32>
    %c0_3 = arith.constant 0 : index
    %c0_4 = arith.constant 0 : index
    %3 = vector.load %arg3[%c0_3, %c0_4] : memref<1x2xf32, #tpu.memory_space<vmem>>, vector<1x2xf32>
    %4 = vector.broadcast %3 : vector<1x2xf32> to vector<2x2xf32>
    %5 = arith.addf %2, %4 : vector<2x2xf32>
    %c0_5 = arith.constant 0 : index
    %c0_6 = arith.constant 0 : index
    %6 = vector.load %arg4[%c0_5, %c0_6] : memref<2x2xf32, #tpu.memory_space<vmem>>, vector<2x2xf32>
    tpu.vector_store %arg4[%c0_5, %c0_6], %5 {strides = array<i32>} : memref<2x2xf32, #tpu.memory_space<vmem>>, vector<2x2xf32>,
    return
  }
  func.func @transform_0(%arg0: i32) -> (i32, i32) {
    %c0_i32 = arith.constant 0 : i32
    %c0_i32_0 = arith.constant 0 : i32
    %c0_i32_1 = arith.constant 0 : i32
    return %c0_i32, %c0_i32_0 : i32, i32
  }
  func.func @transform_1(%arg0: i32) -> (i32, i32) {
    %c0_i32 = arith.constant 0 : i32
    %c0_i32_0 = arith.constant 0 : i32
    %c0_i32_1 = arith.constant 0 : i32
    return %c0_i32, %c0_i32_0 : i32, i32
  }
  func.func @transform_2(%arg0: i32) -> (i32, i32) {
    %c0_i32 = arith.constant 0 : i32
    %c0_i32_0 = arith.constant 0 : i32
    %c0_i32_1 = arith.constant 0 : i32
    return %c0_i32, %c0_i32_0 : i32, i32
  }
  func.func @transform_3(%arg0: i32) -> (i32, i32) {
    %c0_i32 = arith.constant 0 : i32
    %c0_i32_0 = arith.constant 0 : i32
    %c0_i32_1 = arith.constant 0 : i32
    return %c0_i32, %c0_i32_0 : i32, i32
  }
}

module attributes {stable_mosaic.version = 11 : i64} {
  func.func @conformer_block_kernel(%arg0: i32, %arg1: memref<1x9x64xf32, #tpu.memory_space<vmem>>, %arg2: memref<2x64xf32, #tpu.memory_space<vmem>>, %arg3: memref<64x256xbf16, #tpu.memory_space<vmem>>, %arg4: memref<1x256xf32, #tpu.memory_space<vmem>>, %arg5: memref<256x64xbf16, #tpu.memory_space<vmem>>, %arg6: memref<1x64xf32, #tpu.memory_space<vmem>>, %arg7: memref<2x64xf32, #tpu.memory_space<vmem>>, %arg8: memref<64x192xbf16, #tpu.memory_space<vmem>>, %arg9: memref<64x64xbf16, #tpu.memory_space<vmem>>, %arg10: memref<1x64xf32, #tpu.memory_space<vmem>>, %arg11: memref<9x9x16xf32, #tpu.memory_space<vmem>>, %arg12: memref<2x64xf32, #tpu.memory_space<vmem>>, %arg13: memref<64x256xbf16, #tpu.memory_space<vmem>>, %arg14: memref<1x256xf32, #tpu.memory_space<vmem>>, %arg15: memref<31x128xf32, #tpu.memory_space<vmem>>, %arg16: memref<1x128xf32, #tpu.memory_space<vmem>>, %arg17: memref<2x128xf32, #tpu.memory_space<vmem>>, %arg18: memref<128x64xbf16, #tpu.memory_space<vmem>>, %arg19: memref<1x64xf32, #tpu.memory_space<vmem>>, %arg20: memref<2x64xf32, #tpu.memory_space<vmem>>, %arg21: memref<64x256xbf16, #tpu.memory_space<vmem>>, %arg22: memref<1x256xf32, #tpu.memory_space<vmem>>, %arg23: memref<256x64xbf16, #tpu.memory_space<vmem>>, %arg24: memref<1x64xf32, #tpu.memory_space<vmem>>, %arg25: memref<2x64xf32, #tpu.memory_space<vmem>>, %arg26: memref<1x9x64xf32, #tpu.memory_space<vmem>>, %arg27: memref<39x128xf32, #tpu.memory_space<vmem>>) attributes {dimension_semantics = [#tpu.dimension_semantics<parallel>], iteration_bounds = array<i64: 2>, scalar_prefetch = 0 : i64, scratch_operands = 1 : i64, tpu.core_type = #tpu.core_type<tc>, window_params = [{transform_indices = @transform_0, window_bounds = array<i64: 1, 9, 64>}, {pipeline_mode = #tpu.pipeline_mode<synchronous>, transform_indices = @transform_1, window_bounds = array<i64: 2, 64>}, {pipeline_mode = #tpu.pipeline_mode<synchronous>, transform_indices = @transform_2, window_bounds = array<i64: 64, 256>}, {pipeline_mode = #tpu.pipeline_mode<synchronous>, transform_indices = @transform_3, window_bounds = array<i64: 1, 256>}, {pipeline_mode = #tpu.pipeline_mode<synchronous>, transform_indices = @transform_4, window_bounds = array<i64: 256, 64>}, {pipeline_mode = #tpu.pipeline_mode<synchronous>, transform_indices = @transform_5, window_bounds = array<i64: 1, 64>}, {pipeline_mode = #tpu.pipeline_mode<synchronous>, transform_indices = @transform_6, window_bounds = array<i64: 2, 64>}, {pipeline_mode = #tpu.pipeline_mode<synchronous>, transform_indices = @transform_7, window_bounds = array<i64: 64, 192>}, {pipeline_mode = #tpu.pipeline_mode<synchronous>, transform_indices = @transform_8, window_bounds = array<i64: 64, 64>}, {pipeline_mode = #tpu.pipeline_mode<synchronous>, transform_indices = @transform_9, window_bounds = array<i64: 1, 64>}, {pipeline_mode = #tpu.pipeline_mode<synchronous>, transform_indices = @transform_10, window_bounds = array<i64: 9, 9, 16>}, {pipeline_mode = #tpu.pipeline_mode<synchronous>, transform_indices = @transform_11, window_bounds = array<i64: 2, 64>}, {pipeline_mode = #tpu.pipeline_mode<synchronous>, transform_indices = @transform_12, window_bounds = array<i64: 64, 256>}, {pipeline_mode = #tpu.pipeline_mode<synchronous>, transform_indices = @transform_13, window_bounds = array<i64: 1, 256>}, {pipeline_mode = #tpu.pipeline_mode<synchronous>, transform_indices = @transform_14, window_bounds = array<i64: 31, 128>}, {pipeline_mode = #tpu.pipeline_mode<synchronous>, transform_indices = @transform_15, window_bounds = array<i64: 1, 128>}, {pipeline_mode = #tpu.pipeline_mode<synchronous>, transform_indices = @transform_16, window_bounds = array<i64: 2, 128>}, {pipeline_mode = #tpu.pipeline_mode<synchronous>, transform_indices = @transform_17, window_bounds = array<i64: 128, 64>}, {pipeline_mode = #tpu.pipeline_mode<synchronous>, transform_indices = @transform_18, window_bounds = array<i64: 1, 64>}, {pipeline_mode = #tpu.pipeline_mode<synchronous>, transform_indices = @transform_19, window_bounds = array<i64: 2, 64>}, {pipeline_mode = #tpu.pipeline_mode<synchronous>, transform_indices = @transform_20, window_bounds = array<i64: 64, 256>}, {pipeline_mode = #tpu.pipeline_mode<synchronous>, transform_indices = @transform_21, window_bounds = array<i64: 1, 256>}, {pipeline_mode = #tpu.pipeline_mode<synchronous>, transform_indices = @transform_22, window_bounds = array<i64: 256, 64>}, {pipeline_mode = #tpu.pipeline_mode<synchronous>, transform_indices = @transform_23, window_bounds = array<i64: 1, 64>}, {pipeline_mode = #tpu.pipeline_mode<synchronous>, transform_indices = @transform_24, window_bounds = array<i64: 2, 64>}, {transform_indices = @transform_25, window_bounds = array<i64: 1, 9, 64>}]} {
    %c0 = arith.constant 0 : index
    %c0_0 = arith.constant 0 : index
    %c0_1 = arith.constant 0 : index
    %0 = vector.load %arg1[%c0, %c0_0, %c0_1] : memref<1x9x64xf32, #tpu.memory_space<vmem>>, vector<1x9x64xf32>
    %1 = vector.shape_cast %0 : vector<1x9x64xf32> to vector<9x64xf32>
    %c0_2 = arith.constant 0 : index
    %c0_3 = arith.constant 0 : index
    %2 = vector.load %arg2[%c0_2, %c0_3] : memref<2x64xf32, #tpu.memory_space<vmem>>, vector<2x64xf32>
    %cst = arith.constant dense<0.000000e+00> : vector<9xf32>
    %3 = vector.multi_reduction <add>, %1, %cst [1] : vector<9x64xf32> to vector<9xf32>
    %4 = vector.shape_cast %3 : vector<9xf32> to vector<9x1xf32>
    %cst_4 = arith.constant 6.400000e+01 : f32
    %5 = vector.broadcast %cst_4 : f32 to vector<9x1xf32>
    %6 = arith.divf %4, %5 : vector<9x1xf32>
    %7 = vector.broadcast %6 : vector<9x1xf32> to vector<9x64xf32>
    %8 = arith.subf %1, %7 : vector<9x64xf32>
    %9 = arith.mulf %8, %8 : vector<9x64xf32>
    %cst_5 = arith.constant dense<0.000000e+00> : vector<9xf32>
    %10 = vector.multi_reduction <add>, %9, %cst_5 [1] : vector<9x64xf32> to vector<9xf32>
    %11 = vector.shape_cast %10 : vector<9xf32> to vector<9x1xf32>
    %cst_6 = arith.constant 6.400000e+01 : f32
    %12 = vector.broadcast %cst_6 : f32 to vector<9x1xf32>
    %13 = arith.divf %11, %12 : vector<9x1xf32>
    %cst_7 = arith.constant 9.99999974E-6 : f32
    %14 = vector.broadcast %cst_7 : f32 to vector<9x1xf32>
    %15 = arith.addf %13, %14 : vector<9x1xf32>
    %16 = math.rsqrt %15 : vector<9x1xf32>
    %17 = vector.broadcast %16 : vector<9x1xf32> to vector<9x64xf32>
    %18 = arith.mulf %8, %17 : vector<9x64xf32>
    %19 = vector.extract_strided_slice %2 {offsets = [0, 0], sizes = [1, 64], strides = [1, 1]} : vector<2x64xf32> to vector<1x64xf32>
    %20 = vector.broadcast %19 : vector<1x64xf32> to vector<9x64xf32>
    %21 = arith.mulf %18, %20 : vector<9x64xf32>
    %22 = vector.extract_strided_slice %2 {offsets = [1, 0], sizes = [1, 64], strides = [1, 1]} : vector<2x64xf32> to vector<1x64xf32>
    %23 = vector.broadcast %22 : vector<1x64xf32> to vector<9x64xf32>
    %24 = arith.addf %21, %23 : vector<9x64xf32>
    %c0_8 = arith.constant 0 : index
    %c0_9 = arith.constant 0 : index
    %25 = vector.load %arg3[%c0_8, %c0_9] : memref<64x256xbf16, #tpu.memory_space<vmem>>, vector<64x256xbf16>
    %26 = arith.truncf %24 : vector<9x64xf32> to vector<9x64xbf16>
    %cst_10 = arith.constant dense<0.000000e+00> : vector<9x256xf32>
    %27 = tpu.matmul %26, %25, %cst_10 {dimension_numbers = #tpu.dot_dimension_numbers<[1], [0], [0], [1], [0, 0, 1, 1], [], []>} : vector<9x64xbf16>, vector<64x256xbf16>, vector<9x256xf32> -> vector<9x256xf32>
    %c0_11 = arith.constant 0 : index
    %c0_12 = arith.constant 0 : index
    %28 = vector.load %arg4[%c0_11, %c0_12] : memref<1x256xf32, #tpu.memory_space<vmem>>, vector<1x256xf32>
    %29 = vector.broadcast %28 : vector<1x256xf32> to vector<9x256xf32>
    %30 = arith.addf %27, %29 : vector<9x256xf32>
    %31 = arith.negf %30 : vector<9x256xf32>
    %32 = math.exp %31 : vector<9x256xf32>
    %cst_13 = arith.constant 1.000000e+00 : f32
    %33 = vector.broadcast %cst_13 : f32 to vector<9x256xf32>
    %34 = arith.addf %33, %32 : vector<9x256xf32>
    %35 = arith.divf %33, %34 : vector<9x256xf32>
    %36 = arith.mulf %30, %35 : vector<9x256xf32>
    %c0_14 = arith.constant 0 : index
    %c0_15 = arith.constant 0 : index
    %37 = vector.load %arg5[%c0_14, %c0_15] : memref<256x64xbf16, #tpu.memory_space<vmem>>, vector<256x64xbf16>
    %38 = arith.truncf %36 : vector<9x256xf32> to vector<9x256xbf16>
    %cst_16 = arith.constant dense<0.000000e+00> : vector<9x64xf32>
    %39 = tpu.matmul %38, %37, %cst_16 {dimension_numbers = #tpu.dot_dimension_numbers<[1], [0], [0], [1], [0, 0, 1, 1], [], []>} : vector<9x256xbf16>, vector<256x64xbf16>, vector<9x64xf32> -> vector<9x64xf32>
    %c0_17 = arith.constant 0 : index
    %c0_18 = arith.constant 0 : index
    %40 = vector.load %arg6[%c0_17, %c0_18] : memref<1x64xf32, #tpu.memory_space<vmem>>, vector<1x64xf32>
    %41 = vector.broadcast %40 : vector<1x64xf32> to vector<9x64xf32>
    %42 = arith.addf %39, %41 : vector<9x64xf32>
    %cst_19 = arith.constant 5.000000e-01 : f32
    %43 = vector.broadcast %cst_19 : f32 to vector<9x64xf32>
    %44 = arith.mulf %43, %42 : vector<9x64xf32>
    %45 = arith.addf %1, %44 : vector<9x64xf32>
    %c0_20 = arith.constant 0 : index
    %c0_21 = arith.constant 0 : index
    %46 = vector.load %arg7[%c0_20, %c0_21] : memref<2x64xf32, #tpu.memory_space<vmem>>, vector<2x64xf32>
    %cst_22 = arith.constant dense<0.000000e+00> : vector<9xf32>
    %47 = vector.multi_reduction <add>, %45, %cst_22 [1] : vector<9x64xf32> to vector<9xf32>
    %48 = vector.shape_cast %47 : vector<9xf32> to vector<9x1xf32>
    %cst_23 = arith.constant 6.400000e+01 : f32
    %49 = vector.broadcast %cst_23 : f32 to vector<9x1xf32>
    %50 = arith.divf %48, %49 : vector<9x1xf32>
    %51 = vector.broadcast %50 : vector<9x1xf32> to vector<9x64xf32>
    %52 = arith.subf %45, %51 : vector<9x64xf32>
    %53 = arith.mulf %52, %52 : vector<9x64xf32>
    %cst_24 = arith.constant dense<0.000000e+00> : vector<9xf32>
    %54 = vector.multi_reduction <add>, %53, %cst_24 [1] : vector<9x64xf32> to vector<9xf32>
    %55 = vector.shape_cast %54 : vector<9xf32> to vector<9x1xf32>
    %cst_25 = arith.constant 6.400000e+01 : f32
    %56 = vector.broadcast %cst_25 : f32 to vector<9x1xf32>
    %57 = arith.divf %55, %56 : vector<9x1xf32>
    %cst_26 = arith.constant 9.99999974E-6 : f32
    %58 = vector.broadcast %cst_26 : f32 to vector<9x1xf32>
    %59 = arith.addf %57, %58 : vector<9x1xf32>
    %60 = math.rsqrt %59 : vector<9x1xf32>
    %61 = vector.broadcast %60 : vector<9x1xf32> to vector<9x64xf32>
    %62 = arith.mulf %52, %61 : vector<9x64xf32>
    %63 = vector.extract_strided_slice %46 {offsets = [0, 0], sizes = [1, 64], strides = [1, 1]} : vector<2x64xf32> to vector<1x64xf32>
    %64 = vector.broadcast %63 : vector<1x64xf32> to vector<9x64xf32>
    %65 = arith.mulf %62, %64 : vector<9x64xf32>
    %66 = vector.extract_strided_slice %46 {offsets = [1, 0], sizes = [1, 64], strides = [1, 1]} : vector<2x64xf32> to vector<1x64xf32>
    %67 = vector.broadcast %66 : vector<1x64xf32> to vector<9x64xf32>
    %68 = arith.addf %65, %67 : vector<9x64xf32>
    %c0_27 = arith.constant 0 : index
    %c0_28 = arith.constant 0 : index
    %69 = vector.load %arg8[%c0_27, %c0_28] : memref<64x192xbf16, #tpu.memory_space<vmem>>, vector<64x192xbf16>
    %70 = arith.truncf %68 : vector<9x64xf32> to vector<9x64xbf16>
    %cst_29 = arith.constant dense<0.000000e+00> : vector<9x192xf32>
    %71 = tpu.matmul %70, %69, %cst_29 {dimension_numbers = #tpu.dot_dimension_numbers<[1], [0], [0], [1], [0, 0, 1, 1], [], []>} : vector<9x64xbf16>, vector<64x192xbf16>, vector<9x192xf32> -> vector<9x192xf32>
    %c0_30 = arith.constant 0 : index
    %c0_31 = arith.constant 0 : index
    %c0_32 = arith.constant 0 : index
    %72 = vector.load %arg11[%c0_30, %c0_31, %c0_32] : memref<9x9x16xf32, #tpu.memory_space<vmem>>, vector<9x9x16xf32>
    %73 = vector.extract_strided_slice %71 {offsets = [0, 0], sizes = [9, 16], strides = [1, 1]} : vector<9x192xf32> to vector<9x16xf32>
    %74 = vector.extract_strided_slice %71 {offsets = [0, 64], sizes = [9, 16], strides = [1, 1]} : vector<9x192xf32> to vector<9x16xf32>
    %75 = vector.extract_strided_slice %71 {offsets = [0, 128], sizes = [9, 16], strides = [1, 1]} : vector<9x192xf32> to vector<9x16xf32>
    %cst_33 = arith.constant dense<0.000000e+00> : vector<9x9xf32>
    %76 = tpu.matmul %73, %74, %cst_33 {dimension_numbers = #tpu.dot_dimension_numbers<[1], [1], [0], [0], [0, 0, 1, 0], [], []>} : vector<9x16xf32>, vector<9x16xf32>, vector<9x9xf32> -> vector<9x9xf32>
    %77 = vector.shape_cast %73 : vector<9x16xf32> to vector<9x1x16xf32>
    %cst_34 = arith.constant dense<0.000000e+00> : vector<9x1x9xf32>
    %78 = tpu.matmul %77, %72, %cst_34 {dimension_numbers = #tpu.dot_dimension_numbers<[2], [2], [1], [1], [0, 0, 0, 1, 1, 1], [0], [0]>} : vector<9x1x16xf32>, vector<9x9x16xf32>, vector<9x1x9xf32> -> vector<9x1x9xf32>
    %79 = vector.shape_cast %78 : vector<9x1x9xf32> to vector<9x9xf32>
    %80 = arith.addf %76, %79 : vector<9x9xf32>
    %cst_35 = arith.constant 2.500000e-01 : f32
    %81 = vector.broadcast %cst_35 : f32 to vector<9x9xf32>
    %82 = arith.mulf %80, %81 : vector<9x9xf32>
    %cst_36 = arith.constant dense<0xFF800000> : vector<9xf32>
    %83 = vector.multi_reduction <maximumf>, %82, %cst_36 [1] : vector<9x9xf32> to vector<9xf32>
    %84 = vector.shape_cast %83 : vector<9xf32> to vector<9x1xf32>
    %85 = vector.broadcast %84 : vector<9x1xf32> to vector<9x9xf32>
    %86 = arith.subf %82, %85 : vector<9x9xf32>
    %87 = math.exp %86 : vector<9x9xf32>
    %cst_37 = arith.constant dense<0.000000e+00> : vector<9xf32>
    %88 = vector.multi_reduction <add>, %87, %cst_37 [1] : vector<9x9xf32> to vector<9xf32>
    %89 = vector.shape_cast %88 : vector<9xf32> to vector<9x1xf32>
    %90 = tpu.reciprocal %89 {approx = true} : vector<9x1xf32> -> vector<9x1xf32>
    %91 = vector.broadcast %90 : vector<9x1xf32> to vector<9x9xf32>
    %92 = arith.mulf %87, %91 : vector<9x9xf32>
    %cst_38 = arith.constant dense<0.000000e+00> : vector<9x16xf32>
    %93 = tpu.matmul %92, %75, %cst_38 {dimension_numbers = #tpu.dot_dimension_numbers<[1], [0], [0], [1], [0, 0, 1, 1], [], []>} : vector<9x9xf32>, vector<9x16xf32>, vector<9x16xf32> -> vector<9x16xf32>
    %94 = vector.extract_strided_slice %71 {offsets = [0, 16], sizes = [9, 16], strides = [1, 1]} : vector<9x192xf32> to vector<9x16xf32>
    %95 = vector.extract_strided_slice %71 {offsets = [0, 80], sizes = [9, 16], strides = [1, 1]} : vector<9x192xf32> to vector<9x16xf32>
    %96 = vector.extract_strided_slice %71 {offsets = [0, 144], sizes = [9, 16], strides = [1, 1]} : vector<9x192xf32> to vector<9x16xf32>
    %cst_39 = arith.constant dense<0.000000e+00> : vector<9x9xf32>
    %97 = tpu.matmul %94, %95, %cst_39 {dimension_numbers = #tpu.dot_dimension_numbers<[1], [1], [0], [0], [0, 0, 1, 0], [], []>} : vector<9x16xf32>, vector<9x16xf32>, vector<9x9xf32> -> vector<9x9xf32>
    %98 = vector.shape_cast %94 : vector<9x16xf32> to vector<9x1x16xf32>
    %cst_40 = arith.constant dense<0.000000e+00> : vector<9x1x9xf32>
    %99 = tpu.matmul %98, %72, %cst_40 {dimension_numbers = #tpu.dot_dimension_numbers<[2], [2], [1], [1], [0, 0, 0, 1, 1, 1], [0], [0]>} : vector<9x1x16xf32>, vector<9x9x16xf32>, vector<9x1x9xf32> -> vector<9x1x9xf32>
    %100 = vector.shape_cast %99 : vector<9x1x9xf32> to vector<9x9xf32>
    %101 = arith.addf %97, %100 : vector<9x9xf32>
    %cst_41 = arith.constant 2.500000e-01 : f32
    %102 = vector.broadcast %cst_41 : f32 to vector<9x9xf32>
    %103 = arith.mulf %101, %102 : vector<9x9xf32>
    %cst_42 = arith.constant dense<0xFF800000> : vector<9xf32>
    %104 = vector.multi_reduction <maximumf>, %103, %cst_42 [1] : vector<9x9xf32> to vector<9xf32>
    %105 = vector.shape_cast %104 : vector<9xf32> to vector<9x1xf32>
    %106 = vector.broadcast %105 : vector<9x1xf32> to vector<9x9xf32>
    %107 = arith.subf %103, %106 : vector<9x9xf32>
    %108 = math.exp %107 : vector<9x9xf32>
    %cst_43 = arith.constant dense<0.000000e+00> : vector<9xf32>
    %109 = vector.multi_reduction <add>, %108, %cst_43 [1] : vector<9x9xf32> to vector<9xf32>
    %110 = vector.shape_cast %109 : vector<9xf32> to vector<9x1xf32>
    %111 = tpu.reciprocal %110 {approx = true} : vector<9x1xf32> -> vector<9x1xf32>
    %112 = vector.broadcast %111 : vector<9x1xf32> to vector<9x9xf32>
    %113 = arith.mulf %108, %112 : vector<9x9xf32>
    %cst_44 = arith.constant dense<0.000000e+00> : vector<9x16xf32>
    %114 = tpu.matmul %113, %96, %cst_44 {dimension_numbers = #tpu.dot_dimension_numbers<[1], [0], [0], [1], [0, 0, 1, 1], [], []>} : vector<9x9xf32>, vector<9x16xf32>, vector<9x16xf32> -> vector<9x16xf32>
    %115 = vector.extract_strided_slice %71 {offsets = [0, 32], sizes = [9, 16], strides = [1, 1]} : vector<9x192xf32> to vector<9x16xf32>
    %116 = vector.extract_strided_slice %71 {offsets = [0, 96], sizes = [9, 16], strides = [1, 1]} : vector<9x192xf32> to vector<9x16xf32>
    %117 = vector.extract_strided_slice %71 {offsets = [0, 160], sizes = [9, 16], strides = [1, 1]} : vector<9x192xf32> to vector<9x16xf32>
    %cst_45 = arith.constant dense<0.000000e+00> : vector<9x9xf32>
    %118 = tpu.matmul %115, %116, %cst_45 {dimension_numbers = #tpu.dot_dimension_numbers<[1], [1], [0], [0], [0, 0, 1, 0], [], []>} : vector<9x16xf32>, vector<9x16xf32>, vector<9x9xf32> -> vector<9x9xf32>
    %119 = vector.shape_cast %115 : vector<9x16xf32> to vector<9x1x16xf32>
    %cst_46 = arith.constant dense<0.000000e+00> : vector<9x1x9xf32>
    %120 = tpu.matmul %119, %72, %cst_46 {dimension_numbers = #tpu.dot_dimension_numbers<[2], [2], [1], [1], [0, 0, 0, 1, 1, 1], [0], [0]>} : vector<9x1x16xf32>, vector<9x9x16xf32>, vector<9x1x9xf32> -> vector<9x1x9xf32>
    %121 = vector.shape_cast %120 : vector<9x1x9xf32> to vector<9x9xf32>
    %122 = arith.addf %118, %121 : vector<9x9xf32>
    %cst_47 = arith.constant 2.500000e-01 : f32
    %123 = vector.broadcast %cst_47 : f32 to vector<9x9xf32>
    %124 = arith.mulf %122, %123 : vector<9x9xf32>
    %cst_48 = arith.constant dense<0xFF800000> : vector<9xf32>
    %125 = vector.multi_reduction <maximumf>, %124, %cst_48 [1] : vector<9x9xf32> to vector<9xf32>
    %126 = vector.shape_cast %125 : vector<9xf32> to vector<9x1xf32>
    %127 = vector.broadcast %126 : vector<9x1xf32> to vector<9x9xf32>
    %128 = arith.subf %124, %127 : vector<9x9xf32>
    %129 = math.exp %128 : vector<9x9xf32>
    %cst_49 = arith.constant dense<0.000000e+00> : vector<9xf32>
    %130 = vector.multi_reduction <add>, %129, %cst_49 [1] : vector<9x9xf32> to vector<9xf32>
    %131 = vector.shape_cast %130 : vector<9xf32> to vector<9x1xf32>
    %132 = tpu.reciprocal %131 {approx = true} : vector<9x1xf32> -> vector<9x1xf32>
    %133 = vector.broadcast %132 : vector<9x1xf32> to vector<9x9xf32>
    %134 = arith.mulf %129, %133 : vector<9x9xf32>
    %cst_50 = arith.constant dense<0.000000e+00> : vector<9x16xf32>
    %135 = tpu.matmul %134, %117, %cst_50 {dimension_numbers = #tpu.dot_dimension_numbers<[1], [0], [0], [1], [0, 0, 1, 1], [], []>} : vector<9x9xf32>, vector<9x16xf32>, vector<9x16xf32> -> vector<9x16xf32>
    %136 = vector.extract_strided_slice %71 {offsets = [0, 48], sizes = [9, 16], strides = [1, 1]} : vector<9x192xf32> to vector<9x16xf32>
    %137 = vector.extract_strided_slice %71 {offsets = [0, 112], sizes = [9, 16], strides = [1, 1]} : vector<9x192xf32> to vector<9x16xf32>
    %138 = vector.extract_strided_slice %71 {offsets = [0, 176], sizes = [9, 16], strides = [1, 1]} : vector<9x192xf32> to vector<9x16xf32>
    %cst_51 = arith.constant dense<0.000000e+00> : vector<9x9xf32>
    %139 = tpu.matmul %136, %137, %cst_51 {dimension_numbers = #tpu.dot_dimension_numbers<[1], [1], [0], [0], [0, 0, 1, 0], [], []>} : vector<9x16xf32>, vector<9x16xf32>, vector<9x9xf32> -> vector<9x9xf32>
    %140 = vector.shape_cast %136 : vector<9x16xf32> to vector<9x1x16xf32>
    %cst_52 = arith.constant dense<0.000000e+00> : vector<9x1x9xf32>
    %141 = tpu.matmul %140, %72, %cst_52 {dimension_numbers = #tpu.dot_dimension_numbers<[2], [2], [1], [1], [0, 0, 0, 1, 1, 1], [0], [0]>} : vector<9x1x16xf32>, vector<9x9x16xf32>, vector<9x1x9xf32> -> vector<9x1x9xf32>
    %142 = vector.shape_cast %141 : vector<9x1x9xf32> to vector<9x9xf32>
    %143 = arith.addf %139, %142 : vector<9x9xf32>
    %cst_53 = arith.constant 2.500000e-01 : f32
    %144 = vector.broadcast %cst_53 : f32 to vector<9x9xf32>
    %145 = arith.mulf %143, %144 : vector<9x9xf32>
    %cst_54 = arith.constant dense<0xFF800000> : vector<9xf32>
    %146 = vector.multi_reduction <maximumf>, %145, %cst_54 [1] : vector<9x9xf32> to vector<9xf32>
    %147 = vector.shape_cast %146 : vector<9xf32> to vector<9x1xf32>
    %148 = vector.broadcast %147 : vector<9x1xf32> to vector<9x9xf32>
    %149 = arith.subf %145, %148 : vector<9x9xf32>
    %150 = math.exp %149 : vector<9x9xf32>
    %cst_55 = arith.constant dense<0.000000e+00> : vector<9xf32>
    %151 = vector.multi_reduction <add>, %150, %cst_55 [1] : vector<9x9xf32> to vector<9xf32>
    %152 = vector.shape_cast %151 : vector<9xf32> to vector<9x1xf32>
    %153 = tpu.reciprocal %152 {approx = true} : vector<9x1xf32> -> vector<9x1xf32>
    %154 = vector.broadcast %153 : vector<9x1xf32> to vector<9x9xf32>
    %155 = arith.mulf %150, %154 : vector<9x9xf32>
    %cst_56 = arith.constant dense<0.000000e+00> : vector<9x16xf32>
    %156 = tpu.matmul %155, %138, %cst_56 {dimension_numbers = #tpu.dot_dimension_numbers<[1], [0], [0], [1], [0, 0, 1, 1], [], []>} : vector<9x9xf32>, vector<9x16xf32>, vector<9x16xf32> -> vector<9x16xf32>
    %157 = tpu.concatenate %93, %114, %135, %156 in 1 : vector<9x16xf32>, vector<9x16xf32>, vector<9x16xf32>, vector<9x16xf32> -> vector<9x64xf32>
    %c0_57 = arith.constant 0 : index
    %c0_58 = arith.constant 0 : index
    %158 = vector.load %arg9[%c0_57, %c0_58] : memref<64x64xbf16, #tpu.memory_space<vmem>>, vector<64x64xbf16>
    %159 = arith.truncf %157 : vector<9x64xf32> to vector<9x64xbf16>
    %cst_59 = arith.constant dense<0.000000e+00> : vector<9x64xf32>
    %160 = tpu.matmul %159, %158, %cst_59 {dimension_numbers = #tpu.dot_dimension_numbers<[1], [0], [0], [1], [0, 0, 1, 1], [], []>} : vector<9x64xbf16>, vector<64x64xbf16>, vector<9x64xf32> -> vector<9x64xf32>
    %c0_60 = arith.constant 0 : index
    %c0_61 = arith.constant 0 : index
    %161 = vector.load %arg10[%c0_60, %c0_61] : memref<1x64xf32, #tpu.memory_space<vmem>>, vector<1x64xf32>
    %162 = vector.broadcast %161 : vector<1x64xf32> to vector<9x64xf32>
    %163 = arith.addf %160, %162 : vector<9x64xf32>
    %164 = arith.addf %45, %163 : vector<9x64xf32>
    %c0_62 = arith.constant 0 : index
    %c0_63 = arith.constant 0 : index
    %165 = vector.load %arg12[%c0_62, %c0_63] : memref<2x64xf32, #tpu.memory_space<vmem>>, vector<2x64xf32>
    %cst_64 = arith.constant dense<0.000000e+00> : vector<9xf32>
    %166 = vector.multi_reduction <add>, %164, %cst_64 [1] : vector<9x64xf32> to vector<9xf32>
    %167 = vector.shape_cast %166 : vector<9xf32> to vector<9x1xf32>
    %cst_65 = arith.constant 6.400000e+01 : f32
    %168 = vector.broadcast %cst_65 : f32 to vector<9x1xf32>
    %169 = arith.divf %167, %168 : vector<9x1xf32>
    %170 = vector.broadcast %169 : vector<9x1xf32> to vector<9x64xf32>
    %171 = arith.subf %164, %170 : vector<9x64xf32>
    %172 = arith.mulf %171, %171 : vector<9x64xf32>
    %cst_66 = arith.constant dense<0.000000e+00> : vector<9xf32>
    %173 = vector.multi_reduction <add>, %172, %cst_66 [1] : vector<9x64xf32> to vector<9xf32>
    %174 = vector.shape_cast %173 : vector<9xf32> to vector<9x1xf32>
    %cst_67 = arith.constant 6.400000e+01 : f32
    %175 = vector.broadcast %cst_67 : f32 to vector<9x1xf32>
    %176 = arith.divf %174, %175 : vector<9x1xf32>
    %cst_68 = arith.constant 9.99999974E-6 : f32
    %177 = vector.broadcast %cst_68 : f32 to vector<9x1xf32>
    %178 = arith.addf %176, %177 : vector<9x1xf32>
    %179 = math.rsqrt %178 : vector<9x1xf32>
    %180 = vector.broadcast %179 : vector<9x1xf32> to vector<9x64xf32>
    %181 = arith.mulf %171, %180 : vector<9x64xf32>
    %182 = vector.extract_strided_slice %165 {offsets = [0, 0], sizes = [1, 64], strides = [1, 1]} : vector<2x64xf32> to vector<1x64xf32>
    %183 = vector.broadcast %182 : vector<1x64xf32> to vector<9x64xf32>
    %184 = arith.mulf %181, %183 : vector<9x64xf32>
    %185 = vector.extract_strided_slice %165 {offsets = [1, 0], sizes = [1, 64], strides = [1, 1]} : vector<2x64xf32> to vector<1x64xf32>
    %186 = vector.broadcast %185 : vector<1x64xf32> to vector<9x64xf32>
    %187 = arith.addf %184, %186 : vector<9x64xf32>
    %c0_69 = arith.constant 0 : index
    %c0_70 = arith.constant 0 : index
    %188 = vector.load %arg13[%c0_69, %c0_70] : memref<64x256xbf16, #tpu.memory_space<vmem>>, vector<64x256xbf16>
    %189 = arith.truncf %187 : vector<9x64xf32> to vector<9x64xbf16>
    %cst_71 = arith.constant dense<0.000000e+00> : vector<9x256xf32>
    %190 = tpu.matmul %189, %188, %cst_71 {dimension_numbers = #tpu.dot_dimension_numbers<[1], [0], [0], [1], [0, 0, 1, 1], [], []>} : vector<9x64xbf16>, vector<64x256xbf16>, vector<9x256xf32> -> vector<9x256xf32>
    %c0_72 = arith.constant 0 : index
    %c0_73 = arith.constant 0 : index
    %191 = vector.load %arg14[%c0_72, %c0_73] : memref<1x256xf32, #tpu.memory_space<vmem>>, vector<1x256xf32>
    %192 = vector.broadcast %191 : vector<1x256xf32> to vector<9x256xf32>
    %193 = arith.addf %190, %192 : vector<9x256xf32>
    %194 = vector.extract_strided_slice %193 {offsets = [0, 0], sizes = [9, 128], strides = [1, 1]} : vector<9x256xf32> to vector<9x128xf32>
    %195 = vector.extract_strided_slice %193 {offsets = [0, 128], sizes = [9, 128], strides = [1, 1]} : vector<9x256xf32> to vector<9x128xf32>
    %196 = arith.negf %195 : vector<9x128xf32>
    %197 = math.exp %196 : vector<9x128xf32>
    %cst_74 = arith.constant 1.000000e+00 : f32
    %198 = vector.broadcast %cst_74 : f32 to vector<9x128xf32>
    %199 = arith.addf %198, %197 : vector<9x128xf32>
    %200 = arith.divf %198, %199 : vector<9x128xf32>
    %201 = arith.mulf %194, %200 : vector<9x128xf32>
    %cst_75 = arith.constant 0.000000e+00 : f32
    %202 = vector.broadcast %cst_75 : f32 to vector<39x128xf32>
    %c0_76 = arith.constant 0 : index
    %c0_77 = arith.constant 0 : index
    %203 = vector.load %arg27[%c0_76, %c0_77] : memref<39x128xf32, #tpu.memory_space<vmem>>, vector<39x128xf32>
    tpu.vector_store %arg27[%c0_76, %c0_77], %202 {strides = array<i32>} : memref<39x128xf32, #tpu.memory_space<vmem>>, vector<39x128xf32>,
    %c15 = arith.constant 15 : index
    %c0_78 = arith.constant 0 : index
    %204 = vector.load %arg27[%c15, %c0_78] : memref<39x128xf32, #tpu.memory_space<vmem>>, vector<9x128xf32>
    tpu.vector_store %arg27[%c15, %c0_78], %201 {strides = array<i32>} : memref<39x128xf32, #tpu.memory_space<vmem>>, vector<9x128xf32>,
    %c0_79 = arith.constant 0 : index
    %c0_80 = arith.constant 0 : index
    %205 = vector.load %arg27[%c0_79, %c0_80] : memref<39x128xf32, #tpu.memory_space<vmem>>, vector<39x128xf32>
    %c0_81 = arith.constant 0 : index
    %c0_82 = arith.constant 0 : index
    %206 = vector.load %arg15[%c0_81, %c0_82] : memref<31x128xf32, #tpu.memory_space<vmem>>, vector<31x128xf32>
    %cst_83 = arith.constant 0.000000e+00 : f32
    %207 = vector.broadcast %cst_83 : f32 to vector<9x128xf32>
    %208 = vector.extract_strided_slice %205 {offsets = [0, 0], sizes = [9, 128], strides = [1, 1]} : vector<39x128xf32> to vector<9x128xf32>
    %209 = vector.extract_strided_slice %206 {offsets = [0, 0], sizes = [1, 128], strides = [1, 1]} : vector<31x128xf32> to vector<1x128xf32>
    %210 = vector.broadcast %209 : vector<1x128xf32> to vector<9x128xf32>
    %211 = arith.mulf %208, %210 : vector<9x128xf32>
    %212 = arith.addf %207, %211 : vector<9x128xf32>
    %213 = vector.extract_strided_slice %205 {offsets = [1, 0], sizes = [9, 128], strides = [1, 1]} : vector<39x128xf32> to vector<9x128xf32>
    %214 = vector.extract_strided_slice %206 {offsets = [1, 0], sizes = [1, 128], strides = [1, 1]} : vector<31x128xf32> to vector<1x128xf32>
    %215 = vector.broadcast %214 : vector<1x128xf32> to vector<9x128xf32>
    %216 = arith.mulf %213, %215 : vector<9x128xf32>
    %217 = arith.addf %212, %216 : vector<9x128xf32>
    %218 = vector.extract_strided_slice %205 {offsets = [2, 0], sizes = [9, 128], strides = [1, 1]} : vector<39x128xf32> to vector<9x128xf32>
    %219 = vector.extract_strided_slice %206 {offsets = [2, 0], sizes = [1, 128], strides = [1, 1]} : vector<31x128xf32> to vector<1x128xf32>
    %220 = vector.broadcast %219 : vector<1x128xf32> to vector<9x128xf32>
    %221 = arith.mulf %218, %220 : vector<9x128xf32>
    %222 = arith.addf %217, %221 : vector<9x128xf32>
    %223 = vector.extract_strided_slice %205 {offsets = [3, 0], sizes = [9, 128], strides = [1, 1]} : vector<39x128xf32> to vector<9x128xf32>
    %224 = vector.extract_strided_slice %206 {offsets = [3, 0], sizes = [1, 128], strides = [1, 1]} : vector<31x128xf32> to vector<1x128xf32>
    %225 = vector.broadcast %224 : vector<1x128xf32> to vector<9x128xf32>
    %226 = arith.mulf %223, %225 : vector<9x128xf32>
    %227 = arith.addf %222, %226 : vector<9x128xf32>
    %228 = vector.extract_strided_slice %205 {offsets = [4, 0], sizes = [9, 128], strides = [1, 1]} : vector<39x128xf32> to vector<9x128xf32>
    %229 = vector.extract_strided_slice %206 {offsets = [4, 0], sizes = [1, 128], strides = [1, 1]} : vector<31x128xf32> to vector<1x128xf32>
    %230 = vector.broadcast %229 : vector<1x128xf32> to vector<9x128xf32>
    %231 = arith.mulf %228, %230 : vector<9x128xf32>
    %232 = arith.addf %227, %231 : vector<9x128xf32>
    %233 = vector.extract_strided_slice %205 {offsets = [5, 0], sizes = [9, 128], strides = [1, 1]} : vector<39x128xf32> to vector<9x128xf32>
    %234 = vector.extract_strided_slice %206 {offsets = [5, 0], sizes = [1, 128], strides = [1, 1]} : vector<31x128xf32> to vector<1x128xf32>
    %235 = vector.broadcast %234 : vector<1x128xf32> to vector<9x128xf32>
    %236 = arith.mulf %233, %235 : vector<9x128xf32>
    %237 = arith.addf %232, %236 : vector<9x128xf32>
    %238 = vector.extract_strided_slice %205 {offsets = [6, 0], sizes = [9, 128], strides = [1, 1]} : vector<39x128xf32> to vector<9x128xf32>
    %239 = vector.extract_strided_slice %206 {offsets = [6, 0], sizes = [1, 128], strides = [1, 1]} : vector<31x128xf32> to vector<1x128xf32>
    %240 = vector.broadcast %239 : vector<1x128xf32> to vector<9x128xf32>
    %241 = arith.mulf %238, %240 : vector<9x128xf32>
    %242 = arith.addf %237, %241 : vector<9x128xf32>
    %243 = vector.extract_strided_slice %205 {offsets = [7, 0], sizes = [9, 128], strides = [1, 1]} : vector<39x128xf32> to vector<9x128xf32>
    %244 = vector.extract_strided_slice %206 {offsets = [7, 0], sizes = [1, 128], strides = [1, 1]} : vector<31x128xf32> to vector<1x128xf32>
    %245 = vector.broadcast %244 : vector<1x128xf32> to vector<9x128xf32>
    %246 = arith.mulf %243, %245 : vector<9x128xf32>
    %247 = arith.addf %242, %246 : vector<9x128xf32>
    %248 = vector.extract_strided_slice %205 {offsets = [8, 0], sizes = [9, 128], strides = [1, 1]} : vector<39x128xf32> to vector<9x128xf32>
    %249 = vector.extract_strided_slice %206 {offsets = [8, 0], sizes = [1, 128], strides = [1, 1]} : vector<31x128xf32> to vector<1x128xf32>
    %250 = vector.broadcast %249 : vector<1x128xf32> to vector<9x128xf32>
    %251 = arith.mulf %248, %250 : vector<9x128xf32>
    %252 = arith.addf %247, %251 : vector<9x128xf32>
    %253 = vector.extract_strided_slice %205 {offsets = [9, 0], sizes = [9, 128], strides = [1, 1]} : vector<39x128xf32> to vector<9x128xf32>
    %254 = vector.extract_strided_slice %206 {offsets = [9, 0], sizes = [1, 128], strides = [1, 1]} : vector<31x128xf32> to vector<1x128xf32>
    %255 = vector.broadcast %254 : vector<1x128xf32> to vector<9x128xf32>
    %256 = arith.mulf %253, %255 : vector<9x128xf32>
    %257 = arith.addf %252, %256 : vector<9x128xf32>
    %258 = vector.extract_strided_slice %205 {offsets = [10, 0], sizes = [9, 128], strides = [1, 1]} : vector<39x128xf32> to vector<9x128xf32>
    %259 = vector.extract_strided_slice %206 {offsets = [10, 0], sizes = [1, 128], strides = [1, 1]} : vector<31x128xf32> to vector<1x128xf32>
    %260 = vector.broadcast %259 : vector<1x128xf32> to vector<9x128xf32>
    %261 = arith.mulf %258, %260 : vector<9x128xf32>
    %262 = arith.addf %257, %261 : vector<9x128xf32>
    %263 = vector.extract_strided_slice %205 {offsets = [11, 0], sizes = [9, 128], strides = [1, 1]} : vector<39x128xf32> to vector<9x128xf32>
    %264 = vector.extract_strided_slice %206 {offsets = [11, 0], sizes = [1, 128], strides = [1, 1]} : vector<31x128xf32> to vector<1x128xf32>
    %265 = vector.broadcast %264 : vector<1x128xf32> to vector<9x128xf32>
    %266 = arith.mulf %263, %265 : vector<9x128xf32>
    %267 = arith.addf %262, %266 : vector<9x128xf32>
    %268 = vector.extract_strided_slice %205 {offsets = [12, 0], sizes = [9, 128], strides = [1, 1]} : vector<39x128xf32> to vector<9x128xf32>
    %269 = vector.extract_strided_slice %206 {offsets = [12, 0], sizes = [1, 128], strides = [1, 1]} : vector<31x128xf32> to vector<1x128xf32>
    %270 = vector.broadcast %269 : vector<1x128xf32> to vector<9x128xf32>
    %271 = arith.mulf %268, %270 : vector<9x128xf32>
    %272 = arith.addf %267, %271 : vector<9x128xf32>
    %273 = vector.extract_strided_slice %205 {offsets = [13, 0], sizes = [9, 128], strides = [1, 1]} : vector<39x128xf32> to vector<9x128xf32>
    %274 = vector.extract_strided_slice %206 {offsets = [13, 0], sizes = [1, 128], strides = [1, 1]} : vector<31x128xf32> to vector<1x128xf32>
    %275 = vector.broadcast %274 : vector<1x128xf32> to vector<9x128xf32>
    %276 = arith.mulf %273, %275 : vector<9x128xf32>
    %277 = arith.addf %272, %276 : vector<9x128xf32>
    %278 = vector.extract_strided_slice %205 {offsets = [14, 0], sizes = [9, 128], strides = [1, 1]} : vector<39x128xf32> to vector<9x128xf32>
    %279 = vector.extract_strided_slice %206 {offsets = [14, 0], sizes = [1, 128], strides = [1, 1]} : vector<31x128xf32> to vector<1x128xf32>
    %280 = vector.broadcast %279 : vector<1x128xf32> to vector<9x128xf32>
    %281 = arith.mulf %278, %280 : vector<9x128xf32>
    %282 = arith.addf %277, %281 : vector<9x128xf32>
    %283 = vector.extract_strided_slice %205 {offsets = [15, 0], sizes = [9, 128], strides = [1, 1]} : vector<39x128xf32> to vector<9x128xf32>
    %284 = vector.extract_strided_slice %206 {offsets = [15, 0], sizes = [1, 128], strides = [1, 1]} : vector<31x128xf32> to vector<1x128xf32>
    %285 = vector.broadcast %284 : vector<1x128xf32> to vector<9x128xf32>
    %286 = arith.mulf %283, %285 : vector<9x128xf32>
    %287 = arith.addf %282, %286 : vector<9x128xf32>
    %288 = vector.extract_strided_slice %205 {offsets = [16, 0], sizes = [9, 128], strides = [1, 1]} : vector<39x128xf32> to vector<9x128xf32>
    %289 = vector.extract_strided_slice %206 {offsets = [16, 0], sizes = [1, 128], strides = [1, 1]} : vector<31x128xf32> to vector<1x128xf32>
    %290 = vector.broadcast %289 : vector<1x128xf32> to vector<9x128xf32>
    %291 = arith.mulf %288, %290 : vector<9x128xf32>
    %292 = arith.addf %287, %291 : vector<9x128xf32>
    %293 = vector.extract_strided_slice %205 {offsets = [17, 0], sizes = [9, 128], strides = [1, 1]} : vector<39x128xf32> to vector<9x128xf32>
    %294 = vector.extract_strided_slice %206 {offsets = [17, 0], sizes = [1, 128], strides = [1, 1]} : vector<31x128xf32> to vector<1x128xf32>
    %295 = vector.broadcast %294 : vector<1x128xf32> to vector<9x128xf32>
    %296 = arith.mulf %293, %295 : vector<9x128xf32>
    %297 = arith.addf %292, %296 : vector<9x128xf32>
    %298 = vector.extract_strided_slice %205 {offsets = [18, 0], sizes = [9, 128], strides = [1, 1]} : vector<39x128xf32> to vector<9x128xf32>
    %299 = vector.extract_strided_slice %206 {offsets = [18, 0], sizes = [1, 128], strides = [1, 1]} : vector<31x128xf32> to vector<1x128xf32>
    %300 = vector.broadcast %299 : vector<1x128xf32> to vector<9x128xf32>
    %301 = arith.mulf %298, %300 : vector<9x128xf32>
    %302 = arith.addf %297, %301 : vector<9x128xf32>
    %303 = vector.extract_strided_slice %205 {offsets = [19, 0], sizes = [9, 128], strides = [1, 1]} : vector<39x128xf32> to vector<9x128xf32>
    %304 = vector.extract_strided_slice %206 {offsets = [19, 0], sizes = [1, 128], strides = [1, 1]} : vector<31x128xf32> to vector<1x128xf32>
    %305 = vector.broadcast %304 : vector<1x128xf32> to vector<9x128xf32>
    %306 = arith.mulf %303, %305 : vector<9x128xf32>
    %307 = arith.addf %302, %306 : vector<9x128xf32>
    %308 = vector.extract_strided_slice %205 {offsets = [20, 0], sizes = [9, 128], strides = [1, 1]} : vector<39x128xf32> to vector<9x128xf32>
    %309 = vector.extract_strided_slice %206 {offsets = [20, 0], sizes = [1, 128], strides = [1, 1]} : vector<31x128xf32> to vector<1x128xf32>
    %310 = vector.broadcast %309 : vector<1x128xf32> to vector<9x128xf32>
    %311 = arith.mulf %308, %310 : vector<9x128xf32>
    %312 = arith.addf %307, %311 : vector<9x128xf32>
    %313 = vector.extract_strided_slice %205 {offsets = [21, 0], sizes = [9, 128], strides = [1, 1]} : vector<39x128xf32> to vector<9x128xf32>
    %314 = vector.extract_strided_slice %206 {offsets = [21, 0], sizes = [1, 128], strides = [1, 1]} : vector<31x128xf32> to vector<1x128xf32>
    %315 = vector.broadcast %314 : vector<1x128xf32> to vector<9x128xf32>
    %316 = arith.mulf %313, %315 : vector<9x128xf32>
    %317 = arith.addf %312, %316 : vector<9x128xf32>
    %318 = vector.extract_strided_slice %205 {offsets = [22, 0], sizes = [9, 128], strides = [1, 1]} : vector<39x128xf32> to vector<9x128xf32>
    %319 = vector.extract_strided_slice %206 {offsets = [22, 0], sizes = [1, 128], strides = [1, 1]} : vector<31x128xf32> to vector<1x128xf32>
    %320 = vector.broadcast %319 : vector<1x128xf32> to vector<9x128xf32>
    %321 = arith.mulf %318, %320 : vector<9x128xf32>
    %322 = arith.addf %317, %321 : vector<9x128xf32>
    %323 = vector.extract_strided_slice %205 {offsets = [23, 0], sizes = [9, 128], strides = [1, 1]} : vector<39x128xf32> to vector<9x128xf32>
    %324 = vector.extract_strided_slice %206 {offsets = [23, 0], sizes = [1, 128], strides = [1, 1]} : vector<31x128xf32> to vector<1x128xf32>
    %325 = vector.broadcast %324 : vector<1x128xf32> to vector<9x128xf32>
    %326 = arith.mulf %323, %325 : vector<9x128xf32>
    %327 = arith.addf %322, %326 : vector<9x128xf32>
    %328 = vector.extract_strided_slice %205 {offsets = [24, 0], sizes = [9, 128], strides = [1, 1]} : vector<39x128xf32> to vector<9x128xf32>
    %329 = vector.extract_strided_slice %206 {offsets = [24, 0], sizes = [1, 128], strides = [1, 1]} : vector<31x128xf32> to vector<1x128xf32>
    %330 = vector.broadcast %329 : vector<1x128xf32> to vector<9x128xf32>
    %331 = arith.mulf %328, %330 : vector<9x128xf32>
    %332 = arith.addf %327, %331 : vector<9x128xf32>
    %333 = vector.extract_strided_slice %205 {offsets = [25, 0], sizes = [9, 128], strides = [1, 1]} : vector<39x128xf32> to vector<9x128xf32>
    %334 = vector.extract_strided_slice %206 {offsets = [25, 0], sizes = [1, 128], strides = [1, 1]} : vector<31x128xf32> to vector<1x128xf32>
    %335 = vector.broadcast %334 : vector<1x128xf32> to vector<9x128xf32>
    %336 = arith.mulf %333, %335 : vector<9x128xf32>
    %337 = arith.addf %332, %336 : vector<9x128xf32>
    %338 = vector.extract_strided_slice %205 {offsets = [26, 0], sizes = [9, 128], strides = [1, 1]} : vector<39x128xf32> to vector<9x128xf32>
    %339 = vector.extract_strided_slice %206 {offsets = [26, 0], sizes = [1, 128], strides = [1, 1]} : vector<31x128xf32> to vector<1x128xf32>
    %340 = vector.broadcast %339 : vector<1x128xf32> to vector<9x128xf32>
    %341 = arith.mulf %338, %340 : vector<9x128xf32>
    %342 = arith.addf %337, %341 : vector<9x128xf32>
    %343 = vector.extract_strided_slice %205 {offsets = [27, 0], sizes = [9, 128], strides = [1, 1]} : vector<39x128xf32> to vector<9x128xf32>
    %344 = vector.extract_strided_slice %206 {offsets = [27, 0], sizes = [1, 128], strides = [1, 1]} : vector<31x128xf32> to vector<1x128xf32>
    %345 = vector.broadcast %344 : vector<1x128xf32> to vector<9x128xf32>
    %346 = arith.mulf %343, %345 : vector<9x128xf32>
    %347 = arith.addf %342, %346 : vector<9x128xf32>
    %348 = vector.extract_strided_slice %205 {offsets = [28, 0], sizes = [9, 128], strides = [1, 1]} : vector<39x128xf32> to vector<9x128xf32>
    %349 = vector.extract_strided_slice %206 {offsets = [28, 0], sizes = [1, 128], strides = [1, 1]} : vector<31x128xf32> to vector<1x128xf32>
    %350 = vector.broadcast %349 : vector<1x128xf32> to vector<9x128xf32>
    %351 = arith.mulf %348, %350 : vector<9x128xf32>
    %352 = arith.addf %347, %351 : vector<9x128xf32>
    %353 = vector.extract_strided_slice %205 {offsets = [29, 0], sizes = [9, 128], strides = [1, 1]} : vector<39x128xf32> to vector<9x128xf32>
    %354 = vector.extract_strided_slice %206 {offsets = [29, 0], sizes = [1, 128], strides = [1, 1]} : vector<31x128xf32> to vector<1x128xf32>
    %355 = vector.broadcast %354 : vector<1x128xf32> to vector<9x128xf32>
    %356 = arith.mulf %353, %355 : vector<9x128xf32>
    %357 = arith.addf %352, %356 : vector<9x128xf32>
    %358 = vector.extract_strided_slice %205 {offsets = [30, 0], sizes = [9, 128], strides = [1, 1]} : vector<39x128xf32> to vector<9x128xf32>
    %359 = vector.extract_strided_slice %206 {offsets = [30, 0], sizes = [1, 128], strides = [1, 1]} : vector<31x128xf32> to vector<1x128xf32>
    %360 = vector.broadcast %359 : vector<1x128xf32> to vector<9x128xf32>
    %361 = arith.mulf %358, %360 : vector<9x128xf32>
    %362 = arith.addf %357, %361 : vector<9x128xf32>
    %c0_84 = arith.constant 0 : index
    %c0_85 = arith.constant 0 : index
    %363 = vector.load %arg16[%c0_84, %c0_85] : memref<1x128xf32, #tpu.memory_space<vmem>>, vector<1x128xf32>
    %364 = vector.broadcast %363 : vector<1x128xf32> to vector<9x128xf32>
    %365 = arith.addf %362, %364 : vector<9x128xf32>
    %c0_86 = arith.constant 0 : index
    %c0_87 = arith.constant 0 : index
    %366 = vector.load %arg17[%c0_86, %c0_87] : memref<2x128xf32, #tpu.memory_space<vmem>>, vector<1x128xf32>
    %367 = vector.broadcast %366 : vector<1x128xf32> to vector<9x128xf32>
    %368 = arith.mulf %365, %367 : vector<9x128xf32>
    %c1 = arith.constant 1 : index
    %c0_88 = arith.constant 0 : index
    %369 = vector.load %arg17[%c1, %c0_88] : memref<2x128xf32, #tpu.memory_space<vmem>>, vector<1x128xf32>
    %370 = vector.broadcast %369 : vector<1x128xf32> to vector<9x128xf32>
    %371 = arith.addf %368, %370 : vector<9x128xf32>
    %372 = arith.negf %371 : vector<9x128xf32>
    %373 = math.exp %372 : vector<9x128xf32>
    %cst_89 = arith.constant 1.000000e+00 : f32
    %374 = vector.broadcast %cst_89 : f32 to vector<9x128xf32>
    %375 = arith.addf %374, %373 : vector<9x128xf32>
    %376 = arith.divf %374, %375 : vector<9x128xf32>
    %377 = arith.mulf %371, %376 : vector<9x128xf32>
    %c0_90 = arith.constant 0 : index
    %c0_91 = arith.constant 0 : index
    %378 = vector.load %arg18[%c0_90, %c0_91] : memref<128x64xbf16, #tpu.memory_space<vmem>>, vector<128x64xbf16>
    %379 = arith.truncf %377 : vector<9x128xf32> to vector<9x128xbf16>
    %cst_92 = arith.constant dense<0.000000e+00> : vector<9x64xf32>
    %380 = tpu.matmul %379, %378, %cst_92 {dimension_numbers = #tpu.dot_dimension_numbers<[1], [0], [0], [1], [0, 0, 1, 1], [], []>} : vector<9x128xbf16>, vector<128x64xbf16>, vector<9x64xf32> -> vector<9x64xf32>
    %c0_93 = arith.constant 0 : index
    %c0_94 = arith.constant 0 : index
    %381 = vector.load %arg19[%c0_93, %c0_94] : memref<1x64xf32, #tpu.memory_space<vmem>>, vector<1x64xf32>
    %382 = vector.broadcast %381 : vector<1x64xf32> to vector<9x64xf32>
    %383 = arith.addf %380, %382 : vector<9x64xf32>
    %384 = arith.addf %164, %383 : vector<9x64xf32>
    %c0_95 = arith.constant 0 : index
    %c0_96 = arith.constant 0 : index
    %385 = vector.load %arg20[%c0_95, %c0_96] : memref<2x64xf32, #tpu.memory_space<vmem>>, vector<2x64xf32>
    %cst_97 = arith.constant dense<0.000000e+00> : vector<9xf32>
    %386 = vector.multi_reduction <add>, %384, %cst_97 [1] : vector<9x64xf32> to vector<9xf32>
    %387 = vector.shape_cast %386 : vector<9xf32> to vector<9x1xf32>
    %cst_98 = arith.constant 6.400000e+01 : f32
    %388 = vector.broadcast %cst_98 : f32 to vector<9x1xf32>
    %389 = arith.divf %387, %388 : vector<9x1xf32>
    %390 = vector.broadcast %389 : vector<9x1xf32> to vector<9x64xf32>
    %391 = arith.subf %384, %390 : vector<9x64xf32>
    %392 = arith.mulf %391, %391 : vector<9x64xf32>
    %cst_99 = arith.constant dense<0.000000e+00> : vector<9xf32>
    %393 = vector.multi_reduction <add>, %392, %cst_99 [1] : vector<9x64xf32> to vector<9xf32>
    %394 = vector.shape_cast %393 : vector<9xf32> to vector<9x1xf32>
    %cst_100 = arith.constant 6.400000e+01 : f32
    %395 = vector.broadcast %cst_100 : f32 to vector<9x1xf32>
    %396 = arith.divf %394, %395 : vector<9x1xf32>
    %cst_101 = arith.constant 9.99999974E-6 : f32
    %397 = vector.broadcast %cst_101 : f32 to vector<9x1xf32>
    %398 = arith.addf %396, %397 : vector<9x1xf32>
    %399 = math.rsqrt %398 : vector<9x1xf32>
    %400 = vector.broadcast %399 : vector<9x1xf32> to vector<9x64xf32>
    %401 = arith.mulf %391, %400 : vector<9x64xf32>
    %402 = vector.extract_strided_slice %385 {offsets = [0, 0], sizes = [1, 64], strides = [1, 1]} : vector<2x64xf32> to vector<1x64xf32>
    %403 = vector.broadcast %402 : vector<1x64xf32> to vector<9x64xf32>
    %404 = arith.mulf %401, %403 : vector<9x64xf32>
    %405 = vector.extract_strided_slice %385 {offsets = [1, 0], sizes = [1, 64], strides = [1, 1]} : vector<2x64xf32> to vector<1x64xf32>
    %406 = vector.broadcast %405 : vector<1x64xf32> to vector<9x64xf32>
    %407 = arith.addf %404, %406 : vector<9x64xf32>
    %c0_102 = arith.constant 0 : index
    %c0_103 = arith.constant 0 : index
    %408 = vector.load %arg21[%c0_102, %c0_103] : memref<64x256xbf16, #tpu.memory_space<vmem>>, vector<64x256xbf16>
    %409 = arith.truncf %407 : vector<9x64xf32> to vector<9x64xbf16>
    %cst_104 = arith.constant dense<0.000000e+00> : vector<9x256xf32>
    %410 = tpu.matmul %409, %408, %cst_104 {dimension_numbers = #tpu.dot_dimension_numbers<[1], [0], [0], [1], [0, 0, 1, 1], [], []>} : vector<9x64xbf16>, vector<64x256xbf16>, vector<9x256xf32> -> vector<9x256xf32>
    %c0_105 = arith.constant 0 : index
    %c0_106 = arith.constant 0 : index
    %411 = vector.load %arg22[%c0_105, %c0_106] : memref<1x256xf32, #tpu.memory_space<vmem>>, vector<1x256xf32>
    %412 = vector.broadcast %411 : vector<1x256xf32> to vector<9x256xf32>
    %413 = arith.addf %410, %412 : vector<9x256xf32>
    %414 = arith.negf %413 : vector<9x256xf32>
    %415 = math.exp %414 : vector<9x256xf32>
    %cst_107 = arith.constant 1.000000e+00 : f32
    %416 = vector.broadcast %cst_107 : f32 to vector<9x256xf32>
    %417 = arith.addf %416, %415 : vector<9x256xf32>
    %418 = arith.divf %416, %417 : vector<9x256xf32>
    %419 = arith.mulf %413, %418 : vector<9x256xf32>
    %c0_108 = arith.constant 0 : index
    %c0_109 = arith.constant 0 : index
    %420 = vector.load %arg23[%c0_108, %c0_109] : memref<256x64xbf16, #tpu.memory_space<vmem>>, vector<256x64xbf16>
    %421 = arith.truncf %419 : vector<9x256xf32> to vector<9x256xbf16>
    %cst_110 = arith.constant dense<0.000000e+00> : vector<9x64xf32>
    %422 = tpu.matmul %421, %420, %cst_110 {dimension_numbers = #tpu.dot_dimension_numbers<[1], [0], [0], [1], [0, 0, 1, 1], [], []>} : vector<9x256xbf16>, vector<256x64xbf16>, vector<9x64xf32> -> vector<9x64xf32>
    %c0_111 = arith.constant 0 : index
    %c0_112 = arith.constant 0 : index
    %423 = vector.load %arg24[%c0_111, %c0_112] : memref<1x64xf32, #tpu.memory_space<vmem>>, vector<1x64xf32>
    %424 = vector.broadcast %423 : vector<1x64xf32> to vector<9x64xf32>
    %425 = arith.addf %422, %424 : vector<9x64xf32>
    %cst_113 = arith.constant 5.000000e-01 : f32
    %426 = vector.broadcast %cst_113 : f32 to vector<9x64xf32>
    %427 = arith.mulf %426, %425 : vector<9x64xf32>
    %428 = arith.addf %384, %427 : vector<9x64xf32>
    %c0_114 = arith.constant 0 : index
    %c0_115 = arith.constant 0 : index
    %429 = vector.load %arg25[%c0_114, %c0_115] : memref<2x64xf32, #tpu.memory_space<vmem>>, vector<2x64xf32>
    %cst_116 = arith.constant dense<0.000000e+00> : vector<9xf32>
    %430 = vector.multi_reduction <add>, %428, %cst_116 [1] : vector<9x64xf32> to vector<9xf32>
    %431 = vector.shape_cast %430 : vector<9xf32> to vector<9x1xf32>
    %cst_117 = arith.constant 6.400000e+01 : f32
    %432 = vector.broadcast %cst_117 : f32 to vector<9x1xf32>
    %433 = arith.divf %431, %432 : vector<9x1xf32>
    %434 = vector.broadcast %433 : vector<9x1xf32> to vector<9x64xf32>
    %435 = arith.subf %428, %434 : vector<9x64xf32>
    %436 = arith.mulf %435, %435 : vector<9x64xf32>
    %cst_118 = arith.constant dense<0.000000e+00> : vector<9xf32>
    %437 = vector.multi_reduction <add>, %436, %cst_118 [1] : vector<9x64xf32> to vector<9xf32>
    %438 = vector.shape_cast %437 : vector<9xf32> to vector<9x1xf32>
    %cst_119 = arith.constant 6.400000e+01 : f32
    %439 = vector.broadcast %cst_119 : f32 to vector<9x1xf32>
    %440 = arith.divf %438, %439 : vector<9x1xf32>
    %cst_120 = arith.constant 9.99999974E-6 : f32
    %441 = vector.broadcast %cst_120 : f32 to vector<9x1xf32>
    %442 = arith.addf %440, %441 : vector<9x1xf32>
    %443 = math.rsqrt %442 : vector<9x1xf32>
    %444 = vector.broadcast %443 : vector<9x1xf32> to vector<9x64xf32>
    %445 = arith.mulf %435, %444 : vector<9x64xf32>
    %446 = vector.extract_strided_slice %429 {offsets = [0, 0], sizes = [1, 64], strides = [1, 1]} : vector<2x64xf32> to vector<1x64xf32>
    %447 = vector.broadcast %446 : vector<1x64xf32> to vector<9x64xf32>
    %448 = arith.mulf %445, %447 : vector<9x64xf32>
    %449 = vector.extract_strided_slice %429 {offsets = [1, 0], sizes = [1, 64], strides = [1, 1]} : vector<2x64xf32> to vector<1x64xf32>
    %450 = vector.broadcast %449 : vector<1x64xf32> to vector<9x64xf32>
    %451 = arith.addf %448, %450 : vector<9x64xf32>
    %c0_121 = arith.constant 0 : index
    %c0_122 = arith.constant 0 : index
    %c0_123 = arith.constant 0 : index
    %452 = vector.load %arg26[%c0_121, %c0_122, %c0_123] : memref<1x9x64xf32, #tpu.memory_space<vmem>>, vector<1x9x64xf32>
    %453 = vector.shape_cast %452 : vector<1x9x64xf32> to vector<9x64xf32>
    %454 = vector.shape_cast %451 : vector<9x64xf32> to vector<1x9x64xf32>
    tpu.vector_store %arg26[%c0_121, %c0_122, %c0_123], %454 {strides = array<i32>} : memref<1x9x64xf32, #tpu.memory_space<vmem>>, vector<1x9x64xf32>,
    return
  }
  func.func @transform_0(%arg0: i32) -> (i32, i32, i32) {
    %c0_i32 = arith.constant 0 : i32
    %c0_i32_0 = arith.constant 0 : i32
    %c0_i32_1 = arith.constant 0 : i32
    return %arg0, %c0_i32, %c0_i32_0 : i32, i32, i32
  }
  func.func @transform_1(%arg0: i32) -> (i32, i32) {
    %c0_i32 = arith.constant 0 : i32
    %c0_i32_0 = arith.constant 0 : i32
    %c0_i32_1 = arith.constant 0 : i32
    return %c0_i32, %c0_i32_0 : i32, i32
  }
  func.func @transform_2(%arg0: i32) -> (i32, i32) {
    %c0_i32 = arith.constant 0 : i32
    %c0_i32_0 = arith.constant 0 : i32
    %c0_i32_1 = arith.constant 0 : i32
    return %c0_i32, %c0_i32_0 : i32, i32
  }
  func.func @transform_3(%arg0: i32) -> (i32, i32) {
    %c0_i32 = arith.constant 0 : i32
    %c0_i32_0 = arith.constant 0 : i32
    %c0_i32_1 = arith.constant 0 : i32
    return %c0_i32, %c0_i32_0 : i32, i32
  }
  func.func @transform_4(%arg0: i32) -> (i32, i32) {
    %c0_i32 = arith.constant 0 : i32
    %c0_i32_0 = arith.constant 0 : i32
    %c0_i32_1 = arith.constant 0 : i32
    return %c0_i32, %c0_i32_0 : i32, i32
  }
  func.func @transform_5(%arg0: i32) -> (i32, i32) {
    %c0_i32 = arith.constant 0 : i32
    %c0_i32_0 = arith.constant 0 : i32
    %c0_i32_1 = arith.constant 0 : i32
    return %c0_i32, %c0_i32_0 : i32, i32
  }
  func.func @transform_6(%arg0: i32) -> (i32, i32) {
    %c0_i32 = arith.constant 0 : i32
    %c0_i32_0 = arith.constant 0 : i32
    %c0_i32_1 = arith.constant 0 : i32
    return %c0_i32, %c0_i32_0 : i32, i32
  }
  func.func @transform_7(%arg0: i32) -> (i32, i32) {
    %c0_i32 = arith.constant 0 : i32
    %c0_i32_0 = arith.constant 0 : i32
    %c0_i32_1 = arith.constant 0 : i32
    return %c0_i32, %c0_i32_0 : i32, i32
  }
  func.func @transform_8(%arg0: i32) -> (i32, i32) {
    %c0_i32 = arith.constant 0 : i32
    %c0_i32_0 = arith.constant 0 : i32
    %c0_i32_1 = arith.constant 0 : i32
    return %c0_i32, %c0_i32_0 : i32, i32
  }
  func.func @transform_9(%arg0: i32) -> (i32, i32) {
    %c0_i32 = arith.constant 0 : i32
    %c0_i32_0 = arith.constant 0 : i32
    %c0_i32_1 = arith.constant 0 : i32
    return %c0_i32, %c0_i32_0 : i32, i32
  }
  func.func @transform_10(%arg0: i32) -> (i32, i32, i32) {
    %c0_i32 = arith.constant 0 : i32
    %c0_i32_0 = arith.constant 0 : i32
    %c0_i32_1 = arith.constant 0 : i32
    %c0_i32_2 = arith.constant 0 : i32
    return %c0_i32, %c0_i32_0, %c0_i32_1 : i32, i32, i32
  }
  func.func @transform_11(%arg0: i32) -> (i32, i32) {
    %c0_i32 = arith.constant 0 : i32
    %c0_i32_0 = arith.constant 0 : i32
    %c0_i32_1 = arith.constant 0 : i32
    return %c0_i32, %c0_i32_0 : i32, i32
  }
  func.func @transform_12(%arg0: i32) -> (i32, i32) {
    %c0_i32 = arith.constant 0 : i32
    %c0_i32_0 = arith.constant 0 : i32
    %c0_i32_1 = arith.constant 0 : i32
    return %c0_i32, %c0_i32_0 : i32, i32
  }
  func.func @transform_13(%arg0: i32) -> (i32, i32) {
    %c0_i32 = arith.constant 0 : i32
    %c0_i32_0 = arith.constant 0 : i32
    %c0_i32_1 = arith.constant 0 : i32
    return %c0_i32, %c0_i32_0 : i32, i32
  }
  func.func @transform_14(%arg0: i32) -> (i32, i32) {
    %c0_i32 = arith.constant 0 : i32
    %c0_i32_0 = arith.constant 0 : i32
    %c0_i32_1 = arith.constant 0 : i32
    return %c0_i32, %c0_i32_0 : i32, i32
  }
  func.func @transform_15(%arg0: i32) -> (i32, i32) {
    %c0_i32 = arith.constant 0 : i32
    %c0_i32_0 = arith.constant 0 : i32
    %c0_i32_1 = arith.constant 0 : i32
    return %c0_i32, %c0_i32_0 : i32, i32
  }
  func.func @transform_16(%arg0: i32) -> (i32, i32) {
    %c0_i32 = arith.constant 0 : i32
    %c0_i32_0 = arith.constant 0 : i32
    %c0_i32_1 = arith.constant 0 : i32
    return %c0_i32, %c0_i32_0 : i32, i32
  }
  func.func @transform_17(%arg0: i32) -> (i32, i32) {
    %c0_i32 = arith.constant 0 : i32
    %c0_i32_0 = arith.constant 0 : i32
    %c0_i32_1 = arith.constant 0 : i32
    return %c0_i32, %c0_i32_0 : i32, i32
  }
  func.func @transform_18(%arg0: i32) -> (i32, i32) {
    %c0_i32 = arith.constant 0 : i32
    %c0_i32_0 = arith.constant 0 : i32
    %c0_i32_1 = arith.constant 0 : i32
    return %c0_i32, %c0_i32_0 : i32, i32
  }
  func.func @transform_19(%arg0: i32) -> (i32, i32) {
    %c0_i32 = arith.constant 0 : i32
    %c0_i32_0 = arith.constant 0 : i32
    %c0_i32_1 = arith.constant 0 : i32
    return %c0_i32, %c0_i32_0 : i32, i32
  }
  func.func @transform_20(%arg0: i32) -> (i32, i32) {
    %c0_i32 = arith.constant 0 : i32
    %c0_i32_0 = arith.constant 0 : i32
    %c0_i32_1 = arith.constant 0 : i32
    return %c0_i32, %c0_i32_0 : i32, i32
  }
  func.func @transform_21(%arg0: i32) -> (i32, i32) {
    %c0_i32 = arith.constant 0 : i32
    %c0_i32_0 = arith.constant 0 : i32
    %c0_i32_1 = arith.constant 0 : i32
    return %c0_i32, %c0_i32_0 : i32, i32
  }
  func.func @transform_22(%arg0: i32) -> (i32, i32) {
    %c0_i32 = arith.constant 0 : i32
    %c0_i32_0 = arith.constant 0 : i32
    %c0_i32_1 = arith.constant 0 : i32
    return %c0_i32, %c0_i32_0 : i32, i32
  }
  func.func @transform_23(%arg0: i32) -> (i32, i32) {
    %c0_i32 = arith.constant 0 : i32
    %c0_i32_0 = arith.constant 0 : i32
    %c0_i32_1 = arith.constant 0 : i32
    return %c0_i32, %c0_i32_0 : i32, i32
  }
  func.func @transform_24(%arg0: i32) -> (i32, i32) {
    %c0_i32 = arith.constant 0 : i32
    %c0_i32_0 = arith.constant 0 : i32
    %c0_i32_1 = arith.constant 0 : i32
    return %c0_i32, %c0_i32_0 : i32, i32
  }
  func.func @transform_25(%arg0: i32) -> (i32, i32, i32) {
    %c0_i32 = arith.constant 0 : i32
    %c0_i32_0 = arith.constant 0 : i32
    %c0_i32_1 = arith.constant 0 : i32
    return %arg0, %c0_i32, %c0_i32_0 : i32, i32, i32
  }
}

</mosaic_0001>

<bundles_post_ra>
// kernel: my_conformer_forward.5
= control target key start
LH: loop header
LB: loop body
LE: loop exit
PB: predicated region body
PF: predicated region fallthrough
CT: control target
= control target key end

     0   :  { %v191_v3 = vmov 0.0|0.0   ;;  %vm192_vm0 = vmmov 0   ;;  %v193_v6 = vmov 0.0   ;;  %s257_s0 = inlined_call_operand.vmem [shape: f32[2,64], index: 0, kind: input, shape index: {}]   ;;  %s258_s1 = inlined_call_operand.vmem [shape: f32[64,2], index: 1, kind: input, shape index: {}]   ;;  %s259_s2 = inlined_call_operand.vmem [shape: f32[1,2], index: 2, kind: input, shape index: {}]   ;;  %s260_s3 = inlined_call_operand.hbm [shape: f32[2,2], index: 3, kind: output, shape index: {}]  }
   0x1   :  { %v16_v0 = vld [vmem:[%s258_s1] sm:$0xff]  ;;  %v17_v1 = vld [vmem:[%s258_s1 + $0x8] sm:$0xff]  ;;  %v18_v2 = vld [vmem:[%s258_s1 + $0x10] sm:$0xff]  ;;  %151 = vmatprep.subr.bf16.mxu0 %v191_v3  ;;  %148 = vmatprep.mubr.msk.f32.mxu0 %vm192_vm0, %v193_v6 }
   0x2   :  { %v152_v4 = vpack.c.bf16 %v17_v1, %v16_v0  ;;  %v19_v5 = vld [vmem:[%s258_s1 + $0x18] sm:$0xff] }
   0x3   :  { %v155_v7 = vpack.c.bf16 %v19_v5, %v18_v2 }
   0x4   :  { %153 = vmatpush3.bf16.msra.mxu0 %v152_v4 }
   0x5   :  { %8 = vsyncpa [#allocation3], 0  ;;  %154 = vmatprep.subr.bf16.mxu0 %v191_v3  ;;  %v20_v8 = vld [vmem:[%s258_s1 + $0x20] sm:$0xff]  ;;  %v21_v9 = vld [vmem:[%s258_s1 + $0x28] sm:$0xff]  ;;  %vm31_vm1 = vcmask 523264   ;;  %s194_s5 = smov [#allocation2]  }
   0x6   :  { %v158_v10 = vpack.c.bf16 %v21_v9, %v20_v8  ;;  %v22_v11 = vld [vmem:[%s258_s1 + $0x30] sm:$0xff]  ;;  %v23_v12 = vld [vmem:[%s258_s1 + $0x38] sm:$0xff]  ;;  %v15_v14 = vld [vmem:[%s257_s0] sm:$0x3]  ;;  %s113_s6 = sshll.u32 %s194_s5, 4  ;;  %vm105_vm2 = vcmask 9216   ;;  %s114_s6 = int_to_ptr.vmem [resolvable:$true] %s113_s6 }
   0x7   :  { %v161_v13 = vpack.c.bf16 %v23_v12, %v22_v11  ;;  %v121_v15 = vld [vmem:[%s259_s2] ss:$0 sm:$0xff]  ;;  %s167_s1 = scalar_lea.vmem %s114_s6, 32  ;;  %p172_p1 = scmp.lt.s32.totalorder %s114_s6, %s114_s6 }
   0x8   :  { %156 = vmatpush3.bf16.msra.mxu0 %v155_v7  ;;  %p168_p0 = scmp.ne.s32.totalorder %s114_s6, %s167_s1  ;;  %p173_p2 = scmp.lt.s32.totalorder %s167_s1, %s167_s1 }
   0x9   :  { %157 = vmatprep.subr.bf16.mxu0 %v191_v3 }
   0xa   :  { %p174_p3 = por %p173_p2, %p172_p1 }
   0xc   :  { %159 = vmatpush3.bf16.msra.mxu0 %v158_v10  ;;  %p175_p4 = pnand %p174_p3, %p168_p0 }
   0xd   :  { %160 = vmatprep.subr.bf16.mxu0 %v191_v3 }
  0x10   :  { %162 = vmatpush3.bf16.msra.mxu0 %v161_v13 }
  0x13   :  { %149 = vmatmul.mubr.msk.f32.vlgmr.msra.gmra.mrb[0].mxu0 %vm31_vm1, %v15_v14 }
  0xe6   :  { %v101_v16 = vpop.f32.mrb[0].mxu0 }
  0xe7   :  { %v102_v17 = vadd.f32 %v121_v15, %v101_v16  ;;  %v150_v18 = vpop.f32.mrb[1].mxu0 }
  0xe9   :  { %106 = vst.msk [vmem:[#allocation2] sm:$0x3] %vm105_vm2, %v102_v17 }
  0xea   :  { %178 = shalt.err (!%p175_p4)
}
  0xeb   :  { %s179_s8 = scalar_lea.hbm %s260_s3, 32 }
  0xec   :  { %p180_p5 = scmp.ne.s32.totalorder %s260_s3, %s179_s8  ;;  %p183_p6 = scmp.lt.u32.totalorder %s179_s8, %s260_s3 }
  0xee   :  { %p185_p7 = pnand %p183_p6, %p180_p5 }
  0xf0   :  { %188 = shalt.err (!%p185_p7)
}
  0xf1   :  { %116 = dma.vmem_to_hbm [thread:$0]  %s114_s6, 32, %s260_s3, [#allocation3]  }
  0xf2   :  { %189 = dma.done.wait [#allocation3], 32  }
  0xf3   :  { %190 = vsyncadd [#allocation3], 4294967264 }
  0xf4   :  { %120 = vsyncpa [#allocation3], 1 }

// kernel: my_conformer_forward.3
= control target key start
LH: loop header
LB: loop body
LE: loop exit
PB: predicated region body
PF: predicated region fallthrough
CT: control target
= control target key end

     0   :  { %s7731_s29 = smov 0   ;;  %s8914_s0 = inlined_call_operand.vmem [shape: f32[2,9,64], index: 0, kind: input, shape index: {}]   ;;  %s8915_s1 = inlined_call_operand.vmem [shape: f32[2,64], index: 1, kind: input, shape index: {}]   ;;  %s8916_s2 = inlined_call_operand.vmem [shape: bf16[64,256], index: 2, kind: input, shape index: {}]   ;;  %s8917_s3 = inlined_call_operand.vmem [shape: f32[1,256], index: 3, kind: input, shape index: {}]   ;;  %s8918_s4 = inlined_call_operand.vmem [shape: bf16[256,64], index: 4, kind: input, shape index: {}]   ;;  %s8919_s5 = inlined_call_operand.vmem [shape: f32[1,64], index: 5, kind: input, shape index: {}]   ;;  %s8920_s6 = inlined_call_operand.vmem [shape: f32[2,64], index: 6, kind: input, shape index: {}]   ;;  %s8921_s7 = inlined_call_operand.vmem [shape: bf16[64,192], index: 7, kind: input, shape index: {}]   ;;  %s8922_s8 = inlined_call_operand.vmem [shape: bf16[64,64], index: 8, kind: input, shape index: {}]   ;;  %s8923_s9 = inlined_call_operand.vmem [shape: f32[1,64], index: 9, kind: input, shape index: {}]   ;;  %s8924_s10 = inlined_call_operand.vmem [shape: f32[9,9,16], index: 10, kind: input, shape index: {}]   ;;  %s8925_s11 = inlined_call_operand.vmem [shape: f32[2,64], index: 11, kind: input, shape index: {}]   ;;  %s8926_s12 = inlined_call_operand.vmem [shape: bf16[64,256], index: 12, kind: input, shape index: {}]   ;;  %s8927_s13 = inlined_call_operand.vmem [shape: f32[1,256], index: 13, kind: input, shape index: {}]   ;;  %s8928_s14 = inlined_call_operand.vmem [shape: f32[31,128], index: 14, kind: input, shape index: {}]   ;;  %s8929_s15 = inlined_call_operand.vmem [shape: f32[1,128], index: 15, kind: input, shape index: {}]   ;;  %s8930_s16 = inlined_call_operand.vmem [shape: f32[2,128], index: 16, kind: input, shape index: {}]   ;;  %s8931_s17 = inlined_call_operand.vmem [shape: bf16[128,64], index: 17, kind: input, shape index: {}]   ;;  %s8932_s18 = inlined_call_operand.vmem [shape: f32[1,64], index: 18, kind: input, shape index: {}]   ;;  %s8933_s19 = inlined_call_operand.vmem [shape: f32[2,64], index: 19, kind: input, shape index: {}]   ;;  %s8934_s20 = inlined_call_operand.vmem [shape: bf16[64,256], index: 20, kind: input, shape index: {}]   ;;  %s8935_s21 = inlined_call_operand.vmem [shape: f32[1,256], index: 21, kind: input, shape index: {}]   ;;  %s8936_s22 = inlined_call_operand.vmem [shape: bf16[256,64], index: 22, kind: input, shape index: {}]   ;;  %s8937_s23 = inlined_call_operand.vmem [shape: f32[1,64], index: 23, kind: input, shape index: {}]   ;;  %s8938_s24 = inlined_call_operand.vmem [shape: f32[2,64], index: 24, kind: input, shape index: {}]   ;;  %s8939_s25 = inlined_call_operand.vmem [shape: f32[2,9,64], index: 25, kind: output, shape index: {}]  }
   0x1   :  { %8946 = sst [smem:[#allocation3_spill]] %s8914_s0 }
   0x2   :  { %8947 = sst [smem:[#allocation4_spill]] %s8915_s1 }
   0x3   :  { %8948 = sst [smem:[#allocation5_spill]] %s8916_s2 }
   0x4   :  { %8949 = sst [smem:[#allocation6_spill]] %s8917_s3 }
   0x5   :  { %8950 = sst [smem:[#allocation7_spill]] %s8918_s4 }
   0x6   :  { %8951 = sst [smem:[#allocation8_spill]] %s8919_s5 }
   0x7   :  { %8952 = sst [smem:[#allocation9_spill]] %s8920_s6 }
   0x8   :  { %8953 = sst [smem:[#allocation10_spill]] %s8921_s7 }
   0x9   :  { %8954 = sst [smem:[#allocation11_spill]] %s8922_s8 }
   0xa   :  { %8955 = sst [smem:[#allocation12_spill]] %s8923_s9 }
   0xb LB: > { %s6337_s2 = sadd.s32 4294967295, %s7586_s29   ;;  %p6341_p0 = scmp.ge.s32.totalorder %s7586_s29, 1  ;;  %s7586_s29 = sphi %s7731_s29, %s35_s29  }
   0xc   : > { %p687_p1 = scmp.lt.s32.totalorder %s7586_s29, 3 }
   0xe   : > { %p688_p2 = pnand %p6341_p0, %p687_p1 }
   0xf   : > { %p755_p3 = scmp.lt.s32.totalorder (!%p688_p2), %s6337_s2, 1  ;;  %vm769_vm0 = vcmask (!%p688_p2), 523264   ;;  %vm773_vm1 = vcmask (!%p688_p2), 516096   ;;  %s8956_s3 = sld [smem:[#allocation3_spill]] (!%p688_p2)  ;;  %v7588_v22 = vmov (!%p688_p2), 0   ;;  %v798_v27 = vlaneseq (!%p688_p2) }
  0x10   : > { %691 = sbr.rel (%p688_p2) target bundleno = 6283 (0x188b), region = 120  ;;  %s8957_s27 = sld [smem:[#allocation5_spill]] (!%p688_p2)  ;;  %906 = vmatprep.mubr.bf16.mxu0 (!%p688_p2), %v7588_v22  ;;  %vm1344_vm2 = vcmask (!%p688_p2), 130048   ;;  %vm7590_vm4 = vmmov (!%p688_p2), 0   ;;  %vm2198_vm5 = vcmask (!%p688_p2), 1040384   ;;  %vm7595_vm6 = vmmov (!%p688_p2), 1  }
  0x11   : > { %v7784_v30 = vshrl.u32 (!%p688_p2), %v798_v27, 7  ;;  %s8958_s30 = sld [smem:[#allocation4_spill]] (!%p688_p2)  ;;  %s8960_s4 = sld [smem:[#allocation6_spill]] (!%p688_p2)  ;;  %vm7910_vm3 = vmpackc.low (!%p688_p2), %vm1344_vm2, %vm1344_vm2  ;;  %vm2061_vm8 = vcmask (!%p688_p2), 1041409   ;;  %vm2064_vm9 = vcmask (!%p688_p2), 1042434   ;;  %vm2067_vm10 = vcmask (!%p688_p2), 1043459  }
  0x12   : > { %s8961_s5 = sld [smem:[#allocation8_spill]] (!%p688_p2)  ;;  %s8962_s7 = sld [smem:[#allocation10_spill]] (!%p688_p2)  ;;  %vm8112_vm7 = vmpackc.low (!%p688_p2), %vm2198_vm5, %vm7595_vm6  ;;  %vm2070_vm11 = vcmask (!%p688_p2), 1044484   ;;  %vm2073_vm12 = vcmask (!%p688_p2), 1045509   ;;  %vm2076_vm13 = vcmask (!%p688_p2), 1046534   ;;  %vm2079_vm14 = vcmask (!%p688_p2), 1047559  }
  0x13   : > { %v7787_v31 = vsub.s32 (!%p688_p2), 0, %v7784_v30  ;;  %v7794_v36 = vsub.s32 (!%p688_p2), 1, %v7784_v30  ;;  %s8963_s9 = sld [smem:[#allocation9_spill]] (!%p688_p2)  ;;  %s7594_s0 = smov (!%p688_p2), 112   ;;  %vm2168_vm15 = vcmask (!%p688_p2), 72704   ;;  %vm2172_vm6 = vcmask (!%p688_p2), 65536  }
  0x14   : > { %s8969_s8 = sld [smem:[#allocation12_spill]] (!%p688_p2) }
  0x16   : > { %v7387_v14 = vld [vmem:[%s8957_s27 + $0x4] ss:$8 sps:$4 sm:$0xff] (!%p688_p2)   ;;  %v7389_v15 = vld [vmem:[%s8957_s27] ss:$8 sps:$4 sm:$0xff] (!%p688_p2)   ;;  %v7390_v16 = vld [vmem:[%s8957_s27 + $0x14] ss:$8 sps:$4 sm:$0xff] (!%p688_p2)  }
  0x17   : > { %s8972_s2 = smov (!%p755_p3, %s6337_s2), 1  ;;  %874 = vmatprep.subr.bf16.mxu0 %v7387_v14  ;;  %v7392_v17 = vld [vmem:[%s8957_s27 + $0x10] ss:$8 sps:$4 sm:$0xff]   ;;  %v7393_v18 = vld [vmem:[%s8957_s27 + $0x24] ss:$8 sps:$4 sm:$0xff]  }
  0x18   : > { %s8944_s6 = sshll.u32 %s8972_s2, 4  ;;  %875 = vmatpush1.bf16.msra.mxu0 %v7389_v15  ;;  %v7395_v19 = vld [vmem:[%s8957_s27 + $0x20] ss:$8 sps:$4 sm:$0xff]   ;;  %v7396_v20 = vld [vmem:[%s8957_s27 + $0x34] ss:$8 sps:$4 sm:$0xff]   ;;  %s8970_s1 = sshll.u32 %s8972_s2, 4 }
  0x19   : > { %s759_s26 = scalar_lea.vmem %s8956_s3, %s8944_s6  ;;  %876 = vmatprep.subr.bf16.mxu0 %v7390_v16  ;;  %v7398_v21 = vld [vmem:[%s8957_s27 + $0x30] ss:$8 sps:$4 sm:$0xff]   ;;  %v768_v32 = vld [vmem:[%s8958_s30] sm:$0x3]  ;;  %s7599_s30 = smov 80  }
  0x1a   : > { %v7747_v0 = vld [vmem:[%s759_s26] sm:$0xff]  ;;  %v7749_v1 = vld [vmem:[%s759_s26 + $0x8] sm:$0x1]  ;;  %v801_v35 = vrot.slane %v768_v32, %v7787_v31  ;;  %v807_v40 = vrot.slane %v768_v32, %v7794_v36  ;;  %s8959_s26 = sld [smem:[#allocation7_spill]]  ;;  %s7600_s3 = smov 16  }
  0x1b   : > { %v770_v2 = vsel %vm769_vm0, %v7747_v0, 0.0  ;;  %v774_v3 = vsel %vm773_vm1, %v7749_v1, 0.0  ;;  %v819_v61 = vld [vmem:[%s8960_s4] sm:$0x3]  ;;  %s7593_s4 = smov 64   ;;  %s764_s28 = scalar_lea.vmem %s8939_s25, %s8970_s1 }
  0x1c   : > { %771 = vadd.xlane.f32.xlu0 %v770_v2  ;;  %877 = vmatpush1.bf16.msra.mxu0 %v7392_v17  ;;  %v824_v62 = vrot.slane %v819_v61, %v7787_v31  ;;  %v828_v63 = vrot.slane %v819_v61, %v7794_v36  ;;  %v7420_v61 = vld [vmem:[%s8962_s7 + $0x14] ss:$8 sps:$4 sm:$0xff]  }
  0x1d   : > { %878 = vmatprep.subr.bf16.mxu0 %v7393_v18 }
  0x20   : > { %775 = vadd.xlane.f32.xlu0 %v774_v3  ;;  %879 = vmatpush1.bf16.msra.mxu0 %v7395_v19  ;;  %v7399_v45 = vld [vmem:[%s8959_s26 + $0x40] sm:$0xff]   ;;  %v7401_v47 = vld [vmem:[%s8959_s26 + $0x48] sm:$0xff]   ;;  %v7403_v49 = vld [vmem:[%s8959_s26 + $0x50] sm:$0xff]  }
  0x21   : > { %880 = vmatprep.subr.bf16.mxu0 %v7396_v20  ;;  %v7400_v46 = vld [vmem:[%s8959_s26] sm:$0xff]   ;;  %6586 = vmatprep.subr.bf16.mxu1 %v7399_v45  ;;  %v7402_v48 = vld [vmem:[%s8959_s26 + $0x8] sm:$0xff]   ;;  %v7404_v50 = vld [vmem:[%s8959_s26 + $0x10] sm:$0xff]  }
  0x22   : > { %6587 = vmatpush3.bf16.msra.mxu1 %v7400_v46  ;;  %v7405_v51 = vld [vmem:[%s8959_s26 + $0x58] sm:$0xff]   ;;  %v7407_v53 = vld [vmem:[%s8959_s26 + $0x60] sm:$0xff]   ;;  %v7409_v55 = vld [vmem:[%s8959_s26 + $0x68] sm:$0xff]  }
  0x23   : > { %6588 = vmatprep.subr.bf16.mxu1 %v7401_v47  ;;  %v7406_v52 = vld [vmem:[%s8959_s26 + $0x18] sm:$0xff]   ;;  %v7408_v54 = vld [vmem:[%s8959_s26 + $0x20] sm:$0xff]   ;;  %v7410_v56 = vld [vmem:[%s8959_s26 + $0x28] sm:$0xff]  }
  0x24   : > { %881 = vmatpush1.bf16.msra.mxu0 %v7398_v21  ;;  %v7411_v57 = vld [vmem:[%s8959_s26 + $0x70] sm:$0xff]   ;;  %v7413_v59 = vld [vmem:[%s8959_s26 + $0x78] sm:$0xff]  }
  0x25   : > { %v7412_v58 = vld [vmem:[%s8959_s26 + $0x30] sm:$0xff]   ;;  %v7414_v60 = vld [vmem:[%s8959_s26 + $0x38] sm:$0xff]  }
  0x26   : > { %6589 = vmatpush3.bf16.msra.mxu1 %v7402_v48 }
  0x27   : > { %6590 = vmatprep.subr.bf16.mxu1 %v7403_v49 }
  0x2a   : > { %6591 = vmatpush3.bf16.msra.mxu1 %v7404_v50 }
  0x2b   : > { %6592 = vmatprep.subr.bf16.mxu1 %v7405_v51 }
  0x2e   : > { %6593 = vmatpush3.bf16.msra.mxu1 %v7406_v52 }
  0x2f   : > { %6594 = vmatprep.subr.bf16.mxu1 %v7407_v53 }
  0x32   : > { %6595 = vmatpush3.bf16.msra.mxu1 %v7408_v54 }
  0x33   : > { %6596 = vmatprep.subr.bf16.mxu1 %v7409_v55 }
  0x36   : > { %6597 = vmatpush3.bf16.msra.mxu1 %v7410_v56 }
  0x37   : > { %6598 = vmatprep.subr.bf16.mxu1 %v7411_v57 }
  0x3a   : > { %6599 = vmatpush3.bf16.msra.mxu1 %v7412_v58 }
  0x3b   : > { %6600 = vmatprep.subr.bf16.mxu1 %v7413_v59  ;;  %v7417_v59 = vld [vmem:[%s8962_s7 + $0x4] ss:$8 sps:$4 sm:$0xff]  }
  0x3c   : > { %1218 = vmatprep.subr.bf16.mxu0 %v7417_v59 }
  0x3e   : > { %6601 = vmatpush3.bf16.msra.mxu1 %v7414_v60  ;;  %v7415_v60 = vld [vmem:[%s8962_s7] ss:$8 sps:$4 sm:$0xff]  }
  0xa9   : > { %v772_v4 = vpop.xlane.xlu0 %771 }
  0xaa   : > { %v778_v5 = vmul.f32 0.015625, %v772_v4 }
  0xac   : > { %v780_v6 = vsub.f32 %v7747_v0, %v778_v5 }
  0xad   : > { %v776_v7 = vpop.xlane.xlu0 %775 }
  0xae   : > { %v779_v8 = vmul.f32 0.015625, %v776_v7  ;;  %v782_v9 = vmul.f32 %v780_v6, %v780_v6 }
  0xb0   : > { %v781_v10 = vsub.f32 %v7749_v1, %v779_v8  ;;  %v784_v11 = vsel %vm769_vm0, %v782_v9, 0.0 }
  0xb1   : > { %785 = vadd.xlane.f32.xlu1 %v784_v11 }
  0xb2   : > { %v783_v12 = vmul.f32 %v781_v10, %v781_v10 }
  0xb4   : > { %v787_v13 = vsel %vm773_vm1, %v783_v12, 0.0 }
  0xb5   : > { %788 = vadd.xlane.f32.xlu1 %v787_v13 }
 0x13e   : > { %v786_v23 = vpop.xlane.xlu1 %785 }
 0x13f   : > { %v790_v24 = vmul.f32 0.015625, %v786_v23 }
 0x141   : > { %v792_v25 = vadd.f32 1e-05, %v790_v24 }
 0x142   : > { %v789_v26 = vpop.xlane.xlu1 %788 }
 0x143   : > { %7479 = vrsqrt.f32 %v792_v25  ;;  %v791_v28 = vmul.f32 0.015625, %v789_v26 }
 0x145   : > { %v793_v29 = vadd.f32 1e-05, %v791_v28 }
 0x147   : > { %7481 = vrsqrt.f32 %v793_v29 }
 0x14d   : > { %v7480_v33 = vpop.eup %7479 }
 0x14e   : > { %v796_v34 = vmul.f32 %v7480_v33, %v780_v6 }
 0x150   : > { %v802_v39 = vmul.f32 %v801_v35, %v796_v34 }
 0x151   : > { %v7482_v37 = vpop.eup %7481 }
 0x152   : > { %v797_v38 = vmul.f32 %v7482_v37, %v781_v10  ;;  %v808_v42 = vadd.f32 %v807_v40, %v802_v39  ;;  %v6359_v37 = vld [vmem:[%s8961_s5] ss:$0 sm:$0xff]  ;;  %s7597_s5 = smov 96  }
 0x154   : > { %v803_v41 = vmul.f32 %v801_v35, %v797_v38 }
 0x156   : > { %v809_v43 = vadd.f32 %v807_v40, %v803_v41 }
 0x158   : > { %v818_v44 = vpack.c.bf16 %v809_v43, %v808_v42 }
 0x15a   : > { %6354 = vmatmul.mubr.msk.bf16.vlgmr.msra.gmra.mrb[0].mxu0 %vm769_vm0, %v818_v44 }
 0x15b   : > { %1250 = vmatprep.mubr.bf16.mxu0 %v7588_v22  ;;  %1219 = vmatpush1.bf16.msra.mxu0 %v7415_v60  ;;  %v1265_v60 = vld [vmem:[%s8924_s10 + $0x20] sm:$0xff] }
 0x15c   : > { %1220 = vmatprep.subr.bf16.mxu0 %v7420_v61  ;;  %v1266_v61 = vld [vmem:[%s8924_s10 + $0x28] sm:$0x1] }
 0x22d   : > { %v908_v2 = vpop.f32.mrb[0].mxu0 }
 0x22e   : > { %v909_v3 = vadd.f32 %v908_v2, %v824_v62  ;;  %v910_v4 = vpop.f32.mrb[1].mxu0  ;;  %v7421_v2 = vld [vmem:[%s8962_s7 + $0x20] ss:$8 sps:$4 sm:$0xff]  }
 0x22f   : > { %v911_v5 = vadd.f32 %v910_v4, %v828_v63  ;;  %v912_v6 = vpop.f32.mrb[2].mxu0  ;;  %v7426_v4 = vld [vmem:[%s8962_s7 + $0x34] ss:$8 sps:$4 sm:$0xff]  }
 0x230   : > { %v6355_v7 = vmul.f32 -1.442695, %v909_v3  ;;  %v913_v8 = vadd.f32 %v912_v6, %v824_v62  ;;  %v914_v9 = vpop.f32.mrb[3].mxu0  ;;  %v7418_v62 = vld [vmem:[%s8962_s7 + $0x10] ss:$8 sps:$4 sm:$0xff]  }
 0x231   : > { %v6356_v10 = vmul.f32 -1.442695, %v911_v5  ;;  %v915_v11 = vadd.f32 %v914_v9, %v828_v63  ;;  %1221 = vmatpush1.bf16.msra.mxu0 %v7418_v62  ;;  %v7423_v63 = vld [vmem:[%s8962_s7 + $0x24] ss:$8 sps:$4 sm:$0xff]  }
 0x232   : > { %7483 = vpow2.f32 %v6355_v7  ;;  %v6357_v12 = vmul.f32 -1.442695, %v913_v8  ;;  %1222 = vmatprep.subr.bf16.mxu0 %v7423_v63  ;;  %v8004_v63 = vpack.c.bf16 %v1266_v61, %v1265_v60 }
 0x233   : > { %7485 = vpow2.f32 %v6356_v10  ;;  %v6358_v13 = vmul.f32 -1.442695, %v915_v11 }
 0x234   : > { %7487 = vpow2.f32 %v6357_v12  ;;  %v1127_v12 = vld [vmem:[%s8963_s9] sm:$0x3]  ;;  %s7596_s9 = smov 48  }
 0x235   : > { %7489 = vpow2.f32 %v6358_v13  ;;  %1223 = vmatpush1.bf16.msra.mxu0 %v7421_v2  ;;  %v1157_v13 = vrot.slane %v1127_v12, %v7787_v31 }
 0x236   : > { %1224 = vmatprep.subr.bf16.mxu0 %v7426_v4  ;;  %v1275_v4 = vld [vmem:[%s8924_s10 + $0x70] sm:$0xff] }
 0x23c   : > { %v7484_v14 = vpop.eup %7483 }
 0x23d   : > { %v7486_v15 = vpop.eup %7485  ;;  %v929_v16 = vadd.f32 1.0, %v7484_v14 }
 0x23e   : > { %v7488_v17 = vpop.eup %7487  ;;  %v930_v18 = vadd.f32 1.0, %v7486_v15 }
 0x23f   : > { %v7490_v19 = vpop.eup %7489  ;;  %7491 = vrcp.f32 %v929_v16  ;;  %v931_v20 = vadd.f32 1.0, %v7488_v17 }
 0x240   : > { %7493 = vrcp.f32 %v930_v18  ;;  %v932_v21 = vadd.f32 1.0, %v7490_v19  ;;  %v1163_v19 = vrot.slane %v1127_v12, %v7794_v36  ;;  %v1270_v12 = vld [vmem:[%s8924_s10 + $0x48] sm:$0x1] }
 0x241   : > { %7495 = vrcp.f32 %v931_v20 }
 0x242   : > { %7497 = vrcp.f32 %v932_v21  ;;  %v1261_v21 = vld [vmem:[%s8924_s10] sm:$0xff] }
 0x249   : > { %v7492_v23 = vpop.eup %7491 }
 0x24a   : > { %v7494_v24 = vpop.eup %7493  ;;  %v941_v27 = vmul.f32 %v7492_v23, %v909_v3  ;;  %v7424_v3 = vld [vmem:[%s8962_s7 + $0x30] ss:$8 sps:$4 sm:$0xff]   ;;  %v1262_v23 = vld [vmem:[%s8924_s10 + $0x8] sm:$0x1] }
 0x24b   : > { %v7496_v25 = vpop.eup %7495  ;;  %v942_v29 = vmul.f32 %v7494_v24, %v911_v5  ;;  %1225 = vmatpush1.bf16.msra.mxu0 %v7424_v3  ;;  %v7589_v5 = vmov 0.0|0.0  }
 0x24c   : > { %v7498_v26 = vpop.eup %7497  ;;  %v943_v28 = vmul.f32 %v7496_v25, %v913_v8  ;;  %7124 = vmatprep.subr.bf16.mxu0 %v7589_v5  ;;  %7136 = vmatprep.subr.bf16.mxu1 %v7589_v5 }
 0x24d   : > { %v944_v32 = vmul.f32 %v7498_v26, %v915_v11  ;;  %v7906_v26 = vpack.c.bf16 %v1262_v23, %v1261_v21 }
 0x24e   : > { %v977_v33 = vpack.c.bf16 %v943_v28, %v941_v27 }
 0x24f   : > { %v978_v34 = vpack.c.bf16 %v944_v32, %v942_v29  ;;  %v1267_v29 = vld [vmem:[%s8924_s10 + $0x30] sm:$0xff]  ;;  %v1268_v32 = vld [vmem:[%s8924_s10 + $0x38] sm:$0x1] }
 0x251   : > { %1114 = vmatprep.mubr.bf16.mxu1 %v978_v34  ;;  %v7591_v34 = vmov 0.0  }
 0x252   : > { %1115 = vmatmul.mubr.bf16.vlgmr.msra.gmra.mrb[0].mxu1 %v977_v33  ;;  %v7925_v33 = vpack.c.bf16 %v1268_v32, %v1267_v29  ;;  %5274 = vst [vmem:[#allocation2] sm:$0xff] %v7591_v34  ;;  %5275 = vst [vmem:[#allocation2 + $0x8] sm:$0xff] %v7591_v34 }
 0x253   : > { %5276 = vst [vmem:[#allocation2 + $0x10] sm:$0xff] %v7591_v34  ;;  %5278 = vst [vmem:[#allocation2 + $0x20] sm:$0x7f] %v7591_v34  ;;  %6809 = vmatprep.mubr.msk.f32.mxu1 %vm7590_vm4, %v7591_v34 }
 0x254   : > { %7139 = vmatpush3.bf16.xpose.msk.msra.mxu1 %vm7910_vm3, %v7925_v33 }
 0x255   : > { %7144 = vmatprep.subr.bf16.mxu1 %v7589_v5 }
 0x325   : > { %v6602_v35 = vpop.f32.mrb[0].mxu1 }
 0x326   : > { %v6603_v38 = vpop.f32.mrb[1].mxu1 }
 0x327   : > { %v6604_v39 = vadd.f32 %v6603_v38, %v6602_v35  ;;  %v6605_v40 = vpop.f32.mrb[2].mxu1  ;;  %v7592_v35 = vmov 1966171168  }
 0x328   : > { %v6606_v41 = vpop.f32.mrb[3].mxu1 }
 0x329   : > { %v1117_v42 = vadd.f32 %v6604_v39, %v6359_v37  ;;  %v6607_v43 = vadd.f32 %v6606_v41, %v6605_v40  ;;  %v1263_v40 = vld [vmem:[%s8924_s10 + $0x10] sm:$0xff]  ;;  %v1264_v41 = vld [vmem:[%s8924_s10 + $0x18] sm:$0x1] }
 0x32b   : > { %v1123_v44 = vmul.f32 0.5, %v1117_v42  ;;  %v1120_v45 = vadd.f32 %v6607_v43, %v6359_v37  ;;  %v1283_v37 = vunpack.c.l.s4 %v7592_v35 }
 0x32d   : > { %v1124_v46 = vmul.f32 0.5, %v1120_v45  ;;  %v7856_v47 = vadd.f32 %v1123_v44, %v7747_v0  ;;  %v1284_v38 = vunpack.c.0.s8 %v1283_v37 }
 0x32f   : > { %v1128_v48 = vsel %vm769_vm0, %v7856_v47, 0.0  ;;  %v7861_v49 = vadd.f32 %v1124_v46, %v7749_v1  ;;  %v7940_v39 = vsub.s32 %v1284_v38, %v7784_v30  ;;  %v7954_v46 = vpack.c.bf16 %v1264_v41, %v1263_v40 }
 0x330   : > { %1129 = vadd.xlane.f32.xlu0 %v1128_v48 }
 0x331   : > { %v1131_v50 = vsel %vm773_vm1, %v7861_v49, 0.0 }
 0x332   : > { %1132 = vadd.xlane.f32.xlu1 %v1131_v50 }
 0x3bd   : > { %v1130_v51 = vpop.xlane.xlu0 %1129 }
 0x3be   : > { %v1134_v52 = vmul.f32 0.015625, %v1130_v51 }
 0x3bf   : > { %v1133_v53 = vpop.xlane.xlu1 %1132 }
 0x3c0   : > { %v1136_v54 = vsub.f32 %v7856_v47, %v1134_v52  ;;  %v1135_v55 = vmul.f32 0.015625, %v1133_v53  ;;  %v1271_v53 = vld [vmem:[%s8924_s10 + $0x50] sm:$0xff] }
 0x3c2   : > { %v1137_v0 = vsub.f32 %v7861_v49, %v1135_v55  ;;  %v1138_v56 = vmul.f32 %v1136_v54, %v1136_v54 }
 0x3c4   : > { %v1140_v57 = vsel %vm769_vm0, %v1138_v56, 0.0  ;;  %v1139_v58 = vmul.f32 %v1137_v0, %v1137_v0 }
 0x3c5   : > { %1141 = vadd.xlane.f32.xlu0 %v1140_v57 }
 0x3c6   : > { %v1143_v1 = vsel %vm773_vm1, %v1139_v58, 0.0 }
 0x3c7   : > { %1144 = vadd.xlane.f32.xlu1 %v1143_v1 }
 0x452   : > { %v1142_v6 = vpop.xlane.xlu0 %1141 }
 0x453   : > { %v1146_v7 = vmul.f32 0.015625, %v1142_v6  ;;  %v1276_v6 = vld [vmem:[%s8924_s10 + $0x78] sm:$0x1] }
 0x454   : > { %v1145_v8 = vpop.xlane.xlu1 %1144 }
 0x455   : > { %v1148_v9 = vadd.f32 1e-05, %v1146_v7  ;;  %v1147_v10 = vmul.f32 0.015625, %v1145_v8  ;;  %v8025_v8 = vpack.c.bf16 %v1276_v6, %v1275_v4 }
 0x457   : > { %7499 = vrsqrt.f32 %v1148_v9  ;;  %v1149_v11 = vadd.f32 1e-05, %v1147_v10 }
 0x459   : > { %7501 = vrsqrt.f32 %v1149_v11  ;;  %v1269_v11 = vld [vmem:[%s8924_s10 + $0x40] sm:$0xff] }
 0x461   : > { %v7500_v14 = vpop.eup %7499 }
 0x462   : > { %v1152_v15 = vmul.f32 %v7500_v14, %v1136_v54  ;;  %v1272_v54 = vld [vmem:[%s8924_s10 + $0x58] sm:$0x1]  ;;  %v8050_v14 = vpack.c.bf16 %v1270_v12, %v1269_v11 }
 0x463   : > { %v7502_v16 = vpop.eup %7501  ;;  %v7981_v58 = vpack.c.bf16 %v1272_v54, %v1271_v53 }
 0x464   : > { %v1158_v17 = vmul.f32 %v1157_v13, %v1152_v15  ;;  %v1153_v18 = vmul.f32 %v7502_v16, %v1137_v0 }
 0x466   : > { %v1159_v20 = vmul.f32 %v1157_v13, %v1153_v18  ;;  %v1164_v24 = vadd.f32 %v1163_v19, %v1158_v17  ;;  %v1273_v18 = vld [vmem:[%s8924_s10 + $0x60] sm:$0xff] }
 0x468   : > { %v1165_v25 = vadd.f32 %v1163_v19, %v1159_v20  ;;  %v1274_v19 = vld [vmem:[%s8924_s10 + $0x68] sm:$0x1] }
 0x469   : > { %v8084_v21 = vpack.c.bf16 %v1274_v19, %v1273_v18 }
 0x46a   : > { %v1174_v27 = vpack.c.bf16 %v1165_v25, %v1164_v24  ;;  %v1277_v25 = vld [vmem:[%s8924_s10 + $0x80] sm:$0xff] }
 0x46c   : > { %6384 = vmatmul.mubr.msk.bf16.vlgmr.msra.gmra.mrb[4].mxu0 %vm769_vm0, %v1174_v27  ;;  %v1278_v27 = vld [vmem:[%s8924_s10 + $0x88] sm:$0x1] }
 0x46d   : > { %7127 = vmatpush3.bf16.xpose.msk.msra.mxu0 %vm7910_vm3, %v7906_v26  ;;  %6788 = vmatprep.mubr.msk.f32.mxu0 %vm7590_vm4, %v7591_v34  ;;  %v8107_v29 = vpack.c.bf16 %v1278_v27, %v1277_v25 }
 0x46e   : > { %7128 = vmatprep.subr.bf16.mxu0 %v7589_v5 }
 0x53f   : > { %v7948_v42 = vpop.f32.mrb[4].mxu0 }
 0x540   : > { %v1254_v43 = vpop.f32.mrb[5].mxu0  ;;  %v1288_v44 = vrot.slane %v7948_v42, %v7940_v39  ;;  %v1281_v55 = vcombine.high %v7948_v42, %v7948_v42 }
 0x541   : > { %v7952_v45 = vpop.f32.mrb[6].mxu0 }
 0x542   : > { %v1258_v48 = vpop.f32.mrb[7].mxu0  ;;  %v1296_v50 = vcombine.high %v1288_v44, %v1288_v44  ;;  %v1304_v51 = vrot.slane %v1288_v44, %v7940_v39  ;;  %v7959_v52 = vpack.i.bf16 %v7952_v45, %v7948_v42  ;;  %v1295_v62 = vrot.slane %v1281_v55, %v7940_v39 }
 0x543   : > { %v7969_v0 = vpack.c.bf16 %v1258_v48, %v1254_v43  ;;  %v7971_v56 = vpack.i.bf16 %v1258_v48, %v1254_v43  ;;  %v1336_v20 = vrot.slane %v7952_v45, %v7940_v39 }
 0x544   : > { %6789 = vmatmul.mubr.msk.f32.vlgmr.msra.gmra.mrb[8].mxu0 %vm1344_vm2, %v1304_v51  ;;  %7338 = vrot.lane.b32.xlu0 %v7959_v52, %s7593_s4  ;;  %v7976_v57 = vrot.slane %v1296_v50, %v7940_v39  ;;  %v7988_v59 = vrot.slane %v1304_v51, %v7787_v31  ;;  %v1297_v3 = vcombine.high %v1295_v62, %v1295_v62  ;;  %s8968_s4 = sld [smem:[#allocation11_spill]] }
 0x545   : > { %7131 = vmatpush3.bf16.xpose.msk.msra.mxu0 %vm7910_vm3, %v7954_v46  ;;  %6795 = vmatprep.mubr.msk.f32.mxu0 %vm7590_vm4, %v7591_v34  ;;  %v1326_v7 = vcombine.high %v1304_v51, %v1304_v51  ;;  %v1311_v13 = vrot.slane %v1295_v62, %v7940_v39  ;;  %v1343_v23 = vrot.slane %v1336_v20, %v7940_v39 }
 0x546   : > { %v1328_v1 = vcombine.high %v7976_v57, %v7976_v57  ;;  %7132 = vmatprep.subr.bf16.mxu0 %v7589_v5  ;;  %v8030_v9 = vrot.slane %v1297_v3, %v7940_v39 }
 0x547   : > { %v8033_v10 = vrot.slane %v1326_v7, %v7787_v31  ;;  %v8055_v15 = vrot.slane %v1311_v13, %v7787_v31  ;;  %v8096_v24 = vrot.slane %v1343_v23, %v7787_v31  ;;  %v8109_v32 = vcombine.high %v1311_v13, %v1311_v13 }
 0x548   : > { %6810 = vmatmul.mubr.msk.f32.vlgmr.msra.gmra.mrb[4].mxu1 %vm1344_vm2, %v1328_v1  ;;  %2281 = vrot.lane.b32.xlu0 %v7988_v59, %s7594_s0  ;;  %v8009_v2 = vrot.slane %v1328_v1, %v7787_v31  ;;  %v1329_v16 = vcombine.high %v8030_v9, %v8030_v9 }
 0x549   : > { %7147 = vmatpush3.bf16.xpose.msk.msra.mxu1 %vm7910_vm3, %v7981_v58  ;;  %6823 = vmatprep.mubr.msk.f32.mxu1 %vm7590_vm4, %v7591_v34 }
 0x54a   : > { %7152 = vmatprep.subr.bf16.mxu1 %v7589_v5  ;;  %v8068_v17 = vrot.slane %v1329_v16, %v7787_v31 }
 0x54c   : > { %6796 = vmatmul.mubr.msk.f32.vlgmr.msra.gmra.mrb[10].mxu0 %vm1344_vm2, %v7976_v57  ;;  %2515 = vrot.lane.b32.xlu0 %v8009_v2, %s7594_s0 }
 0x54d   : > { %7135 = vmatpush3.bf16.xpose.msk.msra.mxu0 %vm7910_vm3, %v8004_v63  ;;  %6802 = vmatprep.mubr.msk.f32.mxu0 %vm7590_vm4, %v7591_v34 }
 0x54e   : > { %7140 = vmatprep.subr.bf16.mxu0 %v7589_v5 }
 0x550   : > { %6824 = vmatmul.mubr.msk.f32.vlgmr.msra.gmra.mrb[6].mxu1 %vm1344_vm2, %v8030_v9  ;;  %2437 = vrot.lane.b32.xlu0 %v8033_v10, %s7594_s0 }
 0x551   : > { %7155 = vmatpush3.bf16.xpose.msk.msra.mxu1 %vm7910_vm3, %v8025_v8  ;;  %6837 = vmatprep.mubr.msk.f32.mxu1 %vm7590_vm4, %v7591_v34 }
 0x554   : > { %6803 = vmatmul.mubr.msk.f32.vlgmr.msra.gmra.mrb[12].mxu0 %vm1344_vm2, %v1326_v7  ;;  %2593 = vrot.lane.b32.xlu0 %v8055_v15, %s7594_s0 }
 0x555   : > { %7143 = vmatpush3.bf16.xpose.msk.msra.mxu0 %vm7910_vm3, %v8050_v14  ;;  %6816 = vmatprep.mubr.msk.f32.mxu0 %vm7590_vm4, %v7591_v34 }
 0x556   : > { %7148 = vmatprep.subr.bf16.mxu0 %v7589_v5 }
 0x558   : > { %6838 = vmatmul.mubr.msk.f32.vlgmr.msra.gmra.mrb[8].mxu1 %vm1344_vm2, %v1329_v16  ;;  %2827 = vrot.lane.b32.xlu0 %v8068_v17, %s7594_s0 }
 0x559   : > { %6851 = vmatprep.mubr.msk.f32.mxu1 %vm1344_vm2, %v7948_v42 }
 0x55c   : > { %6817 = vmatmul.mubr.msk.f32.vlgmr.msra.gmra.mrb[14].mxu0 %vm1344_vm2, %v1311_v13  ;;  %2979 = vrot.lane.b32.xlu0 %v7948_v42, %s7594_s0 }
 0x55d   : > { %7151 = vmatpush3.bf16.xpose.msk.msra.mxu0 %vm7910_vm3, %v8084_v21  ;;  %6830 = vmatprep.mubr.msk.f32.mxu0 %vm7590_vm4, %v7591_v34 }
 0x55e   : > { %7156 = vmatprep.subr.bf16.mxu0 %v7589_v5 }
 0x560   : > { %2905 = vrot.lane.b32.xlu0 %v8096_v24, %s7594_s0 }
 0x564   : > { %6831 = vmatmul.mubr.msk.f32.vlgmr.msra.gmra.mrb[16].mxu0 %vm1344_vm2, %v8109_v32 }
 0x565   : > { %7159 = vmatpush3.bf16.xpose.msk.msra.mxu0 %vm7910_vm3, %v8107_v29  ;;  %6844 = vmatprep.mubr.msk.f32.mxu0 %vm7590_vm4, %v7591_v34 }
 0x566   : > { %7168 = vmatprep.subr.msk.bf16.mxu0 %vm8112_vm7, %v7969_v0 }
 0x56c   : > { %6845 = vmatmul.mubr.msk.f32.vlgmr.msra.gmra.mrb[18].mxu0 %vm1344_vm2, %v1343_v23 }
 0x56d   : > { %7171 = vmatpush3.bf16.msk.msra.mxu0 %vm8112_vm7, %v7969_v0 }
 0x56e   : > { %7176 = vmatprep.subr.bf16.mxu0 %v7589_v5 }
 0x5b6   : > { %v7339_v37 = vpop.permute.xlu0 %7338 }
 0x5b7   : > { %v7341_v38 = vunpack.i.h.bf16 %v7339_v37  ;;  %v7340_v39 = vunpack.i.l.bf16 %v7339_v37 }
 0x5b9   : > { %v7160_v40 = vpack.c.bf16 %v7341_v38, %v7340_v39 }
 0x5ba   : > { %v2282_v41 = vpop.permute.xlu0 %2281 }
 0x5bb   : > { %7162 = vmatprep.subr.msk.bf16.mxu1 %vm7910_vm3, %v7160_v40 }
 0x5bc   : > { %7165 = vmatpush3.bf16.xpose.msk.msra.mxu1 %vm7910_vm3, %v7160_v40 }
 0x5bd   : > { %7172 = vmatprep.subr.bf16.mxu1 %v7589_v5 }
 0x5be   : > { %v8145_v43 = vpop.permute.xlu0 %2515 }
 0x5c2   : > { %v2438_v44 = vpop.permute.xlu0 %2437 }
 0x5c3   : > { %6852 = vmatmul.mubr.msk.f32.vlgmr.msra.gmra.mrb[10].mxu1 %vm1344_vm2, %v7952_v45 }
 0x5c4   : > { %7175 = vmatpush3.bf16.xpose.msk.msra.mxu1 %vm7910_vm3, %v7906_v26  ;;  %6865 = vmatprep.mubr.msk.f32.mxu1 %vm7590_vm4, %v7591_v34 }
 0x5c5   : > { %7180 = vmatprep.subr.bf16.mxu1 %v7589_v5 }
 0x5c6   : > { %v2594_v48 = vpop.permute.xlu0 %2593 }
 0x5cb   : > { %6866 = vmatmul.mubr.msk.f32.vlgmr.msra.gmra.mrb[12].mxu1 %vm1344_vm2, %v2282_v41 }
 0x5cc   : > { %7183 = vmatpush3.bf16.xpose.msk.msra.mxu1 %vm7910_vm3, %v8004_v63  ;;  %6879 = vmatprep.mubr.msk.f32.mxu1 %vm7590_vm4, %v7591_v34 }
 0x5cd   : > { %7188 = vmatprep.subr.bf16.mxu1 %v7589_v5 }
 0x5d3   : > { %6880 = vmatmul.mubr.msk.f32.vlgmr.msra.gmra.mrb[14].mxu1 %vm1344_vm2, %v2438_v44 }
 0x5d4   : > { %7191 = vmatpush3.bf16.xpose.msk.msra.mxu1 %vm7910_vm3, %v8050_v14  ;;  %6893 = vmatprep.mubr.msk.f32.mxu1 %vm7590_vm4, %v7591_v34 }
 0x5d5   : > { %7196 = vmatprep.subr.bf16.mxu1 %v7589_v5 }
 0x5db   : > { %6894 = vmatmul.mubr.msk.f32.vlgmr.msra.gmra.mrb[16].mxu1 %vm1344_vm2, %v2594_v48 }
 0x5dc   : > { %7199 = vmatpush3.bf16.xpose.msk.msra.mxu1 %vm7910_vm3, %v8084_v21  ;;  %6907 = vmatprep.mubr.msk.f32.mxu1 %vm7590_vm4, %v7591_v34 }
 0x5dd   : > { %7204 = vmatprep.subr.bf16.mxu1 %v7589_v5 }
 0x617   : > { %v1419_v50 = vpop.f32.mrb[8].mxu0 }
 0x618   : > { %v6790_v51 = vpop.f32.mrb[9].mxu0 }
 0x61b   : > { %v1653_v53 = vpop.f32.mrb[4].mxu1 }
 0x61c   : > { %v6811_v54 = vpop.f32.mrb[5].mxu1  ;;  %v2066_v7 = vrot.slane %v1653_v53, 5 }
 0x61f   : > { %v1497_v55 = vpop.f32.mrb[10].mxu0 }
 0x620   : > { %v2060_v0 = vrot.slane %v1497_v55, 7  ;;  %v6797_v1 = vpop.f32.mrb[11].mxu0 }
 0x622   : > { %v2062_v60 = vsel %vm2061_vm8, %v2060_v0, %v1419_v50 }
 0x623   : > { %v1809_v61 = vpop.f32.mrb[6].mxu1 }
 0x624   : > { %v6825_v62 = vpop.f32.mrb[7].mxu1  ;;  %v2072_v23 = vrot.slane %v1809_v61, 3 }
 0x627   : > { %v1575_v3 = vpop.f32.mrb[12].mxu0 }
 0x628   : > { %v2063_v4 = vrot.slane %v1575_v3, 6  ;;  %v6804_v6 = vpop.f32.mrb[13].mxu0 }
 0x62a   : > { %v2065_v11 = vsel %vm2064_vm9, %v2063_v4, %v2062_v60 }
 0x62b   : > { %v1965_v12 = vpop.f32.mrb[8].mxu1  ;;  %v2068_v13 = vsel %vm2067_vm10, %v2066_v7, %v2065_v11 }
 0x62c   : > { %v6839_v16 = vpop.f32.mrb[9].mxu1  ;;  %v2078_v40 = vrot.slane %v1965_v12, 1 }
 0x62f   : > { %v1731_v18 = vpop.f32.mrb[14].mxu0 }
 0x630   : > { %v2069_v19 = vrot.slane %v1731_v18, 4  ;;  %v6818_v20 = vpop.f32.mrb[15].mxu0 }
 0x632   : > { %v2071_v25 = vsel %vm2070_vm11, %v2069_v19, %v2068_v13 }
 0x633   : > { %v2074_v27 = vsel %vm2073_vm12, %v2072_v23, %v2071_v25 }
 0x637   : > { %v1887_v37 = vpop.f32.mrb[16].mxu0 }
 0x638   : > { %v2075_v38 = vrot.slane %v1887_v37, 2  ;;  %v6832_v39 = vpop.f32.mrb[17].mxu0 }
 0x639   : > { %v8192_v39 = vrot.slane %v8030_v9, %v7787_v31 }
 0x63a   : > { %v2077_v41 = vsel %vm2076_vm13, %v2075_v38, %v2074_v27  ;;  %v8186_v38 = vrot.slane %v7976_v57, %v7787_v31 }
 0x63b   : > { %v2080_v44 = vsel %vm2079_vm14, %v2078_v40, %v2077_v41  ;;  %v8200_v40 = vrot.slane %v8109_v32, %v7787_v31 }
 0x63f   : > { %v2043_v48 = vpop.f32.mrb[18].mxu0 }
 0x640   : > { %v6846_v50 = vpop.f32.mrb[19].mxu0 }
 0x696   : > { %v6853_v51 = vpop.f32.mrb[10].mxu1 }
 0x697   : > { %v2163_v53 = vadd.f32 %v6853_v51, %v2043_v48  ;;  %v2157_v54 = vpop.f32.mrb[11].mxu1  ;;  %v2828_v51 = vpop.permute.xlu0 %2827 }
 0x698   : > { %v2158_v55 = vadd.f32 %v2157_v54, %v2080_v44 }
 0x699   : > { %v2167_v1 = vmul.f32 0.25, %v2163_v53 }
 0x69a   : > { %v2166_v0 = vmul.f32 0.25, %v2158_v55 }
 0x69b   : > { %v2173_v3 = vsel %vm2172_vm6, %v2167_v1, -inf }
 0x69c   : > { %v2169_v60 = vsel %vm2168_vm15, %v2166_v0, -inf }
 0x69d   : > { %2170 = vmax.xlane.f32.xlu1 %v2169_v60 }
 0x69e   : > { %v8175_v61 = vpop.f32.mrb[12].mxu1 }
 0x69f   : > { %v6867_v62 = vpop.f32.mrb[13].mxu1 }
 0x6a1   : > { %2174 = vmax.xlane.f32.xlu1 %v2173_v3 }
 0x6a6   : > { %v8178_v4 = vpop.f32.mrb[14].mxu1 }
 0x6a7   : > { %v6881_v6 = vpop.f32.mrb[15].mxu1 }
 0x6ae   : > { %v8180_v7 = vpop.f32.mrb[16].mxu1 }
 0x6af   : > { %v6895_v11 = vpop.f32.mrb[17].mxu1 }
 0x72a   : > { %v2171_v12 = vpop.xlane.xlu1 %2170 }
 0x72b   : > { %v2176_v13 = vsub.f32 %v2166_v0, %v2171_v12  ;;  %v2980_v0 = vpop.permute.xlu0 %2979 }
 0x72d   : > { %v2178_v19 = vmul.f32 1.442695, %v2176_v13 }
 0x72e   : > { %v2175_v16 = vpop.xlane.xlu1 %2174 }
 0x72f   : > { %v2177_v18 = vsub.f32 %v2167_v1, %v2175_v16  ;;  %v2906_v1 = vpop.permute.xlu0 %2905 }
 0x731   : > { %v2180_v20 = vmul.f32 1.442695, %v2177_v18 }
 0x733   : > { %7503 = vpow2.f32 %v2180_v20  ;;  %v2998_v20 = vrot.slane %v8178_v4, 6 }
 0x734   : > { %7505 = vpow2.f32 %v2178_v19 }
 0x73d   : > { %v7504_v23 = vpop.eup %7503 }
 0x73e   : > { %v2185_v25 = vsel %vm2172_vm6, %v7504_v23, 0.0  ;;  %v7506_v27 = vpop.eup %7505 }
 0x73f   : > { %2186 = vadd.xlane.f32.xlu1 %v2185_v25  ;;  %v2182_v37 = vsel %vm2168_vm15, %v7506_v27, 0.0 }
 0x743   : > { %2183 = vadd.xlane.f32.xlu1 %v2182_v37 }
 0x754   : > { %2359 = vrot.lane.b32.xlu1 %v8186_v38, %s7594_s0 }
 0x758   : > { %2671 = vrot.lane.b32.xlu1 %v8192_v39, %s7594_s0 }
 0x75c   : > { %7343 = vrot.lane.b32.xlu1 %v7959_v52, %s7596_s9 }
 0x760   : > { %2749 = vrot.lane.b32.xlu1 %v8200_v40, %s7594_s0 }
 0x764   : > { %2981 = vrot.lane.b32.xlu1 %v7952_v45, %s7594_s0 }
 0x7cc   : > { %v2187_v57 = vpop.xlane.xlu1 %2186 }
 0x7cd   : > { %7507 = vrcp.f32 %v2187_v57 }
 0x7d0   : > { %v2184_v9 = vpop.xlane.xlu1 %2183 }
 0x7d1   : > { %7509 = vrcp.f32 %v2184_v9 }
 0x7d4   : > { %v2360_v41 = vpop.permute.xlu1 %2359 }
 0x7d7   : > { %v7508_v48 = vpop.eup %7507 }
 0x7d8   : > { %v2672_v44 = vpop.permute.xlu1 %2671  ;;  %v2191_v55 = vmul.f32 %v7508_v48, %v7504_v23 }
 0x7db   : > { %v7510_v50 = vpop.eup %7509 }
 0x7dc   : > { %v7344_v53 = vpop.permute.xlu1 %7343  ;;  %v2190_v54 = vmul.f32 %v7510_v50, %v7506_v27 }
 0x7dd   : > { %v7346_v60 = vunpack.i.h.bf16 %v7344_v53  ;;  %v7345_v62 = vunpack.i.l.bf16 %v7344_v53 }
 0x7de   : > { %6858 = vmatprep.mubr.msk.f32.mxu0 %vm2168_vm15, %v2190_v54 }
 0x7df   : > { %6859 = vmatmul.mubr.msk.f32.vlgmr.msra.gmra.mrb[20].mxu0 %vm2168_vm15, %v2191_v55  ;;  %v7208_v3 = vpack.c.bf16 %v7346_v60, %v7345_v62 }
 0x7e0   : > { %7179 = vmatpush3.bf16.xpose.msk.msra.mxu0 %vm7910_vm3, %v7954_v46  ;;  %v2750_v32 = vpop.permute.xlu1 %2749  ;;  %6872 = vmatprep.mubr.msk.f32.mxu0 %vm7590_vm4, %v7591_v34 }
 0x7e1   : > { %6908 = vmatmul.mubr.msk.f32.vlgmr.msra.gmra.mrb[18].mxu1 %vm1344_vm2, %v2750_v32  ;;  %7184 = vmatprep.subr.bf16.mxu0 %v7589_v5 }
 0x7e2   : > { %7207 = vmatpush3.bf16.xpose.msk.msra.mxu1 %vm7910_vm3, %v8107_v29  ;;  %6921 = vmatprep.mubr.msk.f32.mxu1 %vm7590_vm4, %v7591_v34 }
 0x7e7   : > { %6873 = vmatmul.mubr.msk.f32.vlgmr.msra.gmra.mrb[22].mxu0 %vm1344_vm2, %v2360_v41 }
 0x7e8   : > { %7187 = vmatpush3.bf16.xpose.msk.msra.mxu0 %vm7910_vm3, %v7925_v33  ;;  %6886 = vmatprep.mubr.msk.f32.mxu0 %vm7590_vm4, %v7591_v34 }
 0x7e9   : > { %6922 = vmatmul.mubr.msk.f32.vlgmr.msra.gmra.mrb[20].mxu1 %vm1344_vm2, %v2906_v1  ;;  %7192 = vmatprep.subr.bf16.mxu0 %v7589_v5 }
 0x7ef   : > { %6887 = vmatmul.mubr.msk.f32.vlgmr.msra.gmra.mrb[24].mxu0 %vm1344_vm2, %v8145_v43  ;;  %v2982_v43 = vpop.permute.xlu1 %2981 }
 0x7f0   : > { %7195 = vmatpush3.bf16.xpose.msk.msra.mxu0 %vm7910_vm3, %v7981_v58  ;;  %6900 = vmatprep.mubr.msk.f32.mxu0 %vm7590_vm4, %v7591_v34 }
 0x7f1   : > { %7200 = vmatprep.subr.bf16.mxu0 %v7589_v5 }
 0x7f7   : > { %6901 = vmatmul.mubr.msk.f32.vlgmr.msra.gmra.mrb[26].mxu0 %vm1344_vm2, %v2672_v44  ;;  %v3002_v44 = vrot.slane %v8180_v7, 4 }
 0x7f8   : > { %7203 = vmatpush3.bf16.xpose.msk.msra.mxu0 %vm7910_vm3, %v8025_v8  ;;  %6914 = vmatprep.mubr.msk.f32.mxu0 %vm7590_vm4, %v7591_v34 }
 0x7f9   : > { %7210 = vmatprep.subr.msk.bf16.mxu0 %vm7910_vm3, %v7208_v3 }
 0x7ff   : > { %6915 = vmatmul.mubr.msk.f32.vlgmr.msra.gmra.mrb[28].mxu0 %vm1344_vm2, %v2828_v51 }
 0x800   : > { %7213 = vmatpush3.bf16.xpose.msk.msra.mxu0 %vm7910_vm3, %v7208_v3  ;;  %6928 = vmatprep.mubr.msk.f32.mxu0 %vm1344_vm2, %v2980_v0 }
 0x801   : > { %7220 = vmatprep.subr.bf16.mxu0 %v7589_v5 }
 0x807   : > { %6929 = vmatmul.mubr.msk.f32.vlgmr.msra.gmra.mrb[30].mxu0 %vm1344_vm2, %v2982_v43 }
 0x808   : > { %7223 = vmatpush3.bf16.xpose.msk.msra.mxu0 %vm7910_vm3, %v7906_v26  ;;  %6942 = vmatprep.mubr.msk.f32.mxu0 %vm7590_vm4, %v7591_v34 }
 0x809   : > { %7228 = vmatprep.subr.bf16.mxu0 %v7589_v5 }
 0x8b2   : > { %v8256_v6 = vpop.f32.mrb[20].mxu0 }
 0x8b3   : > { %v8258_v11 = vpop.f32.mrb[21].mxu0 }
 0x8b4   : > { %v2819_v12 = vpop.f32.mrb[18].mxu1 }
 0x8b5   : > { %v6909_v13 = vpop.f32.mrb[19].mxu1  ;;  %v3006_v4 = vrot.slane %v2819_v12, 2 }
 0x8ba   : > { %v2429_v16 = vpop.f32.mrb[22].mxu0 }
 0x8bb   : > { %v2996_v18 = vrot.slane %v2429_v16, 7  ;;  %v6874_v19 = vpop.f32.mrb[23].mxu0 }
 0x8bc   : > { %v2975_v23 = vpop.f32.mrb[20].mxu1 }
 0x8bd   : > { %v2997_v25 = vsel %vm2061_vm8, %v2996_v18, %v8175_v61  ;;  %v6923_v27 = vpop.f32.mrb[21].mxu1 }
 0x8be   : > { %v2999_v37 = vsel %vm2064_vm9, %v2998_v20, %v2997_v25 }
 0x8c2   : > { %v2585_v57 = vpop.f32.mrb[24].mxu0 }
 0x8c3   : > { %v3000_v9 = vrot.slane %v2585_v57, 5  ;;  %v6888_v41 = vpop.f32.mrb[25].mxu0 }
 0x8c5   : > { %v3001_v48 = vsel %vm2067_vm10, %v3000_v9, %v2999_v37 }
 0x8c6   : > { %v3003_v50 = vsel %vm2070_vm11, %v3002_v44, %v3001_v48 }
 0x8ca   : > { %v2741_v51 = vpop.f32.mrb[26].mxu0 }
 0x8cb   : > { %v3004_v53 = vrot.slane %v2741_v51, 3  ;;  %v6902_v54 = vpop.f32.mrb[27].mxu0 }
 0x8cd   : > { %v3005_v55 = vsel %vm2073_vm12, %v3004_v53, %v3003_v50 }
 0x8ce   : > { %v3007_v61 = vsel %vm2076_vm13, %v3006_v4, %v3005_v55 }
 0x8d2   : > { %v2897_v32 = vpop.f32.mrb[28].mxu0 }
 0x8d3   : > { %v3008_v0 = vrot.slane %v2897_v32, 1  ;;  %v6916_v1 = vpop.f32.mrb[29].mxu0 }
 0x8d5   : > { %v3009_v60 = vsel %vm2079_vm14, %v3008_v0, %v3007_v61 }
 0x8da   : > { %v6930_v62 = vpop.f32.mrb[30].mxu0 }
 0x8db   : > { %v3092_v3 = vadd.f32 %v6930_v62, %v2975_v23  ;;  %v3086_v7 = vpop.f32.mrb[31].mxu0 }
 0x8dc   : > { %v3087_v43 = vadd.f32 %v3086_v7, %v3009_v60 }
 0x8dd   : > { %v3096_v13 = vmul.f32 0.25, %v3092_v3 }
 0x8de   : > { %v3095_v16 = vmul.f32 0.25, %v3087_v43 }
 0x8df   : > { %v3100_v18 = vsel %vm2172_vm6, %v3096_v13, -inf }
 0x8e0   : > { %3101 = vmax.xlane.f32.xlu0 %v3100_v18  ;;  %v3097_v12 = vsel %vm2168_vm15, %v3095_v16, -inf }
 0x8e1   : > { %3098 = vmax.xlane.f32.xlu1 %v3097_v12 }
 0x8f2   : > { %7348 = vrot.lane.b32.xlu1 %v7971_v56, %s7594_s0  ;;  %s7598_s0 = smov 32  }
 0x8f6   : > { %3208 = vrot.lane.b32.xlu1 %v7988_v59, %s7597_s5 }
 0x8fa   : > { %3430 = vrot.lane.b32.xlu1 %v8009_v2, %s7597_s5 }
 0x8fe   : > { %3356 = vrot.lane.b32.xlu1 %v8033_v10, %s7597_s5 }
 0x902   : > { %3504 = vrot.lane.b32.xlu1 %v8055_v15, %s7597_s5 }
 0x906   : > { %3726 = vrot.lane.b32.xlu1 %v8068_v17, %s7597_s5 }
 0x90a   : > { %3874 = vrot.lane.b32.xlu1 %v7948_v42, %s7597_s5 }
 0x90e   : > { %3800 = vrot.lane.b32.xlu1 %v8096_v24, %s7597_s5 }
 0x96d   : > { %v3102_v19 = vpop.xlane.xlu0 %3101 }
 0x96e   : > { %v3104_v20 = vsub.f32 %v3096_v13, %v3102_v19  ;;  %v3099_v23 = vpop.xlane.xlu1 %3098 }
 0x96f   : > { %v3103_v25 = vsub.f32 %v3095_v16, %v3099_v23 }
 0x970   : > { %v3107_v27 = vmul.f32 1.442695, %v3104_v20 }
 0x971   : > { %v3105_v37 = vmul.f32 1.442695, %v3103_v25 }
 0x972   : > { %v7349_v57 = vpop.permute.xlu1 %7348 }
 0x973   : > { %7511 = vpow2.f32 %v3105_v37  ;;  %v7351_v9 = vunpack.i.h.bf16 %v7349_v57  ;;  %v7350_v41 = vunpack.i.l.bf16 %v7349_v57 }
 0x974   : > { %7513 = vpow2.f32 %v3107_v27 }
 0x975   : > { %v7214_v44 = vpack.c.bf16 %v7351_v9, %v7350_v41 }
 0x976   : > { %v3209_v48 = vpop.permute.xlu1 %3208 }
 0x977   : > { %7216 = vmatprep.subr.msk.bf16.mxu1 %vm8112_vm7, %v7214_v44  ;;  %6943 = vmatmul.mubr.msk.f32.vlgmr.msra.gmra.mrb[32].mxu0 %vm1344_vm2, %v3209_v48 }
 0x978   : > { %7231 = vmatpush3.bf16.xpose.msk.msra.mxu0 %vm7910_vm3, %v8004_v63  ;;  %7219 = vmatpush3.bf16.msk.msra.mxu1 %vm8112_vm7, %v7214_v44 }
 0x979   : > { %6956 = vmatprep.mubr.msk.f32.mxu0 %vm7590_vm4, %v7591_v34  ;;  %7236 = vmatprep.subr.bf16.mxu0 %v7589_v5 }
 0x97a   : > { %v3431_v50 = vpop.permute.xlu1 %3430  ;;  %7224 = vmatprep.subr.bf16.mxu1 %v7589_v5 }
 0x97d   : > { %v7512_v51 = vpop.eup %7511 }
 0x97e   : > { %v3357_v53 = vpop.permute.xlu1 %3356  ;;  %v3109_v54 = vsel %vm2168_vm15, %v7512_v51, 0.0  ;;  %v7514_v4 = vpop.eup %7513 }
 0x97f   : > { %3110 = vadd.xlane.f32.xlu0 %v3109_v54  ;;  %6957 = vmatmul.mubr.msk.f32.vlgmr.msra.gmra.mrb[34].mxu0 %vm1344_vm2, %v3357_v53  ;;  %v3112_v55 = vsel %vm2172_vm6, %v7514_v4, 0.0 }
 0x980   : > { %7239 = vmatpush3.bf16.xpose.msk.msra.mxu0 %vm7910_vm3, %v8050_v14  ;;  %6970 = vmatprep.mubr.msk.f32.mxu0 %vm7590_vm4, %v7591_v34 }
 0x981   : > { %7244 = vmatprep.subr.bf16.mxu0 %v7589_v5 }
 0x982   : > { %v3505_v61 = vpop.permute.xlu1 %3504 }
 0x983   : > { %3113 = vadd.xlane.f32.xlu0 %v3112_v55 }
 0x986   : > { %v3727_v43 = vpop.permute.xlu1 %3726 }
 0x987   : > { %6971 = vmatmul.mubr.msk.f32.vlgmr.msra.gmra.mrb[36].mxu0 %vm1344_vm2, %v3505_v61 }
 0x988   : > { %7247 = vmatpush3.bf16.xpose.msk.msra.mxu0 %vm7910_vm3, %v8084_v21  ;;  %6984 = vmatprep.mubr.msk.f32.mxu0 %vm7590_vm4, %v7591_v34 }
 0x989   : > { %7252 = vmatprep.subr.bf16.mxu0 %v7589_v5 }
 0x98a   : > { %v3875_v12 = vpop.permute.xlu1 %3874 }
 0x98e   : > { %v3801_v19 = vpop.permute.xlu1 %3800 }
 0x999   : > { %3282 = vrot.lane.b32.xlu0 %v8186_v38, %s7597_s5 }
 0x99d   : > { %3578 = vrot.lane.b32.xlu0 %v8192_v39, %s7597_s5 }
 0x9a1   : > { %7353 = vrot.lane.b32.xlu0 %v7959_v52, %s7598_s0 }
 0x9a5   : > { %3652 = vrot.lane.b32.xlu0 %v8200_v40, %s7597_s5 }
 0x9a9   : > { %3876 = vrot.lane.b32.xlu0 %v7952_v45, %s7597_s5 }
 0xa0c   : > { %v3111_v32 = vpop.xlane.xlu0 %3110 }
 0xa0d   : > { %7515 = vrcp.f32 %v3111_v32 }
 0xa10   : > { %v3114_v0 = vpop.xlane.xlu0 %3113 }
 0xa11   : > { %7517 = vrcp.f32 %v3114_v0 }
 0xa14   : > { %v3283_v1 = vpop.permute.xlu0 %3282 }
 0xa17   : > { %v7516_v60 = vpop.eup %7515 }
 0xa18   : > { %v3579_v62 = vpop.permute.xlu0 %3578  ;;  %v3117_v3 = vmul.f32 %v7516_v60, %v7512_v51 }
 0xa1a   : > { %6935 = vmatprep.mubr.msk.f32.mxu1 %vm2168_vm15, %v3117_v3 }
 0xa1b   : > { %v7518_v7 = vpop.eup %7517 }
 0xa1c   : > { %v3118_v13 = vmul.f32 %v7518_v7, %v7514_v4  ;;  %v7354_v16 = vpop.permute.xlu0 %7353 }
 0xa1d   : > { %v7356_v20 = vunpack.i.h.bf16 %v7354_v16  ;;  %v7355_v23 = vunpack.i.l.bf16 %v7354_v16 }
 0xa1e   : > { %6936 = vmatmul.mubr.msk.f32.vlgmr.msra.gmra.mrb[22].mxu1 %vm2168_vm15, %v3118_v13 }
 0xa1f   : > { %7227 = vmatpush3.bf16.xpose.msk.msra.mxu1 %vm7910_vm3, %v7954_v46  ;;  %6949 = vmatprep.mubr.msk.f32.mxu1 %vm7590_vm4, %v7591_v34  ;;  %v7256_v25 = vpack.c.bf16 %v7356_v20, %v7355_v23 }
 0xa20   : > { %v3653_v18 = vpop.permute.xlu0 %3652  ;;  %7232 = vmatprep.subr.bf16.mxu1 %v7589_v5 }
 0xa21   : > { %6985 = vmatmul.mubr.msk.f32.vlgmr.msra.gmra.mrb[38].mxu0 %vm1344_vm2, %v3653_v18 }
 0xa22   : > { %7255 = vmatpush3.bf16.xpose.msk.msra.mxu0 %vm7910_vm3, %v8107_v29  ;;  %6998 = vmatprep.mubr.msk.f32.mxu0 %vm7590_vm4, %v7591_v34 }
 0xa24   : > { %v3877_v27 = vpop.permute.xlu0 %3876 }
 0xa26   : > { %6950 = vmatmul.mubr.msk.f32.vlgmr.msra.gmra.mrb[24].mxu1 %vm1344_vm2, %v3283_v1 }
 0xa27   : > { %7235 = vmatpush3.bf16.xpose.msk.msra.mxu1 %vm7910_vm3, %v7925_v33  ;;  %6963 = vmatprep.mubr.msk.f32.mxu1 %vm7590_vm4, %v7591_v34 }
 0xa28   : > { %7240 = vmatprep.subr.bf16.mxu1 %v7589_v5 }
 0xa29   : > { %6999 = vmatmul.mubr.msk.f32.vlgmr.msra.gmra.mrb[40].mxu0 %vm1344_vm2, %v3801_v19 }
 0xa2e   : > { %6964 = vmatmul.mubr.msk.f32.vlgmr.msra.gmra.mrb[26].mxu1 %vm1344_vm2, %v3431_v50 }
 0xa2f   : > { %7243 = vmatpush3.bf16.xpose.msk.msra.mxu1 %vm7910_vm3, %v7981_v58  ;;  %6977 = vmatprep.mubr.msk.f32.mxu1 %vm7590_vm4, %v7591_v34 }
 0xa30   : > { %7248 = vmatprep.subr.bf16.mxu1 %v7589_v5 }
 0xa36   : > { %6978 = vmatmul.mubr.msk.f32.vlgmr.msra.gmra.mrb[28].mxu1 %vm1344_vm2, %v3579_v62 }
 0xa37   : > { %7251 = vmatpush3.bf16.xpose.msk.msra.mxu1 %vm7910_vm3, %v8025_v8  ;;  %6991 = vmatprep.mubr.msk.f32.mxu1 %vm7590_vm4, %v7591_v34 }
 0xa38   : > { %7258 = vmatprep.subr.msk.bf16.mxu1 %vm7910_vm3, %v7256_v25 }
 0xa3e   : > { %6992 = vmatmul.mubr.msk.f32.vlgmr.msra.gmra.mrb[30].mxu1 %vm1344_vm2, %v3727_v43 }
 0xa3f   : > { %7261 = vmatpush3.bf16.xpose.msk.msra.mxu1 %vm7910_vm3, %v7256_v25  ;;  %7005 = vmatprep.mubr.msk.f32.mxu1 %vm1344_vm2, %v3875_v12 }
 0xa40   : > { %7268 = vmatprep.subr.bf16.mxu1 %v7589_v5 }
 0xa46   : > { %7006 = vmatmul.mubr.msk.f32.vlgmr.msra.gmra.mrb[32].mxu1 %vm1344_vm2, %v3877_v27 }
 0xa47   : > { %7271 = vmatpush3.bf16.xpose.msk.msra.mxu1 %vm7910_vm3, %v7906_v26  ;;  %7019 = vmatprep.mubr.msk.f32.mxu1 %vm7590_vm4, %v7591_v34 }
 0xa48   : > { %7276 = vmatprep.subr.bf16.mxu1 %v7589_v5 }
 0xa4a   : > { %v3278_v37 = vpop.f32.mrb[32].mxu0 }
 0xa4b   : > { %v6944_v57 = vpop.f32.mrb[33].mxu0 }
 0xa52   : > { %v3426_v9 = vpop.f32.mrb[34].mxu0 }
 0xa53   : > { %v6958_v41 = vpop.f32.mrb[35].mxu0  ;;  %v3893_v32 = vrot.slane %v3426_v9, 6 }
 0xa5a   : > { %v3574_v44 = vpop.f32.mrb[36].mxu0 }
 0xa5b   : > { %v6972_v48 = vpop.f32.mrb[37].mxu0  ;;  %v3897_v13 = vrot.slane %v3574_v44, 4 }
 0xaf1   : > { %v8375_v50 = vpop.f32.mrb[22].mxu1 }
 0xaf2   : > { %v8377_v51 = vpop.f32.mrb[23].mxu1 }
 0xaf3   : > { %v7372_v53 = vpack.i.bf16 %v8375_v50, %v8377_v51  ;;  %v7428_v50 = vld [vmem:[%s8968_s4 + $0x8] sm:$0xff]   ;;  %v7429_v51 = vld [vmem:[%s8968_s4 + $0x10] sm:$0xff]  }
 0xaf4   : > { %v3722_v54 = vpop.f32.mrb[38].mxu0 }
 0xaf5   : > { %v6986_v26 = vpop.f32.mrb[39].mxu0  ;;  %v3901_v23 = vrot.slane %v3722_v54, 2 }
 0xaf9   : > { %v3352_v4 = vpop.f32.mrb[24].mxu1 }
 0xafa   : > { %v3891_v55 = vrot.slane %v3352_v4, 7  ;;  %v6951_v61 = vpop.f32.mrb[25].mxu1 }
 0xafc   : > { %v3892_v0 = vsel %vm2061_vm8, %v3891_v55, %v3278_v37  ;;  %v3870_v1 = vpop.f32.mrb[40].mxu0 }
 0xafd   : > { %v7000_v60 = vpop.f32.mrb[41].mxu0  ;;  %v3894_v62 = vsel %vm2064_vm9, %v3893_v32, %v3892_v0 }
 0xb01   : > { %v3500_v3 = vpop.f32.mrb[26].mxu1 }
 0xb02   : > { %v3895_v7 = vrot.slane %v3500_v3, 5  ;;  %v6965_v43 = vpop.f32.mrb[27].mxu1 }
 0xb04   : > { %v3896_v16 = vsel %vm2067_vm10, %v3895_v7, %v3894_v62 }
 0xb05   : > { %v3898_v18 = vsel %vm2070_vm11, %v3897_v13, %v3896_v16 }
 0xb09   : > { %v3648_v12 = vpop.f32.mrb[28].mxu1 }
 0xb0a   : > { %v3899_v19 = vrot.slane %v3648_v12, 3  ;;  %v6979_v20 = vpop.f32.mrb[29].mxu1 }
 0xb0c   : > { %v3900_v25 = vsel %vm2073_vm12, %v3899_v19, %v3898_v18 }
 0xb0d   : > { %v3902_v27 = vsel %vm2076_vm13, %v3901_v23, %v3900_v25 }
 0xb11   : > { %v3796_v37 = vpop.f32.mrb[30].mxu1 }
 0xb12   : > { %v3903_v57 = vrot.slane %v3796_v37, 1  ;;  %v6993_v9 = vpop.f32.mrb[31].mxu1 }
 0xb14   : > { %v3904_v41 = vsel %vm2079_vm14, %v3903_v57, %v3902_v27 }
 0xb19   : > { %v7007_v48 = vpop.f32.mrb[32].mxu1 }
 0xb1a   : > { %v3987_v26 = vadd.f32 %v7007_v48, %v3870_v1  ;;  %v3981_v44 = vpop.f32.mrb[33].mxu1 }
 0xb1b   : > { %v3982_v4 = vadd.f32 %v3981_v44, %v3904_v41 }
 0xb1c   : > { %v3991_v55 = vmul.f32 0.25, %v3987_v26 }
 0xb1d   : > { %v3990_v61 = vmul.f32 0.25, %v3982_v4 }
 0xb1e   : > { %v3995_v32 = vsel %vm2172_vm6, %v3991_v55, -inf }
 0xb1f   : > { %3996 = vmax.xlane.f32.xlu1 %v3995_v32  ;;  %v3992_v54 = vsel %vm2168_vm15, %v3990_v61, -inf }
 0xb20   : > { %3993 = vmax.xlane.f32.xlu0 %v3992_v54 }
 0xb30   : > { %4176 = vrot.lane.b32.xlu1 %v8186_v38, %s7599_s30 }
 0xb34   : > { %4102 = vrot.lane.b32.xlu1 %v7988_v59, %s7599_s30 }
 0xb38   : > { %4324 = vrot.lane.b32.xlu1 %v8009_v2, %s7599_s30 }
 0xb3c   : > { %4472 = vrot.lane.b32.xlu1 %v8192_v39, %s7599_s30 }
 0xb40   : > { %7363 = vrot.lane.b32.xlu1 %v7959_v52, %s7600_s3 }
 0xb44   : > { %4546 = vrot.lane.b32.xlu1 %v8200_v40, %s7599_s30 }
 0xb48   : > { %4770 = vrot.lane.b32.xlu1 %v7952_v45, %s7599_s30 }
 0xbac   : > { %v3997_v38 = vpop.xlane.xlu1 %3996 }
 0xbad   : > { %v3999_v0 = vsub.f32 %v3991_v55, %v3997_v38  ;;  %v3994_v1 = vpop.xlane.xlu0 %3993 }
 0xbae   : > { %v3998_v59 = vsub.f32 %v3990_v61, %v3994_v1 }
 0xbaf   : > { %v4002_v60 = vmul.f32 1.442695, %v3999_v0 }
 0xbb0   : > { %v4000_v62 = vmul.f32 1.442695, %v3998_v59  ;;  %v4177_v2 = vpop.permute.xlu1 %4176 }
 0xbb1   : > { %7519 = vpow2.f32 %v4002_v60 }
 0xbb2   : > { %7521 = vpow2.f32 %v4000_v62 }
 0xbb4   : > { %v4103_v39 = vpop.permute.xlu1 %4102 }
 0xbb5   : > { %7020 = vmatmul.mubr.msk.f32.vlgmr.msra.gmra.mrb[34].mxu1 %vm1344_vm2, %v4103_v39 }
 0xbb6   : > { %7279 = vmatpush3.bf16.xpose.msk.msra.mxu1 %vm7910_vm3, %v8004_v63  ;;  %7033 = vmatprep.mubr.msk.f32.mxu1 %vm7590_vm4, %v7591_v34 }
 0xbb7   : > { %7284 = vmatprep.subr.bf16.mxu1 %v7589_v5 }
 0xbbb   : > { %v7520_v45 = vpop.eup %7519 }
 0xbbc   : > { %v4007_v52 = vsel %vm2172_vm6, %v7520_v45, 0.0  ;;  %v7522_v40 = vpop.eup %7521 }
 0xbbd   : > { %4008 = vadd.xlane.f32.xlu0 %v4007_v52  ;;  %v4004_v3 = vsel %vm2168_vm15, %v7522_v40, 0.0 }
 0xbc1   : > { %4005 = vadd.xlane.f32.xlu0 %v4004_v3 }
 0xbd7   : > { %7358 = vrot.lane.b32.xlu0 %v7971_v56, %s7597_s5 }
 0xbdb   : > { %4250 = vrot.lane.b32.xlu0 %v8033_v10, %s7599_s30  ;;  %v4325_v10 = vpop.permute.xlu1 %4324 }
 0xbdf   : > { %4398 = vrot.lane.b32.xlu0 %v8055_v15, %s7599_s30 }
 0xbe3   : > { %4620 = vrot.lane.b32.xlu0 %v8068_v17, %s7599_s30  ;;  %v4473_v17 = vpop.permute.xlu1 %4472 }
 0xbe7   : > { %4768 = vrot.lane.b32.xlu0 %v7948_v42, %s7599_s30 }
 0xbeb   : > { %4694 = vrot.lane.b32.xlu0 %v8096_v24, %s7599_s30 }
 0xc4a   : > { %v4009_v63 = vpop.xlane.xlu0 %4008 }
 0xc4b   : > { %7523 = vrcp.f32 %v4009_v63 }
 0xc4e   : > { %v4006_v7 = vpop.xlane.xlu0 %4005 }
 0xc4f   : > { %7525 = vrcp.f32 %v4006_v7 }
 0xc52   : > { %v7359_v43 = vpop.permute.xlu0 %7358 }
 0xc53   : > { %v7361_v13 = vunpack.i.h.bf16 %v7359_v43  ;;  %v7360_v16 = vunpack.i.l.bf16 %v7359_v43 }
 0xc55   : > { %v7262_v18 = vpack.c.bf16 %v7361_v13, %v7360_v16  ;;  %v7524_v15 = vpop.eup %7523 }
 0xc56   : > { %v4251_v12 = vpop.permute.xlu0 %4250  ;;  %v4013_v19 = vmul.f32 %v7524_v15, %v7520_v45 }
 0xc57   : > { %7264 = vmatprep.subr.msk.bf16.mxu0 %vm8112_vm7, %v7262_v18  ;;  %7034 = vmatmul.mubr.msk.f32.vlgmr.msra.gmra.mrb[36].mxu1 %vm1344_vm2, %v4251_v12 }
 0xc58   : > { %7287 = vmatpush3.bf16.xpose.msk.msra.mxu1 %vm7910_vm3, %v8050_v14  ;;  %7267 = vmatpush3.bf16.msk.msra.mxu0 %vm8112_vm7, %v7262_v18  ;;  %v7364_v14 = vpop.permute.xlu1 %7363 }
 0xc59   : > { %v7526_v42 = vpop.eup %7525  ;;  %7047 = vmatprep.mubr.msk.f32.mxu1 %vm7590_vm4, %v7591_v34  ;;  %7292 = vmatprep.subr.bf16.mxu1 %v7589_v5 }
 0xc5a   : > { %v4012_v24 = vmul.f32 %v7526_v42, %v7522_v40  ;;  %7272 = vmatprep.subr.bf16.mxu0 %v7589_v5  ;;  %v4399_v20 = vpop.permute.xlu0 %4398 }
 0xc5c   : > { %7012 = vmatprep.mubr.msk.f32.mxu0 %vm2168_vm15, %v4012_v24  ;;  %v4547_v25 = vpop.permute.xlu1 %4546 }
 0xc5d   : > { %7013 = vmatmul.mubr.msk.f32.vlgmr.msra.gmra.mrb[42].mxu0 %vm2168_vm15, %v4013_v19 }
 0xc5e   : > { %7026 = vmatprep.mubr.msk.f32.mxu0 %vm7590_vm4, %v7591_v34  ;;  %v4621_v23 = vpop.permute.xlu0 %4620 }
 0xc5f   : > { %7048 = vmatmul.mubr.msk.f32.vlgmr.msra.gmra.mrb[38].mxu1 %vm1344_vm2, %v4399_v20 }
 0xc60   : > { %7295 = vmatpush3.bf16.xpose.msk.msra.mxu1 %vm7910_vm3, %v8084_v21  ;;  %7061 = vmatprep.mubr.msk.f32.mxu1 %vm7590_vm4, %v7591_v34  ;;  %v8460_v34 = vld [vmem:[#allocation2] sm:$0xff]  ;;  %v7365_v21 = vunpack.i.l.bf16 %v7364_v14 }
 0xc61   : > { %7275 = vmatpush3.bf16.xpose.msk.msra.mxu0 %vm7910_vm3, %v7954_v46  ;;  %7300 = vmatprep.subr.bf16.mxu1 %v7589_v5 }
 0xc62   : > { %7280 = vmatprep.subr.bf16.mxu0 %v7589_v5  ;;  %v4769_v27 = vpop.permute.xlu0 %4768 }
 0xc66   : > { %v4695_v46 = vpop.permute.xlu0 %4694 }
 0xc67   : > { %7062 = vmatmul.mubr.msk.f32.vlgmr.msra.gmra.mrb[40].mxu1 %vm1344_vm2, %v4547_v25 }
 0xc68   : > { %7303 = vmatpush3.bf16.xpose.msk.msra.mxu1 %vm7910_vm3, %v8107_v29  ;;  %7027 = vmatmul.mubr.msk.f32.vlgmr.msra.gmra.mrb[44].mxu0 %vm1344_vm2, %v4177_v2 }
 0xc69   : > { %7283 = vmatpush3.bf16.xpose.msk.msra.mxu0 %vm7910_vm3, %v7925_v33  ;;  %7075 = vmatprep.mubr.msk.f32.mxu1 %vm7590_vm4, %v8460_v34  ;;  %v7366_v33 = vunpack.i.h.bf16 %v7364_v14 }
 0xc6a   : > { %7040 = vmatprep.mubr.msk.f32.mxu0 %vm7590_vm4, %v8460_v34  ;;  %7288 = vmatprep.subr.bf16.mxu0 %v7589_v5 }
 0xc6b   : > { %v7304_v29 = vpack.c.bf16 %v7366_v33, %v7365_v21 }
 0xc6f   : > { %7076 = vmatmul.mubr.msk.f32.vlgmr.msra.gmra.mrb[42].mxu1 %vm1344_vm2, %v4695_v46 }
 0xc70   : > { %7041 = vmatmul.mubr.msk.f32.vlgmr.msra.gmra.mrb[46].mxu0 %vm1344_vm2, %v4325_v10 }
 0xc71   : > { %7291 = vmatpush3.bf16.xpose.msk.msra.mxu0 %vm7910_vm3, %v7981_v58  ;;  %7054 = vmatprep.mubr.msk.f32.mxu0 %vm7590_vm4, %v8460_v34 }
 0xc72   : > { %7296 = vmatprep.subr.bf16.mxu0 %v7589_v5  ;;  %v4771_v5 = vpop.permute.xlu1 %4770 }
 0xc78   : > { %7055 = vmatmul.mubr.msk.f32.vlgmr.msra.gmra.mrb[48].mxu0 %vm1344_vm2, %v4473_v17 }
 0xc79   : > { %7299 = vmatpush3.bf16.xpose.msk.msra.mxu0 %vm7910_vm3, %v8025_v8  ;;  %7068 = vmatprep.mubr.msk.f32.mxu0 %vm7590_vm4, %v8460_v34 }
 0xc7a   : > { %7306 = vmatprep.subr.msk.bf16.mxu0 %vm7910_vm3, %v7304_v29 }
 0xc80   : > { %7069 = vmatmul.mubr.msk.f32.vlgmr.msra.gmra.mrb[50].mxu0 %vm1344_vm2, %v4621_v23 }
 0xc81   : > { %7309 = vmatpush3.bf16.xpose.msk.msra.mxu0 %vm7910_vm3, %v7304_v29  ;;  %7082 = vmatprep.mubr.msk.f32.mxu0 %vm1344_vm2, %v4769_v27  ;;  %vm5022_vm3 = vcmask 261120  }
 0xc82   : > { %7092 = vmatprep.subr.bf16.mxu0 %v8460_v34 }
 0xc88   : > { %v4172_v58 = vpop.f32.mrb[34].mxu1  ;;  %7083 = vmatmul.mubr.msk.f32.vlgmr.msra.gmra.mrb[52].mxu0 %vm1344_vm2, %v4771_v5 }
 0xc89   : > { %v7021_v8 = vpop.f32.mrb[35].mxu1  ;;  %7100 = vmatprep.mubr.msk.bf16.mxu0 %vm7590_vm4, %v8460_v34 }
 0xd2a   : > { %v4320_v37 = vpop.f32.mrb[36].mxu1 }
 0xd2b   : > { %v7035_v57 = vpop.f32.mrb[37].mxu1  ;;  %v4787_v54 = vrot.slane %v4320_v37, 6 }
 0xd30   : > { %v7014_v9 = vpop.f32.mrb[42].mxu0 }
 0xd31   : > { %v4093_v41 = vpop.f32.mrb[43].mxu0 }
 0xd32   : > { %v7377_v48 = vpack.i.bf16 %v7014_v9, %v4093_v41  ;;  %v4468_v26 = vpop.f32.mrb[38].mxu1 }
 0xd33   : > { %v7049_v28 = vpop.f32.mrb[39].mxu1  ;;  %v4791_v39 = vrot.slane %v4468_v26, 4 }
 0xd3a   : > { %v4616_v44 = vpop.f32.mrb[40].mxu1 }
 0xd3b   : > { %v7063_v4 = vpop.f32.mrb[41].mxu1  ;;  %v4246_v55 = vpop.f32.mrb[44].mxu0  ;;  %v4795_v7 = vrot.slane %v4616_v44, 2 }
 0xd3c   : > { %v4785_v61 = vrot.slane %v4246_v55, 7  ;;  %v7028_v32 = vpop.f32.mrb[45].mxu0  ;;  %v7427_v55 = vld [vmem:[%s8968_s4] sm:$0xff]  }
 0xd3d   : > { %7093 = vmatpush3.bf16.msra.mxu0 %v7427_v55 }
 0xd3e   : > { %v4786_v38 = vsel %vm2061_vm8, %v4785_v61, %v4172_v58  ;;  %7094 = vmatprep.subr.bf16.mxu0 %v8460_v34  ;;  %vm5338_vm8 = vcmask 1044480  }
 0xd3f   : > { %v4788_v0 = vsel %vm2064_vm9, %v4787_v54, %v4786_v38  ;;  %vm5354_vm9 = vcmask 1043456  }
 0xd41   : > { %7095 = vmatpush3.bf16.msra.mxu0 %v7428_v50 }
 0xd42   : > { %v4764_v1 = vpop.f32.mrb[42].mxu1  ;;  %7096 = vmatprep.subr.bf16.mxu0 %v8460_v34 }
 0xd43   : > { %v7077_v59 = vpop.f32.mrb[43].mxu1  ;;  %v4394_v60 = vpop.f32.mrb[46].mxu0 }
 0xd44   : > { %v4789_v62 = vrot.slane %v4394_v60, 5  ;;  %v7042_v2 = vpop.f32.mrb[47].mxu0 }
 0xd45   : > { %7097 = vmatpush3.bf16.msra.mxu0 %v7429_v51 }
 0xd46   : > { %v4790_v45 = vsel %vm2067_vm10, %v4789_v62, %v4788_v0  ;;  %7098 = vmatprep.subr.bf16.mxu0 %v8460_v34  ;;  %vm5370_vm10 = vcmask 1042432  }
 0xd47   : > { %v4792_v52 = vsel %vm2070_vm11, %v4791_v39, %v4790_v45  ;;  %vm5386_vm11 = vcmask 1041408  }
 0xd4b   : > { %v4542_v40 = vpop.f32.mrb[48].mxu0 }
 0xd4c   : > { %v4793_v3 = vrot.slane %v4542_v40, 3  ;;  %v7056_v63 = vpop.f32.mrb[49].mxu0 }
 0xd4e   : > { %v4794_v43 = vsel %vm2073_vm12, %v4793_v3, %v4792_v52 }
 0xd4f   : > { %v4796_v13 = vsel %vm2076_vm13, %v4795_v7, %v4794_v43 }
 0xd53   : > { %v4690_v16 = vpop.f32.mrb[50].mxu0 }
 0xd54   : > { %v4797_v10 = vrot.slane %v4690_v16, 1  ;;  %v7070_v18 = vpop.f32.mrb[51].mxu0 }
 0xd56   : > { %v4798_v12 = vsel %vm2079_vm14, %v4797_v10, %v4796_v13 }
 0xd5b   : > { %v7084_v15 = vpop.f32.mrb[52].mxu0 }
 0xd5c   : > { %v4881_v42 = vadd.f32 %v7084_v15, %v4764_v1  ;;  %v4875_v17 = vpop.f32.mrb[53].mxu0 }
 0xd5d   : > { %v4876_v24 = vadd.f32 %v4875_v17, %v4798_v12 }
 0xd5e   : > { %v4885_v19 = vmul.f32 0.25, %v4881_v42 }
 0xd5f   : > { %v4884_v20 = vmul.f32 0.25, %v4876_v24 }
 0xd60   : > { %v4889_v14 = vsel %vm2172_vm6, %v4885_v19, -inf }
 0xd61   : > { %4890 = vmax.xlane.f32.xlu0 %v4889_v14  ;;  %v4886_v23 = vsel %vm2168_vm15, %v4884_v20, -inf }
 0xd62   : > { %4887 = vmax.xlane.f32.xlu1 %v4886_v23 }
 0xd73   : > { %7368 = vrot.lane.b32.xlu1 %v7971_v56, %s7599_s30 }
 0xd77   : > { %7378 = vrot.lane.b32.xlu1 %v7377_v48, %s7598_s0 }
 0xdee   : > { %v4891_v25 = vpop.xlane.xlu0 %4890 }
 0xdef   : > { %v4893_v27 = vsub.f32 %v4885_v19, %v4891_v25  ;;  %v4888_v46 = vpop.xlane.xlu1 %4887 }
 0xdf0   : > { %v4892_v33 = vsub.f32 %v4884_v20, %v4888_v46 }
 0xdf1   : > { %v4896_v21 = vmul.f32 1.442695, %v4893_v27 }
 0xdf2   : > { %v4894_v29 = vmul.f32 1.442695, %v4892_v33 }
 0xdf3   : > { %v7369_v5 = vpop.permute.xlu1 %7368 }
 0xdf4   : > { %7527 = vpow2.f32 %v4894_v29  ;;  %v7371_v58 = vunpack.i.h.bf16 %v7369_v5  ;;  %v7370_v8 = vunpack.i.l.bf16 %v7369_v5  ;;  %v7433_v29 = vld [vmem:[%s8926_s12 + $0x4] ss:$8 sps:$4 sm:$0xff]   ;;  %v7431_v5 = vld [vmem:[%s8926_s12] ss:$8 sps:$4 sm:$0xff]  }
 0xdf5   : > { %7529 = vpow2.f32 %v4896_v21 }
 0xdf6   : > { %v7310_v37 = vpack.c.bf16 %v7371_v58, %v7370_v8  ;;  %v7436_v58 = vld [vmem:[%s8926_s12 + $0x14] ss:$8 sps:$4 sm:$0xff]   ;;  %v7434_v8 = vld [vmem:[%s8926_s12 + $0x10] ss:$8 sps:$4 sm:$0xff]  }
 0xdf7   : > { %v7379_v59 = vpop.permute.xlu1 %7378 }
 0xdf8   : > { %7312 = vmatprep.subr.msk.bf16.mxu1 %vm8112_vm7, %v7310_v37  ;;  %v7381_v2 = vunpack.i.h.bf16 %v7379_v59  ;;  %v7380_v39 = vunpack.i.l.bf16 %v7379_v59 }
 0xdf9   : > { %7315 = vmatpush3.bf16.msk.msra.mxu1 %vm8112_vm7, %v7310_v37  ;;  %vm5025_vm7 = vcmask 392192   ;;  %v7437_v37 = vld [vmem:[%s8926_s12 + $0x20] ss:$8 sps:$4 sm:$0xff]  }
 0xdfa   : > { %5217 = vmatprep.subr.bf16.mxu1 %v7433_v29 }
 0xdfe   : > { %v7528_v56 = vpop.eup %7527 }
 0xdff   : > { %v4898_v57 = vsel %vm2168_vm15, %v7528_v56, 0.0  ;;  %v7530_v9 = vpop.eup %7529 }
 0xe00   : > { %4899 = vadd.xlane.f32.xlu0 %v4898_v57  ;;  %v4901_v41 = vsel %vm2172_vm6, %v7530_v9, 0.0  ;;  %v7442_v57 = vld [vmem:[%s8926_s12 + $0x34] ss:$8 sps:$4 sm:$0xff]  }
 0xe04   : > { %4902 = vadd.xlane.f32.xlu0 %v4901_v41 }
 0xe1a   : > { %7373 = vrot.lane.b32.xlu0 %v7372_v53, %s7600_s3  ;;  %v7430_v53 = vld [vmem:[%s8968_s4 + $0x18] sm:$0xff]  }
 0xe1b   : > { %7099 = vmatpush3.bf16.msra.mxu0 %v7430_v53 }
 0xe1c   : > { %7104 = vmatprep.subr.bf16.mxu0 %v8460_v34 }
 0xe8d   : > { %v4900_v48 = vpop.xlane.xlu0 %4899 }
 0xe8e   : > { %7531 = vrcp.f32 %v4900_v48 }
 0xe91   : > { %v4903_v26 = vpop.xlane.xlu0 %4902 }
 0xe92   : > { %7533 = vrcp.f32 %v4903_v26 }
 0xe95   : > { %v7374_v38 = vpop.permute.xlu0 %7373 }
 0xe96   : > { %v7376_v0 = vunpack.i.h.bf16 %v7374_v38  ;;  %v7375_v1 = vunpack.i.l.bf16 %v7374_v38 }
 0xe98   : > { %v7532_v28 = vpop.eup %7531  ;;  %v5021_v60 = vsel %vm1344_vm2, %v8256_v6, %v7376_v0  ;;  %v5020_v62 = vsel %vm1344_vm2, %v8258_v11, %v7375_v1  ;;  %v6521_v6 = vld [vmem:[%s8969_s8] ss:$0 sm:$0xff]  ;;  %vm5306_vm2 = vcmask 1046528  }
 0xe99   : > { %v4906_v35 = vmul.f32 %v7532_v28, %v7528_v56  ;;  %v5023_v3 = vsel %vm5022_vm3, %v5020_v62, %v7380_v39  ;;  %v5024_v63 = vsel %vm5022_vm3, %v5021_v60, %v7381_v2  ;;  %v7439_v56 = vld [vmem:[%s8926_s12 + $0x24] ss:$8 sps:$4 sm:$0xff]   ;;  %v7445_v2 = vld [vmem:[%s8931_s17 + $0x10] sm:$0xff]  }
 0xe9a   : > { %v7443_v60 = vld [vmem:[%s8931_s17] sm:$0xff]   ;;  %v7444_v62 = vld [vmem:[%s8931_s17 + $0x8] sm:$0xff]  }
 0xe9b   : > { %7089 = vmatprep.mubr.msk.f32.mxu1 %vm2168_vm15, %v4906_v35  ;;  %v7447_v39 = vld [vmem:[%s8931_s17 + $0x20] sm:$0xff]  }
 0xe9c   : > { %v7534_v44 = vpop.eup %7533 }
 0xe9d   : > { %v4907_v4 = vmul.f32 %v7534_v44, %v7530_v9  ;;  %v7440_v9 = vld [vmem:[%s8926_s12 + $0x30] ss:$8 sps:$4 sm:$0xff]  }
 0xe9f   : > { %7090 = vmatmul.mubr.msk.f32.vlgmr.msra.gmra.mrb[44].mxu1 %vm2168_vm15, %v4907_v4  ;;  %v5114_v4 = vld [vmem:[%s8925_s11] sm:$0x3] }
 0xea0   : > { %5249 = vmatprep.mubr.bf16.mxu1 %v7588_v22  ;;  %5218 = vmatpush1.bf16.msra.mxu1 %v7431_v5  ;;  %v5144_v50 = vrot.slane %v5114_v4, %v7787_v31 }
 0xea1   : > { %5219 = vmatprep.subr.bf16.mxu1 %v7436_v58  ;;  %v8636_v58 = vsub.s32 4, %v7784_v30 }
 0xea4   : > { %5220 = vmatpush1.bf16.msra.mxu1 %v7434_v8 }
 0xea5   : > { %5221 = vmatprep.subr.bf16.mxu1 %v7439_v56 }
 0xea8   : > { %5222 = vmatpush1.bf16.msra.mxu1 %v7437_v37  ;;  %v8640_v37 = vsub.s32 5, %v7784_v30 }
 0xea9   : > { %5223 = vmatprep.subr.bf16.mxu1 %v7442_v57 }
 0xeac   : > { %5224 = vmatpush1.bf16.msra.mxu1 %v7440_v9 }
 0xf72   : > { %v7091_v61 = vpop.f32.mrb[44].mxu1 }
 0xf73   : > { %v4987_v32 = vpop.f32.mrb[45].mxu1 }
 0xf74   : > { %v7382_v54 = vpack.i.bf16 %v7091_v61, %v4987_v32 }
 0xf76   : > { %7383 = vrot.lane.b32.xlu1 %v7382_v54, %s7596_s9  ;;  %v5150_v54 = vrot.slane %v5114_v4, %v7794_v36 }
 0xfe8   : > { %v7384_v45 = vpop.permute.xlu1 %7383 }
 0xfe9   : > { %v7386_v52 = vunpack.i.h.bf16 %v7384_v45  ;;  %v7385_v40 = vunpack.i.l.bf16 %v7384_v45  ;;  %v7448_v45 = vld [vmem:[%s8931_s17 + $0x28] sm:$0xff]  }
 0xfeb   : > { %v5027_v7 = vsel %vm5025_vm7, %v5024_v63, %v7386_v52  ;;  %v5026_v43 = vsel %vm5025_vm7, %v5023_v3, %v7385_v40  ;;  %v7449_v52 = vld [vmem:[%s8931_s17 + $0x30] sm:$0xff]   ;;  %v7450_v40 = vld [vmem:[%s8931_s17 + $0x38] sm:$0xff]   ;;  %v5162_v3 = vld [vmem:[%s8927_s13] sm:$0x3] }
 0xfec   : > { %v5036_v13 = vpack.c.bf16 %v5027_v7, %v5026_v43  ;;  %v5171_v63 = vrot.slane %v5162_v3, %v7794_v36 }
 0xfee   : > { %7101 = vmatmul.mubr.msk.bf16.vlgmr.msra.gmra.mrb[56].mxu0 %vm769_vm0, %v5036_v13 }
 0xfef   : > { %7120 = vmatprep.mubr.msk.bf16.mxu0 %vm7590_vm4, %v8460_v34  ;;  %7105 = vmatpush3.bf16.msra.mxu0 %v7443_v60  ;;  %vm5322_vm4 = vcmask 1045504  }
 0xff0   : > { %7106 = vmatprep.subr.bf16.mxu0 %v8460_v34 }
 0xff3   : > { %7107 = vmatpush3.bf16.msra.mxu0 %v7444_v62 }
 0xff4   : > { %7108 = vmatprep.subr.bf16.mxu0 %v8460_v34 }
 0xff7   : > { %7109 = vmatpush3.bf16.msra.mxu0 %v7445_v2 }
 0xff8   : > { %7110 = vmatprep.subr.bf16.mxu0 %v8460_v34 }
0x10c1   : > { %v5105_v11 = vpop.f32.mrb[56].mxu0 }
0x10c2   : > { %v5106_v16 = vadd.f32 %v6521_v6, %v5105_v11  ;;  %v7102_v10 = vpop.f32.mrb[57].mxu0 }
0x10c3   : > { %v5108_v18 = vpop.f32.mrb[58].mxu0 }
0x10c4   : > { %v8544_v12 = vadd.f32 %v5106_v16, %v7856_v47  ;;  %v5109_v15 = vadd.f32 %v6521_v6, %v5108_v18  ;;  %v7103_v42 = vpop.f32.mrb[59].mxu0 }
0x10c6   : > { %v8547_v17 = vadd.f32 %v5109_v15, %v7861_v49  ;;  %v5115_v24 = vsel %vm769_vm0, %v8544_v12, 0.0 }
0x10c7   : > { %5116 = vadd.xlane.f32.xlu1 %v5115_v24 }
0x10c8   : > { %v5118_v19 = vsel %vm773_vm1, %v8547_v17, 0.0 }
0x10c9   : > { %5119 = vadd.xlane.f32.xlu0 %v5118_v19 }
0x1154   : > { %v5117_v20 = vpop.xlane.xlu1 %5116 }
0x1155   : > { %v5121_v14 = vmul.f32 0.015625, %v5117_v20  ;;  %v5167_v20 = vrot.slane %v5162_v3, %v7787_v31 }
0x1156   : > { %v5120_v23 = vpop.xlane.xlu0 %5119 }
0x1157   : > { %v5123_v25 = vsub.f32 %v8544_v12, %v5121_v14  ;;  %v5122_v47 = vmul.f32 0.015625, %v5120_v23 }
0x1159   : > { %v5124_v27 = vsub.f32 %v8547_v17, %v5122_v47  ;;  %v5125_v46 = vmul.f32 %v5123_v25, %v5123_v25  ;;  %v8628_v47 = vsub.s32 2, %v7784_v30 }
0x115b   : > { %v5127_v49 = vsel %vm769_vm0, %v5125_v46, 0.0  ;;  %v5126_v33 = vmul.f32 %v5124_v27, %v5124_v27 }
0x115c   : > { %5128 = vadd.xlane.f32.xlu0 %v5127_v49 }
0x115d   : > { %v5130_v21 = vsel %vm773_vm1, %v5126_v33, 0.0  ;;  %v8631_v33 = vsub.s32 3, %v7784_v30 }
0x1160   : > { %5131 = vadd.xlane.f32.xlu0 %v5130_v21 }
0x11e9   : > { %v5129_v41 = vpop.xlane.xlu0 %5128 }
0x11ea   : > { %v5133_v48 = vmul.f32 0.015625, %v5129_v41  ;;  %v8646_v41 = vsub.s32 6, %v7784_v30 }
0x11ec   : > { %v5135_v26 = vadd.f32 1e-05, %v5133_v48 }
0x11ed   : > { %v5132_v28 = vpop.xlane.xlu0 %5131 }
0x11ee   : > { %7535 = vrsqrt.f32 %v5135_v26  ;;  %v5134_v35 = vmul.f32 0.015625, %v5132_v28 }
0x11f0   : > { %v5136_v44 = vadd.f32 1e-05, %v5134_v35 }
0x11f2   : > { %7537 = vrsqrt.f32 %v5136_v44  ;;  %v8654_v44 = vsub.s32 7, %v7784_v30 }
0x11f8   : > { %v7536_v55 = vpop.eup %7535 }
0x11f9   : > { %v5139_v51 = vmul.f32 %v7536_v55, %v5123_v25  ;;  %v5286_v25 = vld [vmem:[%s8928_s14] sm:$0xff] }
0x11fa   : > { %v5301_v29 = vrot.slane %v5286_v25, %v7794_v36  ;;  %v5317_v5 = vrot.slane %v5286_v25, %v8628_v47  ;;  %v5333_v8 = vrot.slane %v5286_v25, %v8631_v33  ;;  %v5349_v9 = vrot.slane %v5286_v25, %v8636_v58 }
0x11fb   : > { %v5145_v61 = vmul.f32 %v5144_v50, %v5139_v51  ;;  %v5293_v48 = vrot.slane %v5286_v25, %v7787_v31  ;;  %v5365_v35 = vrot.slane %v5286_v25, %v8640_v37  ;;  %v5397_v62 = vrot.slane %v5286_v25, %v8654_v44 }
0x11fc   : > { %v7538_v53 = vpop.eup %7537  ;;  %v5302_v56 = vmul.f32 %v8460_v34, %v5301_v29  ;;  %v5318_v57 = vmul.f32 %v8460_v34, %v5317_v5  ;;  %v5334_v28 = vmul.f32 %v8460_v34, %v5333_v8 }
0x11fd   : > { %v5140_v32 = vmul.f32 %v7538_v53, %v5124_v27  ;;  %v5151_v0 = vadd.f32 %v5150_v54, %v5145_v61  ;;  %v5294_v53 = vmul.f32 %v8460_v34, %v5293_v48  ;;  %v5366_v60 = vmul.f32 %v8460_v34, %v5365_v35 }
0x11fe   : > { %v5307_v55 = vrot.slane %v5302_v56, 1  ;;  %v5323_v61 = vrot.slane %v5318_v57, 2 }
0x11ff   : > { %v5146_v38 = vmul.f32 %v5144_v50, %v5140_v32  ;;  %v5350_v32 = vmul.f32 %v8460_v34, %v5349_v9 }
0x1201   : > { %v5152_v1 = vadd.f32 %v5150_v54, %v5146_v38  ;;  %v5381_v54 = vrot.slane %v5286_v25, %v8646_v41 }
0x1203   : > { %v5161_v59 = vpack.c.bf16 %v5152_v1, %v5151_v0  ;;  %v5382_v3 = vmul.f32 %v8460_v34, %v5381_v54 }
0x1205   : > { %6535 = vmatmul.mubr.msk.bf16.vlgmr.msra.gmra.mrb[48].mxu1 %vm769_vm0, %v5161_v59  ;;  %v5339_v59 = vrot.slane %v5334_v28, 3 }
0x1206   : > { %6020 = vmatprep.mubr.bf16.mxu1 %v7588_v22  ;;  %v7446_v22 = vld [vmem:[%s8931_s17 + $0x18] sm:$0xff]  }
0x1207   : > { %7111 = vmatpush3.bf16.msra.mxu0 %v7446_v22 }
0x1208   : > { %7112 = vmatprep.subr.bf16.mxu0 %v8460_v34 }
0x120b   : > { %7113 = vmatpush3.bf16.msra.mxu0 %v7447_v39 }
0x120c   : > { %7114 = vmatprep.subr.bf16.mxu0 %v8460_v34 }
0x120f   : > { %7115 = vmatpush3.bf16.msra.mxu0 %v7448_v45 }
0x1210   : > { %7116 = vmatprep.subr.bf16.mxu0 %v8460_v34 }
0x1213   : > { %7117 = vmatpush3.bf16.msra.mxu0 %v7449_v52 }
0x1214   : > { %7118 = vmatprep.subr.bf16.mxu0 %v8460_v34 }
0x1217   : > { %7119 = vmatpush3.bf16.msra.mxu0 %v7450_v40  ;;  %v5355_v40 = vrot.slane %v5350_v32, 4 }
0x12d8   : > { %v5251_v7 = vpop.f32.mrb[48].mxu1 }
0x12d9   : > { %v5253_v43 = vpop.f32.mrb[49].mxu1  ;;  %v5252_v14 = vadd.f32 %v5251_v7, %v5167_v20 }
0x12da   : > { %v5254_v13 = vadd.f32 %v5253_v43, %v5171_v63  ;;  %v5255_v6 = vpop.f32.mrb[50].mxu1 }
0x12db   : > { %v5257_v11 = vpop.f32.mrb[51].mxu1  ;;  %v5256_v46 = vadd.f32 %v5255_v6, %v5167_v20 }
0x12dc   : > { %v6536_v16 = vmul.f32 -1.442695, %v5254_v13  ;;  %v5258_v10 = vadd.f32 %v5257_v11, %v5171_v63  ;;  %v5287_v63 = vld [vmem:[%s8928_s14 + $0x8] sm:$0xff] }
0x12de   : > { %7539 = vpow2.f32 %v6536_v16  ;;  %v6537_v18 = vmul.f32 -1.442695, %v5258_v10  ;;  %v5371_v16 = vrot.slane %v5366_v60, 5  ;;  %v5398_v10 = vmul.f32 %v8460_v34, %v5397_v62 }
0x12e0   : > { %7541 = vpow2.f32 %v6537_v18 }
0x12e8   : > { %v7540_v15 = vpop.eup %7539 }
0x12e9   : > { %v5266_v42 = vadd.f32 1.0, %v7540_v15 }
0x12ea   : > { %v7542_v24 = vpop.eup %7541 }
0x12eb   : > { %7543 = vrcp.f32 %v5266_v42  ;;  %v5267_v19 = vadd.f32 1.0, %v7542_v24 }
0x12ed   : > { %7545 = vrcp.f32 %v5267_v19 }
0x12f5   : > { %v7544_v23 = vpop.eup %7543 }
0x12f6   : > { %v5272_v27 = vmul.f32 %v7544_v23, %v5252_v14  ;;  %v5387_v14 = vrot.slane %v5382_v3, 6  ;;  %v5412_v23 = vrot.slane %v5287_v63, %v7787_v31 }
0x12f7   : > { %v7546_v49 = vpop.eup %7545 }
0x12f8   : > { %5279 = vst [vmem:[#allocation2 + $0xf] sm:$0xff] %v5272_v27  ;;  %v5273_v21 = vmul.f32 %v7546_v49, %v5256_v46  ;;  %v5420_v49 = vrot.slane %v5287_v63, %v7794_v36 }
0x12fa   : > { %5280 = vst [vmem:[#allocation2 + $0x17] sm:$0x1] %v5273_v21 }
0x12ff   : > { %v8649_v26 = vld [vmem:[#allocation2 + $0x8] sm:$0xff] }
0x1300   : > { %v5303_v4 = vmul.f32 %v5301_v29, %v8649_v26  ;;  %v5319_v50 = vmul.f32 %v5317_v5, %v8649_v26  ;;  %v5335_v51 = vmul.f32 %v5333_v8, %v8649_v26  ;;  %v5295_v38 = vmul.f32 %v5293_v48, %v8649_v26 }
0x1301   : > { %v5351_v30 = vmul.f32 %v5349_v9, %v8649_v26  ;;  %v5367_v45 = vmul.f32 %v5365_v35, %v8649_v26  ;;  %v5383_v6 = vmul.f32 %v5381_v54, %v8649_v26  ;;  %v5399_v24 = vmul.f32 %v5397_v62, %v8649_v26  ;;  %v8677_v19 = vld [vmem:[#allocation2 + $0x10] sm:$0xff] }
0x1302   : > { %v5308_v0 = vrot.slane %v5303_v4, 1  ;;  %v5324_v1 = vrot.slane %v5319_v50, 2  ;;  %v5340_v39 = vrot.slane %v5335_v51, 3  ;;  %v5402_v29 = vrot.slane %v5398_v10, 7  ;;  %v8692_v50 = vld [vmem:[%s8928_s14 + $0x10] sm:$0xff] }
0x1303   : > { %v5356_v13 = vrot.slane %v5351_v30, 4  ;;  %v5372_v42 = vrot.slane %v5367_v45, 5  ;;  %v5388_v46 = vrot.slane %v5383_v6, 6  ;;  %v5435_v5 = vrot.slane %v5287_v63, %v8628_v47 }
0x1304   : > { %v5309_v2 = vsel %vm5306_vm2, %v5307_v55, %v5308_v0  ;;  %v5313_v22 = vadd.f32 %v5308_v0, %v5295_v38  ;;  %v5325_v7 = vsel %vm5322_vm4, %v5323_v61, %v5324_v1  ;;  %v5341_v18 = vsel %vm5338_vm8, %v5339_v59, %v5340_v39 }
0x1305   : > { %v5312_v52 = vadd.f32 %v5309_v2, %v5294_v53  ;;  %v5357_v25 = vsel %vm5354_vm9, %v5355_v40, %v5356_v13  ;;  %v5450_v8 = vrot.slane %v5287_v63, %v8631_v33  ;;  %v5373_v56 = vsel %vm5370_vm10, %v5371_v16, %v5372_v42 }
0x1306   : > { %v5329_v43 = vadd.f32 %v5324_v1, %v5313_v22  ;;  %v5403_v9 = vrot.slane %v5399_v24, 7  ;;  %v5422_v48 = vmul.f32 %v5420_v49, %v8677_v19  ;;  %v5465_v35 = vrot.slane %v5287_v63, %v8636_v58 }
0x1307   : > { %v5328_v11 = vadd.f32 %v5325_v7, %v5312_v52  ;;  %v5480_v4 = vrot.slane %v5287_v63, %v8640_v37  ;;  %v5495_v55 = vrot.slane %v5287_v63, %v8646_v41  ;;  %v5389_v51 = vsel %vm5386_vm11, %v5387_v14, %v5388_v46 }
0x1308   : > { %v5345_v15 = vadd.f32 %v5340_v39, %v5329_v43  ;;  %v5421_v61 = vmul.f32 %v5420_v49, %v8649_v26  ;;  %v5437_v32 = vmul.f32 %v5435_v5, %v8677_v19  ;;  %v5436_v38 = vmul.f32 %v5435_v5, %v8649_v26 }
0x1309   : > { %v5344_v20 = vadd.f32 %v5341_v18, %v5328_v11  ;;  %v5452_v0 = vmul.f32 %v5450_v8, %v8677_v19  ;;  %v5510_v1 = vrot.slane %v5287_v63, %v8654_v44  ;;  %v5404_v30 = vsel %vm2198_vm5, %v5402_v29, %v5403_v9 }
0x130a   : > { %v5361_v27 = vadd.f32 %v5356_v13, %v5345_v15  ;;  %v5414_v60 = vmul.f32 %v5412_v23, %v8677_v19  ;;  %v5426_v62 = vrot.slane %v5422_v48, 1  ;;  %v5413_v22 = vmul.f32 %v5412_v23, %v8649_v26 }
0x130b   : > { %v5360_v21 = vadd.f32 %v5357_v25, %v5344_v20  ;;  %v5451_v39 = vmul.f32 %v5450_v8, %v8649_v26  ;;  %v5525_v45 = vrot.slane %v8692_v50, %v7787_v31  ;;  %v5425_v40 = vrot.slane %v5421_v61, 1 }
0x130c   : > { %v5377_v57 = vadd.f32 %v5372_v42, %v5361_v27  ;;  %v5441_v3 = vrot.slane %v5437_v32, 2  ;;  %v5467_v7 = vmul.f32 %v5465_v35, %v8677_v19  ;;  %v5440_v43 = vrot.slane %v5436_v38, 2 }
0x130d   : > { %v5376_v28 = vadd.f32 %v5373_v56, %v5360_v21  ;;  %v5456_v13 = vrot.slane %v5452_v0, 3  ;;  %v5533_v6 = vrot.slane %v8692_v50, %v7794_v36  ;;  %v5427_v11 = vsel %vm5306_vm2, %v5425_v40, %v5426_v62 }
0x130e   : > { %v5393_v53 = vadd.f32 %v5388_v46, %v5377_v57  ;;  %v5466_v10 = vmul.f32 %v5465_v35, %v8649_v26  ;;  %v5482_v18 = vmul.f32 %v5480_v4, %v8677_v19  ;;  %v5455_v42 = vrot.slane %v5451_v39, 3 }
0x130f   : > { %v5392_v54 = vadd.f32 %v5389_v51, %v5376_v28  ;;  %v5481_v24 = vmul.f32 %v5480_v4, %v8649_v26  ;;  %v5548_v20 = vrot.slane %v8692_v50, %v8628_v47  ;;  %v5442_v14 = vsel %vm5322_vm4, %v5440_v43, %v5441_v3 }
0x1310   : > { %v5408_v59 = vadd.f32 %v5403_v9, %v5393_v53  ;;  %v5471_v25 = vrot.slane %v5467_v7, 4  ;;  %v5497_v27 = vmul.f32 %v5495_v55, %v8677_v19  ;;  %v5457_v49 = vsel %vm5338_vm8, %v5455_v42, %v5456_v13 }
0x1311   : > { %v5407_v2 = vadd.f32 %v5404_v30, %v5392_v54  ;;  %v5496_v21 = vmul.f32 %v5495_v55, %v8649_v26  ;;  %v5563_v29 = vrot.slane %v8692_v50, %v8631_v33  ;;  %v5470_v8 = vrot.slane %v5466_v10, 4 }
0x1312   : > { %v5416_v52 = vadd.f32 %v5414_v60, %v5408_v59  ;;  %v5486_v56 = vrot.slane %v5482_v18, 5  ;;  %v5512_v57 = vmul.f32 %v5510_v1, %v8677_v19  ;;  %v5485_v48 = vrot.slane %v5481_v24, 5  ;;  %v5289_v24 = vld [vmem:[%s8928_s14 + $0x18] sm:$0x7f] }
0x1313   : > { %v5415_v63 = vadd.f32 %v5413_v22, %v5407_v2  ;;  %v5535_v28 = vmul.f32 %v8460_v34, %v5533_v6  ;;  %v5578_v35 = vrot.slane %v8692_v50, %v8636_v58  ;;  %v5472_v4 = vsel %vm5354_vm9, %v5470_v8, %v5471_v25 }
0x1314   : > { %v5431_v16 = vadd.f32 %v5426_v62, %v5416_v52  ;;  %v5501_v53 = vrot.slane %v5497_v27, 6  ;;  %v5511_v55 = vmul.f32 %v5510_v1, %v8649_v26  ;;  %v5500_v32 = vrot.slane %v5496_v21, 6 }
0x1315   : > { %v5430_v15 = vadd.f32 %v5427_v11, %v5415_v63  ;;  %v5550_v54 = vmul.f32 %v8460_v34, %v5548_v20  ;;  %v5593_v38 = vrot.slane %v8692_v50, %v8640_v37  ;;  %v5487_v0 = vsel %vm5370_vm10, %v5485_v48, %v5486_v56 }
0x1316   : > { %v5446_v23 = vadd.f32 %v5441_v3, %v5431_v16  ;;  %v5516_v59 = vrot.slane %v5512_v57, 7  ;;  %v5534_v60 = vmul.f32 %v5533_v6, %v8677_v19  ;;  %v5527_v2 = vmul.f32 %v8460_v34, %v5525_v45 }
0x1317   : > { %v5445_v46 = vadd.f32 %v5442_v14, %v5430_v15  ;;  %v5565_v22 = vmul.f32 %v8460_v34, %v5563_v29  ;;  %v5608_v26 = vrot.slane %v8692_v50, %v8646_v41  ;;  %v5502_v1 = vsel %vm5386_vm11, %v5500_v32, %v5501_v53 }
0x1318   : > { %v5461_v5 = vadd.f32 %v5456_v13, %v5446_v23  ;;  %v5515_v52 = vrot.slane %v5511_v55, 7  ;;  %v5549_v40 = vmul.f32 %v5548_v20, %v8677_v19  ;;  %v5539_v7 = vrot.slane %v5535_v28, 1 }
0x1319   : > { %v5460_v9 = vadd.f32 %v5457_v49, %v5445_v46  ;;  %v5580_v63 = vmul.f32 %v8460_v34, %v5578_v35  ;;  %v5623_v43 = vrot.slane %v8692_v50, %v8654_v44  ;;  %v5538_v11 = vrot.slane %v5534_v60, 1 }
0x131a   : > { %v5476_v51 = vadd.f32 %v5471_v25, %v5461_v5  ;;  %v5517_v13 = vsel %vm2198_vm5, %v5515_v52, %v5516_v59  ;;  %v5564_v16 = vmul.f32 %v5563_v29, %v8677_v19  ;;  %v5526_v18 = vmul.f32 %v5525_v45, %v8677_v19 }
0x131b   : > { %v5475_v61 = vadd.f32 %v5472_v4, %v5460_v9  ;;  %v5554_v15 = vrot.slane %v5550_v54, 2  ;;  %v5595_v42 = vmul.f32 %v8460_v34, %v5593_v38  ;;  %v5553_v14 = vrot.slane %v5549_v40, 2  ;;  %v5285_v9 = vld [vmem:[#allocation2 + $0x20] sm:$0x7f] }
0x131c   : > { %v5491_v30 = vadd.f32 %v5486_v56, %v5476_v51  ;;  %v5569_v23 = vrot.slane %v5565_v22, 3  ;;  %v5579_v44 = vmul.f32 %v5578_v35, %v8677_v19  ;;  %v5584_v25 = vrot.slane %v5580_v63, 4 }
0x131d   : > { %v5490_v62 = vadd.f32 %v5487_v0, %v5475_v61  ;;  %v5610_v27 = vmul.f32 %v8460_v34, %v5608_v26  ;;  %v5625_v46 = vmul.f32 %v8460_v34, %v5623_v43  ;;  %v5540_v45 = vsel %vm5306_vm2, %v5538_v11, %v5539_v7 }
0x131e   : > { %v5506_v39 = vadd.f32 %v5501_v53, %v5491_v30  ;;  %v5568_v21 = vrot.slane %v5564_v16, 3  ;;  %v5594_v29 = vmul.f32 %v5593_v38, %v8677_v19  ;;  %v5599_v8 = vrot.slane %v5595_v42, 5 }
0x131f   : > { %v5505_v3 = vadd.f32 %v5502_v1, %v5490_v62  ;;  %v5638_v56 = vrot.slane %v5289_v24, %v7787_v31  ;;  %v5646_v57 = vrot.slane %v5289_v24, %v7794_v36  ;;  %v5555_v48 = vsel %vm5322_vm4, %v5553_v14, %v5554_v15 }
0x1320   : > { %v5521_v6 = vadd.f32 %v5516_v59, %v5506_v39  ;;  %v5583_v35 = vrot.slane %v5579_v44, 4  ;;  %v5609_v4 = vmul.f32 %v5608_v26, %v8677_v19  ;;  %v5614_v53 = vrot.slane %v5610_v27, 6 }
0x1321   : > { %v5520_v10 = vadd.f32 %v5517_v13, %v5505_v3  ;;  %v5629_v55 = vrot.slane %v5625_v46, 7  ;;  %v5661_v61 = vrot.slane %v5289_v24, %v8628_v47  ;;  %v5570_v32 = vsel %vm5338_vm8, %v5568_v21, %v5569_v23 }
0x1322   : > { %v5529_v20 = vadd.f32 %v5527_v2, %v5521_v6  ;;  %v5598_v38 = vrot.slane %v5594_v29, 5  ;;  %v5624_v0 = vmul.f32 %v5623_v43, %v8677_v19  ;;  %v5647_v59 = vmul.f32 %v8460_v34, %v5646_v57 }
0x1323   : > { %v5528_v50 = vadd.f32 %v5526_v18, %v5520_v10  ;;  %v5648_v60 = vmul.f32 %v5646_v57, %v5285_v9  ;;  %v5676_v62 = vrot.slane %v5289_v24, %v8631_v33  ;;  %v5585_v2 = vsel %vm5354_vm9, %v5583_v35, %v5584_v25 }
0x1324   : > { %v5544_v49 = vadd.f32 %v5539_v7, %v5529_v20  ;;  %v5613_v26 = vrot.slane %v5609_v4, 6  ;;  %v5639_v1 = vmul.f32 %v8460_v34, %v5638_v56  ;;  %v5662_v47 = vmul.f32 %v8460_v34, %v5661_v61 }
0x1325   : > { %v5543_v5 = vadd.f32 %v5540_v45, %v5528_v50  ;;  %v5663_v52 = vmul.f32 %v5661_v61, %v5285_v9  ;;  %v5691_v40 = vrot.slane %v5289_v24, %v8636_v58  ;;  %v5600_v19 = vsel %vm5370_vm10, %v5598_v38, %v5599_v8 }
0x1326   : > { %v5559_v28 = vadd.f32 %v5554_v15, %v5544_v49  ;;  %v5628_v7 = vrot.slane %v5624_v0, 7  ;;  %v5640_v63 = vmul.f32 %v5638_v56, %v5285_v9  ;;  %v5651_v13 = vrot.slane %v5647_v59, 1 }
0x1327   : > { %v5558_v51 = vadd.f32 %v5555_v48, %v5543_v5  ;;  %v5652_v33 = vrot.slane %v5648_v60, 1  ;;  %v5677_v6 = vmul.f32 %v8460_v34, %v5676_v62  ;;  %v5615_v11 = vsel %vm5386_vm11, %v5613_v26, %v5614_v53  ;;  %v6539_v26 = vld [vmem:[%s8930_s16] ss:$0 sm:$0xff] }
0x1328   : > { %v5574_v54 = vadd.f32 %v5569_v23, %v5559_v28  ;;  %v5678_v10 = vmul.f32 %v5676_v62, %v5285_v9  ;;  %v5706_v18 = vrot.slane %v5289_v24, %v8640_v37  ;;  %v5666_v42 = vrot.slane %v5662_v47, 2  ;;  %v6538_v62 = vld [vmem:[%s8929_s15] ss:$0 sm:$0xff]  ;;  %v6540_v47 = vld [vmem:[%s8930_s16 + $0x1] ss:$0 sm:$0xff] }
0x1329   : > { %v5573_v30 = vadd.f32 %v5570_v32, %v5558_v51  ;;  %v5667_v20 = vrot.slane %v5663_v52, 2  ;;  %v5692_v58 = vmul.f32 %v8460_v34, %v5691_v40  ;;  %v5630_v14 = vsel %vm2198_vm5, %v5628_v7, %v5629_v55 }
0x132a   : > { %v5589_v22 = vadd.f32 %v5584_v25, %v5574_v54  ;;  %v5693_v44 = vmul.f32 %v5691_v40, %v5285_v9  ;;  %v5721_v50 = vrot.slane %v5289_v24, %v8646_v41  ;;  %v5653_v27 = vsel %vm5306_vm2, %v5651_v13, %v5652_v33 }
0x132b   : > { %v5588_v39 = vadd.f32 %v5585_v2, %v5573_v30  ;;  %v5681_v46 = vrot.slane %v5677_v6, 3  ;;  %v5682_v49 = vrot.slane %v5678_v10, 3  ;;  %v5707_v21 = vmul.f32 %v8460_v34, %v5706_v18 }
0x132c   : > { %v5604_v3 = vadd.f32 %v5599_v8, %v5589_v22  ;;  %v5708_v37 = vmul.f32 %v5706_v18, %v5285_v9  ;;  %v5668_v5 = vsel %vm5322_vm4, %v5666_v42, %v5667_v20  ;;  %v5696_v8 = vrot.slane %v5692_v58, 4  ;;  %v6543_v42 = vld [vmem:[%s8932_s18] ss:$0 sm:$0xff] }
0x132d   : > { %v5603_v43 = vadd.f32 %v5600_v19, %v5588_v39  ;;  %v5697_v57 = vrot.slane %v5693_v44, 4  ;;  %v5722_v48 = vmul.f32 %v8460_v34, %v5721_v50  ;;  %v5723_v28 = vmul.f32 %v5721_v50, %v5285_v9 }
0x132e   : > { %v5619_v16 = vadd.f32 %v5614_v53, %v5604_v3  ;;  %v5683_v24 = vsel %vm5338_vm8, %v5681_v46, %v5682_v49  ;;  %v5711_v4 = vrot.slane %v5707_v21, 5  ;;  %v5712_v51 = vrot.slane %v5708_v37, 5 }
0x132f   : > { %v5618_v15 = vadd.f32 %v5615_v11, %v5603_v43  ;;  %v5698_v61 = vsel %vm5354_vm9, %v5696_v8, %v5697_v57  ;;  %v5726_v32 = vrot.slane %v5722_v48, 6  ;;  %v5727_v54 = vrot.slane %v5723_v28, 6  ;;  %v7451_v48 = vld [vmem:[%s8934_s20] ss:$8 sps:$4 sm:$0xff]   ;;  %v7453_v28 = vld [vmem:[%s8934_s20 + $0x4] ss:$8 sps:$4 sm:$0xff]  }
0x1330   : > { %v5634_v23 = vadd.f32 %v5629_v55, %v5619_v16  ;;  %v5713_v30 = vsel %vm5370_vm10, %v5711_v4, %v5712_v51  ;;  %5988 = vmatprep.subr.bf16.mxu1 %v7453_v28  ;;  %v7457_v4 = vld [vmem:[%s8934_s20 + $0x20] ss:$8 sps:$4 sm:$0xff]  }
0x1331   : > { %v5633_v25 = vadd.f32 %v5630_v14, %v5618_v15  ;;  %v5728_v34 = vsel %vm5386_vm11, %v5726_v32, %v5727_v54  ;;  %5989 = vmatpush1.bf16.msra.mxu1 %v7451_v48 }
0x1332   : > { %v5642_v45 = vadd.f32 %v5640_v63, %v5634_v23 }
0x1333   : > { %v5641_v29 = vadd.f32 %v5639_v1, %v5633_v25 }
0x1334   : > { %v5657_v56 = vadd.f32 %v5652_v33, %v5642_v45 }
0x1335   : > { %v5656_v35 = vadd.f32 %v5653_v27, %v5641_v29 }
0x1336   : > { %v5672_v41 = vadd.f32 %v5667_v20, %v5657_v56 }
0x1337   : > { %v5671_v53 = vadd.f32 %v5668_v5, %v5656_v35  ;;  %v7456_v35 = vld [vmem:[%s8934_s20 + $0x14] ss:$8 sps:$4 sm:$0xff]  }
0x1338   : > { %v5687_v55 = vadd.f32 %v5682_v49, %v5672_v41  ;;  %v7454_v41 = vld [vmem:[%s8934_s20 + $0x10] ss:$8 sps:$4 sm:$0xff]   ;;  %5990 = vmatprep.subr.bf16.mxu1 %v7456_v35 }
0x1339   : > { %v5686_v38 = vadd.f32 %v5683_v24, %v5671_v53  ;;  %v7459_v24 = vld [vmem:[%s8934_s20 + $0x24] ss:$8 sps:$4 sm:$0xff]   ;;  %5991 = vmatpush1.bf16.msra.mxu1 %v7454_v41  ;;  %v7460_v53 = vld [vmem:[%s8934_s20 + $0x30] ss:$8 sps:$4 sm:$0xff]  }
0x133a   : > { %v5702_v0 = vadd.f32 %v5697_v57, %v5687_v55  ;;  %5992 = vmatprep.subr.bf16.mxu1 %v7459_v24 }
0x133b   : > { %v5701_v59 = vadd.f32 %v5698_v61, %v5686_v38 }
0x133c   : > { %v5717_v60 = vadd.f32 %v5712_v51, %v5702_v0  ;;  %v7462_v51 = vld [vmem:[%s8934_s20 + $0x34] ss:$8 sps:$4 sm:$0xff]  }
0x133d   : > { %v5716_v9 = vadd.f32 %v5713_v30, %v5701_v59  ;;  %5993 = vmatpush1.bf16.msra.mxu1 %v7457_v4  ;;  %v5885_v30 = vld [vmem:[%s8933_s19] sm:$0x3] }
0x133e   : > { %v5732_v2 = vadd.f32 %v5727_v54, %v5717_v60  ;;  %5994 = vmatprep.subr.bf16.mxu1 %v7462_v51  ;;  %v5915_v59 = vrot.slane %v5885_v30, %v7787_v31 }
0x133f   : > { %v5731_v22 = vadd.f32 %v5728_v34, %v5716_v9 }
0x1340   : > { %v5741_v1 = vadd.f32 %v6538_v62, %v5732_v2 }
0x1341   : > { %v5740_v39 = vadd.f32 %v6538_v62, %v5731_v22  ;;  %5995 = vmatpush1.bf16.msra.mxu1 %v7460_v53  ;;  %v5921_v22 = vrot.slane %v5885_v30, %v7794_v36 }
0x1342   : > { %v5748_v52 = vmul.f32 %v6539_v26, %v5741_v1 }
0x1343   : > { %v5747_v40 = vmul.f32 %v6539_v26, %v5740_v39 }
0x1344   : > { %v5755_v19 = vadd.f32 %v6540_v47, %v5748_v52  ;;  %v7463_v52 = vld [vmem:[%s8936_s22 + $0x40] sm:$0xff]  }
0x1345   : > { %v5754_v3 = vadd.f32 %v6540_v47, %v5747_v40  ;;  %v7464_v40 = vld [vmem:[%s8936_s22] sm:$0xff]   ;;  %6762 = vmatprep.subr.bf16.mxu1 %v7463_v52 }
0x1346   : > { %v6542_v7 = vmul.f32 -1.442695, %v5755_v19 }
0x1347   : > { %v6541_v63 = vmul.f32 -1.442695, %v5754_v3 }
0x1348   : > { %7547 = vpow2.f32 %v6542_v7  ;;  %v7467_v7 = vld [vmem:[%s8936_s22 + $0x50] sm:$0xff]  }
0x1349   : > { %7549 = vpow2.f32 %v6541_v63  ;;  %v7468_v63 = vld [vmem:[%s8936_s22 + $0x10] sm:$0xff]  }
0x1352   : > { %v7548_v43 = vpop.eup %7547 }
0x1353   : > { %v7550_v13 = vpop.eup %7549  ;;  %v5763_v33 = vadd.f32 1.0, %v7548_v43  ;;  %v7469_v43 = vld [vmem:[%s8936_s22 + $0x58] sm:$0xff]  }
0x1354   : > { %v5762_v6 = vadd.f32 1.0, %v7550_v13  ;;  %v7470_v13 = vld [vmem:[%s8936_s22 + $0x18] sm:$0xff]  }
0x1355   : > { %7551 = vrcp.f32 %v5763_v33  ;;  %v7471_v33 = vld [vmem:[%s8936_s22 + $0x60] sm:$0xff]  }
0x1356   : > { %7553 = vrcp.f32 %v5762_v6  ;;  %v7472_v6 = vld [vmem:[%s8936_s22 + $0x20] sm:$0xff]  }
0x135f   : > { %v7552_v11 = vpop.eup %7551 }
0x1360   : > { %v7554_v16 = vpop.eup %7553  ;;  %v5769_v10 = vmul.f32 %v7552_v11, %v5755_v19  ;;  %v7465_v19 = vld [vmem:[%s8936_s22 + $0x48] sm:$0xff]  }
0x1361   : > { %v5768_v18 = vmul.f32 %v7554_v16, %v5754_v3  ;;  %v7466_v3 = vld [vmem:[%s8936_s22 + $0x8] sm:$0xff]  }
0x1362   : > { %v7473_v11 = vld [vmem:[%s8936_s22 + $0x68] sm:$0xff]  }
0x1363   : > { %v5786_v15 = vpack.c.bf16 %v5769_v10, %v5768_v18  ;;  %v7474_v16 = vld [vmem:[%s8936_s22 + $0x28] sm:$0xff]   ;;  %v7475_v10 = vld [vmem:[%s8936_s22 + $0x70] sm:$0xff]  }
0x1364   : > { %v7476_v18 = vld [vmem:[%s8936_s22 + $0x30] sm:$0xff]  }
0x1365   : > { %7121 = vmatmul.mubr.bf16.vlgmr.msra.gmra.mrb[60].mxu0 %v5786_v15  ;;  %v7477_v15 = vld [vmem:[%s8936_s22 + $0x78] sm:$0xff]  }
0x1438   : > { %v5876_v20 = vpop.f32.mrb[60].mxu0 }
0x1439   : > { %v5877_v58 = vadd.f32 %v6543_v42, %v5876_v20  ;;  %v7122_v14 = vpop.f32.mrb[61].mxu0  ;;  %v5933_v20 = vld [vmem:[%s8935_s21] sm:$0x3] }
0x143a   : > { %v5879_v23 = vpop.f32.mrb[62].mxu0  ;;  %v5942_v14 = vrot.slane %v5933_v20, %v7794_v36 }
0x143b   : > { %v8794_v44 = vadd.f32 %v5877_v58, %v8544_v12  ;;  %v5880_v50 = vadd.f32 %v6543_v42, %v5879_v23  ;;  %v7123_v25 = vpop.f32.mrb[63].mxu0  ;;  %v7478_v42 = vld [vmem:[%s8936_s22 + $0x38] sm:$0xff]   ;;  %v5938_v58 = vrot.slane %v5933_v20, %v7787_v31 }
0x143d   : > { %v8797_v27 = vadd.f32 %v5880_v50, %v8547_v17  ;;  %v5886_v46 = vsel %vm769_vm0, %v8794_v44, 0.0 }
0x143e   : > { %5887 = vadd.xlane.f32.xlu1 %v5886_v46 }
0x143f   : > { %v5889_v45 = vsel %vm773_vm1, %v8797_v27, 0.0 }
0x1440   : > { %5890 = vadd.xlane.f32.xlu0 %v5889_v45 }
0x14cb   : > { %v5888_v49 = vpop.xlane.xlu1 %5887 }
0x14cc   : > { %v5892_v21 = vmul.f32 0.015625, %v5888_v49 }
0x14cd   : > { %v5891_v37 = vpop.xlane.xlu0 %5890 }
0x14ce   : > { %v5894_v29 = vsub.f32 %v8794_v44, %v5892_v21  ;;  %v5893_v12 = vmul.f32 0.015625, %v5891_v37 }
0x14d0   : > { %v5895_v5 = vsub.f32 %v8797_v27, %v5893_v12  ;;  %v5896_v8 = vmul.f32 %v5894_v29, %v5894_v29 }
0x14d2   : > { %v5898_v17 = vsel %vm769_vm0, %v5896_v8, 0.0  ;;  %v5897_v56 = vmul.f32 %v5895_v5, %v5895_v5 }
0x14d3   : > { %5899 = vadd.xlane.f32.xlu1 %v5898_v17 }
0x14d4   : > { %v5901_v57 = vsel %vm773_vm1, %v5897_v56, 0.0 }
0x14d5   : > { %5902 = vadd.xlane.f32.xlu0 %v5901_v57 }
0x1560   : > { %v5900_v55 = vpop.xlane.xlu1 %5899 }
0x1561   : > { %v5904_v61 = vmul.f32 0.015625, %v5900_v55 }
0x1562   : > { %v5903_v32 = vpop.xlane.xlu0 %5902 }
0x1563   : > { %v5906_v54 = vadd.f32 1e-05, %v5904_v61  ;;  %v5905_v38 = vmul.f32 0.015625, %v5903_v32 }
0x1565   : > { %7555 = vrsqrt.f32 %v5906_v54  ;;  %v5907_v0 = vadd.f32 1e-05, %v5905_v38 }
0x1567   : > { %7557 = vrsqrt.f32 %v5907_v0 }
0x156f   : > { %v7556_v60 = vpop.eup %7555 }
0x1570   : > { %v5910_v34 = vmul.f32 %v7556_v60, %v5894_v29  ;;  %v6565_v60 = vld [vmem:[%s8937_s23] ss:$0 sm:$0xff] }
0x1571   : > { %v7558_v9 = vpop.eup %7557 }
0x1572   : > { %v5916_v62 = vmul.f32 %v5915_v59, %v5910_v34  ;;  %v5911_v2 = vmul.f32 %v7558_v9, %v5895_v5 }
0x1574   : > { %v5917_v26 = vmul.f32 %v5915_v59, %v5911_v2  ;;  %v5922_v1 = vadd.f32 %v5921_v22, %v5916_v62 }
0x1576   : > { %v5923_v39 = vadd.f32 %v5921_v22, %v5917_v26 }
0x1578   : > { %v5932_v47 = vpack.c.bf16 %v5923_v39, %v5922_v1 }
0x157a   : > { %6560 = vmatmul.mubr.msk.bf16.vlgmr.msra.gmra.mrb[52].mxu1 %vm769_vm0, %v5932_v47 }
0x157b   : > { %6763 = vmatpush3.bf16.msra.mxu1 %v7464_v40 }
0x157c   : > { %6764 = vmatprep.subr.bf16.mxu1 %v7465_v19 }
0x157f   : > { %6765 = vmatpush3.bf16.msra.mxu1 %v7466_v3 }
0x1580   : > { %6766 = vmatprep.subr.bf16.mxu1 %v7467_v7 }
0x1583   : > { %6767 = vmatpush3.bf16.msra.mxu1 %v7468_v63 }
0x1584   : > { %6768 = vmatprep.subr.bf16.mxu1 %v7469_v43 }
0x1587   : > { %6769 = vmatpush3.bf16.msra.mxu1 %v7470_v13 }
0x1588   : > { %6770 = vmatprep.subr.bf16.mxu1 %v7471_v33 }
0x158b   : > { %6771 = vmatpush3.bf16.msra.mxu1 %v7472_v6 }
0x158c   : > { %6772 = vmatprep.subr.bf16.mxu1 %v7473_v11 }
0x158f   : > { %6773 = vmatpush3.bf16.msra.mxu1 %v7474_v16 }
0x1590   : > { %6774 = vmatprep.subr.bf16.mxu1 %v7475_v10 }
0x1593   : > { %6775 = vmatpush3.bf16.msra.mxu1 %v7476_v18 }
0x1594   : > { %6776 = vmatprep.subr.bf16.mxu1 %v7477_v15 }
0x1597   : > { %6777 = vmatpush3.bf16.msra.mxu1 %v7478_v42 }
0x164d   : > { %v6022_v23 = vpop.f32.mrb[52].mxu1 }
0x164e   : > { %v6023_v50 = vadd.f32 %v6022_v23, %v5938_v58  ;;  %v6024_v25 = vpop.f32.mrb[53].mxu1 }
0x164f   : > { %v6025_v46 = vadd.f32 %v6024_v25, %v5942_v14  ;;  %v6026_v45 = vpop.f32.mrb[54].mxu1 }
0x1650   : > { %v6561_v49 = vmul.f32 -1.442695, %v6023_v50  ;;  %v6027_v21 = vadd.f32 %v6026_v45, %v5938_v58  ;;  %v6028_v37 = vpop.f32.mrb[55].mxu1 }
0x1651   : > { %v6562_v29 = vmul.f32 -1.442695, %v6025_v46  ;;  %v6029_v12 = vadd.f32 %v6028_v37, %v5942_v14  ;;  %v6241_v14 = vld [vmem:[%s8938_s24] sm:$0x3] }
0x1652   : > { %7559 = vpow2.f32 %v6561_v49  ;;  %v6563_v5 = vmul.f32 -1.442695, %v6027_v21  ;;  %v6271_v23 = vrot.slane %v6241_v14, %v7787_v31  ;;  %v6277_v25 = vrot.slane %v6241_v14, %v7794_v36 }
0x1653   : > { %7561 = vpow2.f32 %v6562_v29  ;;  %v6564_v8 = vmul.f32 -1.442695, %v6029_v12 }
0x1654   : > { %7563 = vpow2.f32 %v6563_v5 }
0x1655   : > { %7565 = vpow2.f32 %v6564_v8 }
0x165c   : > { %v7560_v17 = vpop.eup %7559 }
0x165d   : > { %v7562_v56 = vpop.eup %7561  ;;  %v6043_v57 = vadd.f32 1.0, %v7560_v17 }
0x165e   : > { %v7564_v48 = vpop.eup %7563  ;;  %v6044_v28 = vadd.f32 1.0, %v7562_v56 }
0x165f   : > { %v7566_v35 = vpop.eup %7565  ;;  %7567 = vrcp.f32 %v6043_v57  ;;  %v6045_v41 = vadd.f32 1.0, %v7564_v48 }
0x1660   : > { %7569 = vrcp.f32 %v6044_v28  ;;  %v6046_v24 = vadd.f32 1.0, %v7566_v35 }
0x1661   : > { %7571 = vrcp.f32 %v6045_v41 }
0x1662   : > { %7573 = vrcp.f32 %v6046_v24 }
0x1669   : > { %v7568_v4 = vpop.eup %7567 }
0x166a   : > { %v7570_v51 = vpop.eup %7569  ;;  %v6055_v61 = vmul.f32 %v7568_v4, %v6023_v50 }
0x166b   : > { %v7572_v53 = vpop.eup %7571  ;;  %v6056_v54 = vmul.f32 %v7570_v51, %v6025_v46 }
0x166c   : > { %v7574_v55 = vpop.eup %7573  ;;  %v6057_v32 = vmul.f32 %v7572_v53, %v6027_v21 }
0x166d   : > { %v6058_v38 = vmul.f32 %v7574_v55, %v6029_v12 }
0x166e   : > { %v6091_v0 = vpack.c.bf16 %v6057_v32, %v6055_v61 }
0x166f   : > { %v6092_v30 = vpack.c.bf16 %v6058_v38, %v6056_v54 }
0x1671   : > { %6228 = vmatprep.mubr.bf16.mxu1 %v6092_v30 }
0x1672   : > { %6229 = vmatmul.mubr.bf16.vlgmr.msra.gmra.mrb[56].mxu1 %v6091_v0 }
0x1745   : > { %v6778_v59 = vpop.f32.mrb[56].mxu1 }
0x1746   : > { %v6779_v34 = vpop.f32.mrb[57].mxu1 }
0x1747   : > { %v6780_v9 = vadd.f32 %v6779_v34, %v6778_v59  ;;  %v6781_v62 = vpop.f32.mrb[58].mxu1 }
0x1748   : > { %v6782_v2 = vpop.f32.mrb[59].mxu1 }
0x1749   : > { %v6231_v22 = vadd.f32 %v6780_v9, %v6565_v60  ;;  %v6783_v26 = vadd.f32 %v6782_v2, %v6781_v62 }
0x174b   : > { %v6237_v1 = vmul.f32 0.5, %v6231_v22  ;;  %v6234_v39 = vadd.f32 %v6783_v26, %v6565_v60 }
0x174d   : > { %v6238_v47 = vmul.f32 0.5, %v6234_v39  ;;  %v6239_v52 = vadd.f32 %v6237_v1, %v8794_v44 }
0x174f   : > { %v6242_v40 = vsel %vm769_vm0, %v6239_v52, 0.0  ;;  %v6240_v19 = vadd.f32 %v6238_v47, %v8797_v27 }
0x1750   : > { %6243 = vadd.xlane.f32.xlu1 %v6242_v40 }
0x1751   : > { %v6245_v3 = vsel %vm773_vm1, %v6240_v19, 0.0 }
0x1752   : > { %6246 = vadd.xlane.f32.xlu0 %v6245_v3 }
0x17dd   : > { %v6244_v7 = vpop.xlane.xlu1 %6243 }
0x17de   : > { %v6248_v63 = vmul.f32 0.015625, %v6244_v7 }
0x17df   : > { %v6247_v43 = vpop.xlane.xlu0 %6246 }
0x17e0   : > { %v6250_v13 = vsub.f32 %v6239_v52, %v6248_v63  ;;  %v6249_v33 = vmul.f32 0.015625, %v6247_v43 }
0x17e2   : > { %v6251_v6 = vsub.f32 %v6240_v19, %v6249_v33  ;;  %v6252_v11 = vmul.f32 %v6250_v13, %v6250_v13 }
0x17e4   : > { %v6254_v16 = vsel %vm769_vm0, %v6252_v11, 0.0  ;;  %v6253_v10 = vmul.f32 %v6251_v6, %v6251_v6 }
0x17e5   : > { %6255 = vadd.xlane.f32.xlu1 %v6254_v16 }
0x17e6   : > { %v6257_v44 = vsel %vm773_vm1, %v6253_v10, 0.0 }
0x17e7   : > { %6258 = vadd.xlane.f32.xlu0 %v6257_v44 }
0x1872   : > { %v6256_v18 = vpop.xlane.xlu1 %6255 }
0x1873   : > { %v6260_v27 = vmul.f32 0.015625, %v6256_v18 }
0x1874   : > { %v6259_v15 = vpop.xlane.xlu0 %6258 }
0x1875   : > { %v6262_v42 = vadd.f32 1e-05, %v6260_v27  ;;  %v6261_v20 = vmul.f32 0.015625, %v6259_v15 }
0x1877   : > { %7575 = vrsqrt.f32 %v6262_v42  ;;  %v6263_v58 = vadd.f32 1e-05, %v6261_v20 }
0x1879   : > { %7577 = vrsqrt.f32 %v6263_v58 }
0x1881   : > { %v7576_v50 = vpop.eup %7575 }
0x1882   : > { %v6266_v46 = vmul.f32 %v7576_v50, %v6250_v13 }
0x1883   : > { %v7578_v45 = vpop.eup %7577 }
0x1884   : > { %v6272_v49 = vmul.f32 %v6271_v23, %v6266_v46  ;;  %v6267_v21 = vmul.f32 %v7578_v45, %v6251_v6 }
0x1886   : > { %v6278_v37 = vadd.f32 %v6277_v25, %v6272_v49  ;;  %v6273_v29 = vmul.f32 %v6271_v23, %v6267_v21 }
0x1888   : > { %6280 = vst.msk [vmem:[%s764_s28] sm:$0xff] %vm769_vm0, %v6278_v37  ;;  %v6279_v12 = vadd.f32 %v6277_v25, %v6273_v29 }
0x188a   : > { %6281 = vst.msk [vmem:[%s764_s28 + $0x8] sm:$0x1] %vm773_vm1, %v6279_v12 }
0x188b PF: > { %s35_s29 = sadd.s32 1, %s7586_s29  }
0x188c   : > { %p32_p4 = scmp.ge.s32.totalorder %s35_s29, 4  }
0x188e   :  { %34 = sbr.rel (!%p32_p4) target bundleno = 11 (0xb), region = 150 }

</bundles_post_ra>
